<compile_context>
chip_gen: v5e
topology: v5e:2x2
jax: 0.10.0
libtpu: 0.0.40
codegen_flags: <defaults>
</compile_context>

<pallas_src>
import numpy as np
import jax
import jax.numpy as jnp
from jax import lax
from jax.experimental import pallas as pl
from jax.experimental.pallas import tpu as pltpu

POOL_SIZES = (1, 2, 4, 6)


# ---------------- host-side constant builders (trace-time numpy) -------------

def _adaptive_pool_matrix(out_size, in_size):
    """PyTorch AdaptiveAvgPool window rule as a dense (out, in) averaging matrix."""
    m = np.zeros((out_size, in_size), np.float32)
    for i in range(out_size):
        s = (i * in_size) // out_size
        e = -((-(i + 1) * in_size) // out_size)  # ceil
        m[i, s:e] = 1.0 / (e - s)
    return m


def _bilinear_up_matrix(out_size, in_size):
    """align_corners=True bilinear interpolation as a dense (out, in) matrix."""
    m = np.zeros((out_size, in_size), np.float32)
    if in_size == 1:
        m[:, 0] = 1.0
        return m
    if out_size == 1:
        m[0, 0] = 1.0
        return m
    for h in range(out_size):
        src = h * (in_size - 1) / (out_size - 1)
        i0 = int(np.floor(src))
        i1 = min(i0 + 1, in_size - 1)
        w1 = src - i0
        m[h, i0] += 1.0 - w1
        m[h, i1] += w1
    return m


def _maxpool_select_matrix(H, W):
    """(4*HW4, HW) 0/1 matrix: row k*HW4 + p selects corner k of 2x2 window p."""
    H2, W2 = H // 2, W // 2
    HW4 = H2 * W2
    S = np.zeros((4 * HW4, H * W), np.float32)
    for h2 in range(H2):
        for j in range(W2):
            p = h2 * W2 + j
            corners = ((2 * h2) * W + 2 * j, (2 * h2) * W + 2 * j + 1,
                       (2 * h2 + 1) * W + 2 * j, (2 * h2 + 1) * W + 2 * j + 1)
            for k, src in enumerate(corners):
                S[k * HW4 + p, src] = 1.0
    return S


def _build_constants(H, W, Cout):
    P_blocks = [np.kron(_adaptive_pool_matrix(ps, H), _adaptive_pool_matrix(ps, W))
                for ps in POOL_SIZES]
    U_blocks = [np.kron(_bilinear_up_matrix(H, ps), _bilinear_up_matrix(W, ps))
                for ps in POOL_SIZES]
    P_all = np.concatenate(P_blocks, axis=0)          # (R, HW), R = sum ps^2 = 57
    U_cat = np.concatenate(U_blocks, axis=1)          # (HW, R)
    R = P_all.shape[0]
    mask = np.zeros((R, 4 * Cout), np.float32)        # keep branch-i rows only in slab i
    r0 = 0
    for i, ps in enumerate(POOL_SIZES):
        mask[r0:r0 + ps * ps, i * Cout:(i + 1) * Cout] = 1.0
        r0 += ps * ps
    sel = _maxpool_select_matrix(H, W)                # (4*HW4, HW)
    return (jnp.asarray(P_all), jnp.asarray(U_cat),
            jnp.asarray(mask), jnp.asarray(sel))


# ------------------------------- Pallas kernel --------------------------------

def _make_gcm_kernel(HW4, inter):
    def kernel(x_ref, pall_ref, ucat_ref, mask_ref, sel_ref,
               w4_ref, b4_ref, wc_ref, bc_ref, wtpg_ref, btpg_ref,
               ww_ref, bw_ref, bns_ref, bnb_ref, o_ref):
        x = x_ref[0]                                                    # (HW, Cin)

        # ---- four AdaptiveAvgPool -> conv1x1 -> ReLU -> bilinear-up branches,
        #      stacked into wide MXU matmuls (N = 4*Cout lanes) ---------------
        pooled = jnp.dot(pall_ref[...], x,
                         preferred_element_type=jnp.float32)            # (R, Cin)
        conv = jnp.dot(pooled, w4_ref[...],
                       preferred_element_type=jnp.float32) + b4_ref[...]
        act = jnp.maximum(conv, 0.0) * mask_ref[...]                    # zero cross-branch terms
        up4 = jnp.dot(ucat_ref[...], act,
                      preferred_element_type=jnp.float32)               # (HW, 4*Cout)

        # ---- NonLocal branch: conv1x1 + ReLU, fused theta/phi/g projection --
        feat = jnp.maximum(
            jnp.dot(x, wc_ref[...], preferred_element_type=jnp.float32)
            + bc_ref[...], 0.0)                                          # (HW, Cout)
        tpg = jnp.dot(feat, wtpg_ref[...],
                      preferred_element_type=jnp.float32) + btpg_ref[...]  # (HW, 3*inter)
        theta = tpg[:, :inter]                                           # (HW, inter)
        pg = tpg[:, inter:]                                              # (HW, 2*inter) = phi || g

        # MaxPool2d(2,2) on phi,g without any HBM round trip: one 0/1 selection
        # matmul gathers the 4 corners of every window, then 3 elementwise maxima.
        win = jnp.dot(sel_ref[...], pg,
                      preferred_element_type=jnp.float32)                # (4*HW4, 2*inter)
        pooled_pg = jnp.maximum(
            jnp.maximum(win[0:HW4], win[HW4:2 * HW4]),
            jnp.maximum(win[2 * HW4:3 * HW4], win[3 * HW4:4 * HW4]))     # (HW4, 2*inter)
        phi_p = pooled_pg[:, :inter]
        g_p = pooled_pg[:, inter:]

        # attention: theta @ phi_p^T via dot_general (no materialized transpose)
        scores = lax.dot_general(theta, phi_p, (((1,), (1,)), ((), ())),
                                 preferred_element_type=jnp.float32)     # (HW, HW4)
        m = jnp.max(scores, axis=-1, keepdims=True)
        e = jnp.exp(scores - m)
        p = e * pl.reciprocal(jnp.sum(e, axis=-1, keepdims=True), approx=True)
        y = jnp.dot(p, g_p, preferred_element_type=jnp.float32)          # (HW, inter)
        wy = jnp.dot(y, ww_ref[...],
                     preferred_element_type=jnp.float32) + bw_ref[...]   # (HW, Cout)
        z = wy * bns_ref[...] + bnb_ref[...] + feat                      # folded BN + residual

        # single lane-dense (HW, 5*Cout) store
        o_ref[0] = jnp.concatenate([up4, z], axis=-1)

    return kernel


# ------------------------------- glue / wrapper --------------------------------

def init_params(key, cin, cout):
    inter = max(cout // 2, 1)
    keys = jax.random.split(key, 9)

    def conv(k, ci, co):
        kw, kb = jax.random.split(k)
        w = jax.random.normal(kw, (ci, co), jnp.float32) * (1.0 / np.sqrt(ci))
        b = jax.random.normal(kb, (1, co), jnp.float32) * 0.01
        return w, b

    return {
        "gc": [conv(keys[i], cin, cout) for i in range(4)],   # pooled-branch 1x1 convs
        "nl_conv": conv(keys[4], cin, cout),                  # conv before NonLocal
        "theta": conv(keys[5], cout, inter),
        "phi": conv(keys[6], cout, inter),
        "g": conv(keys[7], cout, inter),
        "nl_w": conv(keys[8], inter, cout),
        # BatchNorm2d after W: (gamma, beta, running_mean, running_var, eps).
        # Module init sets gamma=0, beta=0 (stats 0/1) -> folded scale/bias == 0,
        # so the NonLocal output equals its input, exactly as in PyTorch.
        "nl_bn": (jnp.zeros((1, cout), jnp.float32),
                  jnp.zeros((1, cout), jnp.float32),
                  jnp.zeros((1, cout), jnp.float32),
                  jnp.ones((1, cout), jnp.float32),
                  1e-5),
    }


def gcm_forward(x_nchw, params):
    B, Cin, H, W = x_nchw.shape
    HW = H * W
    HW4 = (H // 2) * (W // 2)
    Cout = params["nl_conv"][0].shape[1]
    inter = params["theta"][0].shape[1]

    P_all, U_cat, mask, sel = _build_constants(H, W, Cout)
    R = P_all.shape[0]

    # stacked / folded weights
    w4 = jnp.concatenate([w for (w, _) in params["gc"]], axis=1)          # (Cin, 4*Cout)
    b4 = jnp.concatenate([b for (_, b) in params["gc"]], axis=1)          # (1, 4*Cout)
    wc, bc = params["nl_conv"]
    wtpg = jnp.concatenate([params["theta"][0], params["phi"][0], params["g"][0]], axis=1)
    btpg = jnp.concatenate([params["theta"][1], params["phi"][1], params["g"][1]], axis=1)
    ww, bw = params["nl_w"]
    gamma, beta, mean, var, eps = params["nl_bn"]
    bn_scale = gamma / jnp.sqrt(var + eps)                                # (1, Cout)
    bn_bias = beta - mean * bn_scale

    x = jnp.transpose(x_nchw, (0, 2, 3, 1)).reshape(B, HW, Cin)           # (B, HW, Cin)

    def full(shape):
        n = len(shape)
        return pl.BlockSpec(shape, lambda b, _n=n: (0,) * _n)

    kernel = _make_gcm_kernel(HW4, inter)

    out = pl.pallas_call(
        kernel,
        out_shape=jax.ShapeDtypeStruct((B, HW, 5 * Cout), jnp.float32),
        grid=(B,),
        in_specs=[
            pl.BlockSpec((1, HW, Cin), lambda b: (b, 0, 0)),
            full((R, HW)), full((HW, R)), full((R, 4 * Cout)), full((4 * HW4, HW)),
            full((Cin, 4 * Cout)), full((1, 4 * Cout)),
            full((Cin, Cout)), full((1, Cout)),
            full((Cout, 3 * inter)), full((1, 3 * inter)),
            full((inter, Cout)), full((1, Cout)),
            full((1, Cout)), full((1, Cout)),
        ],
        out_specs=pl.BlockSpec((1, HW, 5 * Cout), lambda b: (b, 0, 0)),
        compiler_params=pltpu.CompilerParams(
            dimension_semantics=("parallel",)),
    )(x, P_all, U_cat, mask, sel, w4, b4, wc, bc, wtpg, btpg, ww, bw, bn_scale, bn_bias)

    return jnp.transpose(out.reshape(B, H, W, 5 * Cout), (0, 3, 1, 2))    # NCHW


# ------------------------------------ main --------------------------------------

if __name__ == "__main__":
    key = jax.random.PRNGKey(0)
    kx, kp = jax.random.split(key)

    B, Cin, H, W = 2, 16, 16, 16
    Cout = 32                                   # out_channels of GCM (5*Cout = 160 lanes)

    x = jax.random.normal(kx, (B, Cin, H, W), jnp.float32)
    params = init_params(kp, Cin, Cout)

    out = jax.block_until_ready(jax.jit(gcm_forward)(x, params))

    assert out.shape == (B, 5 * Cout, H, W), out.shape
    assert bool(jnp.all(jnp.isfinite(out)))
    print("KERNEL_OK")
</pallas_src>

<mosaic_0001>
module attributes {stable_mosaic.version = 11 : i64} {
  func.func @kernel(%arg0: i32, %arg1: memref<1x256x16xf32, #tpu.memory_space<vmem>>, %arg2: memref<57x256xf32, #tpu.memory_space<vmem>>, %arg3: memref<256x57xf32, #tpu.memory_space<vmem>>, %arg4: memref<57x128xf32, #tpu.memory_space<vmem>>, %arg5: memref<256x256xf32, #tpu.memory_space<vmem>>, %arg6: memref<16x128xf32, #tpu.memory_space<vmem>>, %arg7: memref<1x128xf32, #tpu.memory_space<vmem>>, %arg8: memref<16x32xf32, #tpu.memory_space<vmem>>, %arg9: memref<1x32xf32, #tpu.memory_space<vmem>>, %arg10: memref<32x48xf32, #tpu.memory_space<vmem>>, %arg11: memref<1x48xf32, #tpu.memory_space<vmem>>, %arg12: memref<16x32xf32, #tpu.memory_space<vmem>>, %arg13: memref<1x32xf32, #tpu.memory_space<vmem>>, %arg14: memref<1x32xf32, #tpu.memory_space<vmem>>, %arg15: memref<1x32xf32, #tpu.memory_space<vmem>>, %arg16: memref<1x256x160xf32, #tpu.memory_space<vmem>>) attributes {dimension_semantics = [#tpu.dimension_semantics<parallel>], iteration_bounds = array<i64: 2>, scalar_prefetch = 0 : i64, scratch_operands = 0 : i64, tpu.core_type = #tpu.core_type<tc>, window_params = [{transform_indices = @transform_0, window_bounds = array<i64: 1, 256, 16>}, {pipeline_mode = #tpu.pipeline_mode<synchronous>, transform_indices = @transform_1, window_bounds = array<i64: 57, 256>}, {pipeline_mode = #tpu.pipeline_mode<synchronous>, transform_indices = @transform_2, window_bounds = array<i64: 256, 57>}, {pipeline_mode = #tpu.pipeline_mode<synchronous>, transform_indices = @transform_3, window_bounds = array<i64: 57, 128>}, {pipeline_mode = #tpu.pipeline_mode<synchronous>, transform_indices = @transform_4, window_bounds = array<i64: 256, 256>}, {pipeline_mode = #tpu.pipeline_mode<synchronous>, transform_indices = @transform_5, window_bounds = array<i64: 16, 128>}, {pipeline_mode = #tpu.pipeline_mode<synchronous>, transform_indices = @transform_6, window_bounds = array<i64: 1, 128>}, {pipeline_mode = #tpu.pipeline_mode<synchronous>, transform_indices = @transform_7, window_bounds = array<i64: 16, 32>}, {pipeline_mode = #tpu.pipeline_mode<synchronous>, transform_indices = @transform_8, window_bounds = array<i64: 1, 32>}, {pipeline_mode = #tpu.pipeline_mode<synchronous>, transform_indices = @transform_9, window_bounds = array<i64: 32, 48>}, {pipeline_mode = #tpu.pipeline_mode<synchronous>, transform_indices = @transform_10, window_bounds = array<i64: 1, 48>}, {pipeline_mode = #tpu.pipeline_mode<synchronous>, transform_indices = @transform_11, window_bounds = array<i64: 16, 32>}, {pipeline_mode = #tpu.pipeline_mode<synchronous>, transform_indices = @transform_12, window_bounds = array<i64: 1, 32>}, {pipeline_mode = #tpu.pipeline_mode<synchronous>, transform_indices = @transform_13, window_bounds = array<i64: 1, 32>}, {pipeline_mode = #tpu.pipeline_mode<synchronous>, transform_indices = @transform_14, window_bounds = array<i64: 1, 32>}, {transform_indices = @transform_15, window_bounds = array<i64: 1, 256, 160>}]} {
    %c0 = arith.constant 0 : index
    %c0_0 = arith.constant 0 : index
    %c0_1 = arith.constant 0 : index
    %0 = vector.load %arg1[%c0, %c0_0, %c0_1] : memref<1x256x16xf32, #tpu.memory_space<vmem>>, vector<1x256x16xf32>
    %1 = vector.shape_cast %0 : vector<1x256x16xf32> to vector<256x16xf32>
    %c0_2 = arith.constant 0 : index
    %c0_3 = arith.constant 0 : index
    %2 = vector.load %arg2[%c0_2, %c0_3] : memref<57x256xf32, #tpu.memory_space<vmem>>, vector<57x256xf32>
    %cst = arith.constant dense<0.000000e+00> : vector<57x16xf32>
    %3 = tpu.matmul %2, %1, %cst {dimension_numbers = #tpu.dot_dimension_numbers<[1], [0], [0], [1], [0, 0, 1, 1], [], []>} : vector<57x256xf32>, vector<256x16xf32>, vector<57x16xf32> -> vector<57x16xf32>
    %c0_4 = arith.constant 0 : index
    %c0_5 = arith.constant 0 : index
    %4 = vector.load %arg6[%c0_4, %c0_5] : memref<16x128xf32, #tpu.memory_space<vmem>>, vector<16x128xf32>
    %cst_6 = arith.constant dense<0.000000e+00> : vector<57x128xf32>
    %5 = tpu.matmul %3, %4, %cst_6 {dimension_numbers = #tpu.dot_dimension_numbers<[1], [0], [0], [1], [0, 0, 1, 1], [], []>} : vector<57x16xf32>, vector<16x128xf32>, vector<57x128xf32> -> vector<57x128xf32>
    %c0_7 = arith.constant 0 : index
    %c0_8 = arith.constant 0 : index
    %6 = vector.load %arg7[%c0_7, %c0_8] : memref<1x128xf32, #tpu.memory_space<vmem>>, vector<1x128xf32>
    %7 = vector.broadcast %6 : vector<1x128xf32> to vector<57x128xf32>
    %8 = arith.addf %5, %7 : vector<57x128xf32>
    %cst_9 = arith.constant 0.000000e+00 : f32
    %9 = vector.broadcast %cst_9 : f32 to vector<57x128xf32>
    %10 = arith.maximumf %8, %9 : vector<57x128xf32>
    %c0_10 = arith.constant 0 : index
    %c0_11 = arith.constant 0 : index
    %11 = vector.load %arg4[%c0_10, %c0_11] : memref<57x128xf32, #tpu.memory_space<vmem>>, vector<57x128xf32>
    %12 = arith.mulf %10, %11 : vector<57x128xf32>
    %c0_12 = arith.constant 0 : index
    %c0_13 = arith.constant 0 : index
    %13 = vector.load %arg3[%c0_12, %c0_13] : memref<256x57xf32, #tpu.memory_space<vmem>>, vector<256x57xf32>
    %cst_14 = arith.constant dense<0.000000e+00> : vector<256x128xf32>
    %14 = tpu.matmul %13, %12, %cst_14 {dimension_numbers = #tpu.dot_dimension_numbers<[1], [0], [0], [1], [0, 0, 1, 1], [], []>} : vector<256x57xf32>, vector<57x128xf32>, vector<256x128xf32> -> vector<256x128xf32>
    %c0_15 = arith.constant 0 : index
    %c0_16 = arith.constant 0 : index
    %15 = vector.load %arg8[%c0_15, %c0_16] : memref<16x32xf32, #tpu.memory_space<vmem>>, vector<16x32xf32>
    %cst_17 = arith.constant dense<0.000000e+00> : vector<256x32xf32>
    %16 = tpu.matmul %1, %15, %cst_17 {dimension_numbers = #tpu.dot_dimension_numbers<[1], [0], [0], [1], [0, 0, 1, 1], [], []>} : vector<256x16xf32>, vector<16x32xf32>, vector<256x32xf32> -> vector<256x32xf32>
    %c0_18 = arith.constant 0 : index
    %c0_19 = arith.constant 0 : index
    %17 = vector.load %arg9[%c0_18, %c0_19] : memref<1x32xf32, #tpu.memory_space<vmem>>, vector<1x32xf32>
    %18 = vector.broadcast %17 : vector<1x32xf32> to vector<256x32xf32>
    %19 = arith.addf %16, %18 : vector<256x32xf32>
    %cst_20 = arith.constant 0.000000e+00 : f32
    %20 = vector.broadcast %cst_20 : f32 to vector<256x32xf32>
    %21 = arith.maximumf %19, %20 : vector<256x32xf32>
    %c0_21 = arith.constant 0 : index
    %c0_22 = arith.constant 0 : index
    %22 = vector.load %arg10[%c0_21, %c0_22] : memref<32x48xf32, #tpu.memory_space<vmem>>, vector<32x48xf32>
    %cst_23 = arith.constant dense<0.000000e+00> : vector<256x48xf32>
    %23 = tpu.matmul %21, %22, %cst_23 {dimension_numbers = #tpu.dot_dimension_numbers<[1], [0], [0], [1], [0, 0, 1, 1], [], []>} : vector<256x32xf32>, vector<32x48xf32>, vector<256x48xf32> -> vector<256x48xf32>
    %c0_24 = arith.constant 0 : index
    %c0_25 = arith.constant 0 : index
    %24 = vector.load %arg11[%c0_24, %c0_25] : memref<1x48xf32, #tpu.memory_space<vmem>>, vector<1x48xf32>
    %25 = vector.broadcast %24 : vector<1x48xf32> to vector<256x48xf32>
    %26 = arith.addf %23, %25 : vector<256x48xf32>
    %27 = vector.extract_strided_slice %26 {offsets = [0, 0], sizes = [256, 16], strides = [1, 1]} : vector<256x48xf32> to vector<256x16xf32>
    %28 = vector.extract_strided_slice %26 {offsets = [0, 16], sizes = [256, 32], strides = [1, 1]} : vector<256x48xf32> to vector<256x32xf32>
    %c0_26 = arith.constant 0 : index
    %c0_27 = arith.constant 0 : index
    %29 = vector.load %arg5[%c0_26, %c0_27] : memref<256x256xf32, #tpu.memory_space<vmem>>, vector<256x256xf32>
    %cst_28 = arith.constant dense<0.000000e+00> : vector<256x32xf32>
    %30 = tpu.matmul %29, %28, %cst_28 {dimension_numbers = #tpu.dot_dimension_numbers<[1], [0], [0], [1], [0, 0, 1, 1], [], []>} : vector<256x256xf32>, vector<256x32xf32>, vector<256x32xf32> -> vector<256x32xf32>
    %31 = vector.extract_strided_slice %30 {offsets = [0, 0], sizes = [64, 32], strides = [1, 1]} : vector<256x32xf32> to vector<64x32xf32>
    %32 = vector.extract_strided_slice %30 {offsets = [64, 0], sizes = [64, 32], strides = [1, 1]} : vector<256x32xf32> to vector<64x32xf32>
    %33 = arith.maximumf %31, %32 : vector<64x32xf32>
    %34 = vector.extract_strided_slice %30 {offsets = [128, 0], sizes = [64, 32], strides = [1, 1]} : vector<256x32xf32> to vector<64x32xf32>
    %35 = vector.extract_strided_slice %30 {offsets = [192, 0], sizes = [64, 32], strides = [1, 1]} : vector<256x32xf32> to vector<64x32xf32>
    %36 = arith.maximumf %34, %35 : vector<64x32xf32>
    %37 = arith.maximumf %33, %36 : vector<64x32xf32>
    %38 = vector.extract_strided_slice %37 {offsets = [0, 0], sizes = [64, 16], strides = [1, 1]} : vector<64x32xf32> to vector<64x16xf32>
    %39 = vector.extract_strided_slice %37 {offsets = [0, 16], sizes = [64, 16], strides = [1, 1]} : vector<64x32xf32> to vector<64x16xf32>
    %cst_29 = arith.constant dense<0.000000e+00> : vector<256x64xf32>
    %40 = tpu.matmul %27, %38, %cst_29 {dimension_numbers = #tpu.dot_dimension_numbers<[1], [1], [0], [0], [0, 0, 1, 0], [], []>} : vector<256x16xf32>, vector<64x16xf32>, vector<256x64xf32> -> vector<256x64xf32>
    %cst_30 = arith.constant dense<0xFF800000> : vector<256xf32>
    %41 = vector.multi_reduction <maximumf>, %40, %cst_30 [1] : vector<256x64xf32> to vector<256xf32>
    %42 = vector.shape_cast %41 : vector<256xf32> to vector<256x1xf32>
    %43 = vector.broadcast %42 : vector<256x1xf32> to vector<256x64xf32>
    %44 = arith.subf %40, %43 : vector<256x64xf32>
    %45 = math.exp %44 : vector<256x64xf32>
    %cst_31 = arith.constant dense<0.000000e+00> : vector<256xf32>
    %46 = vector.multi_reduction <add>, %45, %cst_31 [1] : vector<256x64xf32> to vector<256xf32>
    %47 = vector.shape_cast %46 : vector<256xf32> to vector<256x1xf32>
    %48 = tpu.reciprocal %47 {approx = true} : vector<256x1xf32> -> vector<256x1xf32>
    %49 = vector.broadcast %48 : vector<256x1xf32> to vector<256x64xf32>
    %50 = arith.mulf %45, %49 : vector<256x64xf32>
    %cst_32 = arith.constant dense<0.000000e+00> : vector<256x16xf32>
    %51 = tpu.matmul %50, %39, %cst_32 {dimension_numbers = #tpu.dot_dimension_numbers<[1], [0], [0], [1], [0, 0, 1, 1], [], []>} : vector<256x64xf32>, vector<64x16xf32>, vector<256x16xf32> -> vector<256x16xf32>
    %c0_33 = arith.constant 0 : index
    %c0_34 = arith.constant 0 : index
    %52 = vector.load %arg12[%c0_33, %c0_34] : memref<16x32xf32, #tpu.memory_space<vmem>>, vector<16x32xf32>
    %cst_35 = arith.constant dense<0.000000e+00> : vector<256x32xf32>
    %53 = tpu.matmul %51, %52, %cst_35 {dimension_numbers = #tpu.dot_dimension_numbers<[1], [0], [0], [1], [0, 0, 1, 1], [], []>} : vector<256x16xf32>, vector<16x32xf32>, vector<256x32xf32> -> vector<256x32xf32>
    %c0_36 = arith.constant 0 : index
    %c0_37 = arith.constant 0 : index
    %54 = vector.load %arg13[%c0_36, %c0_37] : memref<1x32xf32, #tpu.memory_space<vmem>>, vector<1x32xf32>
    %55 = vector.broadcast %54 : vector<1x32xf32> to vector<256x32xf32>
    %56 = arith.addf %53, %55 : vector<256x32xf32>
    %c0_38 = arith.constant 0 : index
    %c0_39 = arith.constant 0 : index
    %57 = vector.load %arg14[%c0_38, %c0_39] : memref<1x32xf32, #tpu.memory_space<vmem>>, vector<1x32xf32>
    %58 = vector.broadcast %57 : vector<1x32xf32> to vector<256x32xf32>
    %59 = arith.mulf %56, %58 : vector<256x32xf32>
    %c0_40 = arith.constant 0 : index
    %c0_41 = arith.constant 0 : index
    %60 = vector.load %arg15[%c0_40, %c0_41] : memref<1x32xf32, #tpu.memory_space<vmem>>, vector<1x32xf32>
    %61 = vector.broadcast %60 : vector<1x32xf32> to vector<256x32xf32>
    %62 = arith.addf %59, %61 : vector<256x32xf32>
    %63 = arith.addf %62, %21 : vector<256x32xf32>
    %64 = tpu.concatenate %14, %63 in 1 : vector<256x128xf32>, vector<256x32xf32> -> vector<256x160xf32>
    %c0_42 = arith.constant 0 : index
    %c0_43 = arith.constant 0 : index
    %c0_44 = arith.constant 0 : index
    %65 = vector.load %arg16[%c0_42, %c0_43, %c0_44] : memref<1x256x160xf32, #tpu.memory_space<vmem>>, vector<1x256x160xf32>
    %66 = vector.shape_cast %65 : vector<1x256x160xf32> to vector<256x160xf32>
    %67 = vector.shape_cast %64 : vector<256x160xf32> to vector<1x256x160xf32>
    tpu.vector_store %arg16[%c0_42, %c0_43, %c0_44], %67 {strides = array<i32>} : memref<1x256x160xf32, #tpu.memory_space<vmem>>, vector<1x256x160xf32>,
    return
  }
  func.func @transform_0(%arg0: i32) -> (i32, i32, i32) {
    %c0_i32 = arith.constant 0 : i32
    %c0_i32_0 = arith.constant 0 : i32
    %c0_i32_1 = arith.constant 0 : i32
    return %arg0, %c0_i32, %c0_i32_0 : i32, i32, i32
  }
  func.func @transform_1(%arg0: i32) -> (i32, i32) {
    %c0_i32 = arith.constant 0 : i32
    %c0_i32_0 = arith.constant 0 : i32
    %c0_i32_1 = arith.constant 0 : i32
    return %c0_i32, %c0_i32_0 : i32, i32
  }
  func.func @transform_2(%arg0: i32) -> (i32, i32) {
    %c0_i32 = arith.constant 0 : i32
    %c0_i32_0 = arith.constant 0 : i32
    %c0_i32_1 = arith.constant 0 : i32
    return %c0_i32, %c0_i32_0 : i32, i32
  }
  func.func @transform_3(%arg0: i32) -> (i32, i32) {
    %c0_i32 = arith.constant 0 : i32
    %c0_i32_0 = arith.constant 0 : i32
    %c0_i32_1 = arith.constant 0 : i32
    return %c0_i32, %c0_i32_0 : i32, i32
  }
  func.func @transform_4(%arg0: i32) -> (i32, i32) {
    %c0_i32 = arith.constant 0 : i32
    %c0_i32_0 = arith.constant 0 : i32
    %c0_i32_1 = arith.constant 0 : i32
    return %c0_i32, %c0_i32_0 : i32, i32
  }
  func.func @transform_5(%arg0: i32) -> (i32, i32) {
    %c0_i32 = arith.constant 0 : i32
    %c0_i32_0 = arith.constant 0 : i32
    %c0_i32_1 = arith.constant 0 : i32
    return %c0_i32, %c0_i32_0 : i32, i32
  }
  func.func @transform_6(%arg0: i32) -> (i32, i32) {
    %c0_i32 = arith.constant 0 : i32
    %c0_i32_0 = arith.constant 0 : i32
    %c0_i32_1 = arith.constant 0 : i32
    return %c0_i32, %c0_i32_0 : i32, i32
  }
  func.func @transform_7(%arg0: i32) -> (i32, i32) {
    %c0_i32 = arith.constant 0 : i32
    %c0_i32_0 = arith.constant 0 : i32
    %c0_i32_1 = arith.constant 0 : i32
    return %c0_i32, %c0_i32_0 : i32, i32
  }
  func.func @transform_8(%arg0: i32) -> (i32, i32) {
    %c0_i32 = arith.constant 0 : i32
    %c0_i32_0 = arith.constant 0 : i32
    %c0_i32_1 = arith.constant 0 : i32
    return %c0_i32, %c0_i32_0 : i32, i32
  }
  func.func @transform_9(%arg0: i32) -> (i32, i32) {
    %c0_i32 = arith.constant 0 : i32
    %c0_i32_0 = arith.constant 0 : i32
    %c0_i32_1 = arith.constant 0 : i32
    return %c0_i32, %c0_i32_0 : i32, i32
  }
  func.func @transform_10(%arg0: i32) -> (i32, i32) {
    %c0_i32 = arith.constant 0 : i32
    %c0_i32_0 = arith.constant 0 : i32
    %c0_i32_1 = arith.constant 0 : i32
    return %c0_i32, %c0_i32_0 : i32, i32
  }
  func.func @transform_11(%arg0: i32) -> (i32, i32) {
    %c0_i32 = arith.constant 0 : i32
    %c0_i32_0 = arith.constant 0 : i32
    %c0_i32_1 = arith.constant 0 : i32
    return %c0_i32, %c0_i32_0 : i32, i32
  }
  func.func @transform_12(%arg0: i32) -> (i32, i32) {
    %c0_i32 = arith.constant 0 : i32
    %c0_i32_0 = arith.constant 0 : i32
    %c0_i32_1 = arith.constant 0 : i32
    return %c0_i32, %c0_i32_0 : i32, i32
  }
  func.func @transform_13(%arg0: i32) -> (i32, i32) {
    %c0_i32 = arith.constant 0 : i32
    %c0_i32_0 = arith.constant 0 : i32
    %c0_i32_1 = arith.constant 0 : i32
    return %c0_i32, %c0_i32_0 : i32, i32
  }
  func.func @transform_14(%arg0: i32) -> (i32, i32) {
    %c0_i32 = arith.constant 0 : i32
    %c0_i32_0 = arith.constant 0 : i32
    %c0_i32_1 = arith.constant 0 : i32
    return %c0_i32, %c0_i32_0 : i32, i32
  }
  func.func @transform_15(%arg0: i32) -> (i32, i32, i32) {
    %c0_i32 = arith.constant 0 : i32
    %c0_i32_0 = arith.constant 0 : i32
    %c0_i32_1 = arith.constant 0 : i32
    return %arg0, %c0_i32, %c0_i32_0 : i32, i32, i32
  }
}

</mosaic_0001>

<bundles_post_ra>
// kernel: gcm_forward.1
= control target key start
LH: loop header
LB: loop body
LE: loop exit
PB: predicated region body
PF: predicated region fallthrough
CT: control target
= control target key end

     0   :  { %s5771_s0 = inlined_call_operand.vmem [shape: f32[2,256,16], index: 0, kind: input, shape index: {}]   ;;  %s5772_s1 = inlined_call_operand.vmem [shape: f32[57,256], index: 1, kind: input, shape index: {}]   ;;  %s5773_s2 = inlined_call_operand.vmem [shape: f32[256,57], index: 2, kind: input, shape index: {}]   ;;  %s5774_s3 = inlined_call_operand.vmem [shape: f32[57,128], index: 3, kind: input, shape index: {}]   ;;  %s5775_s4 = inlined_call_operand.vmem [shape: f32[256,256], index: 4, kind: input, shape index: {}]   ;;  %s5776_s5 = inlined_call_operand.vmem [shape: f32[16,128], index: 5, kind: input, shape index: {}]   ;;  %s5777_s6 = inlined_call_operand.vmem [shape: f32[1,128], index: 6, kind: input, shape index: {}]   ;;  %s5778_s7 = inlined_call_operand.vmem [shape: f32[16,32], index: 7, kind: input, shape index: {}]   ;;  %s5779_s8 = inlined_call_operand.vmem [shape: f32[1,32], index: 8, kind: input, shape index: {}]   ;;  %s5780_s9 = inlined_call_operand.vmem [shape: f32[32,48], index: 9, kind: input, shape index: {}]   ;;  %s5781_s10 = inlined_call_operand.vmem [shape: f32[1,48], index: 10, kind: input, shape index: {}]   ;;  %s5782_s11 = inlined_call_operand.vmem [shape: f32[16,32], index: 11, kind: input, shape index: {}]   ;;  %s5783_s12 = inlined_call_operand.vmem [shape: f32[1,32], index: 12, kind: input, shape index: {}]   ;;  %s5784_s13 = inlined_call_operand.vmem [shape: f32[1,32], index: 13, kind: input, shape index: {}]   ;;  %s5785_s14 = inlined_call_operand.vmem [shape: f32[1,32], index: 14, kind: input, shape index: {}]   ;;  %s5786_s15 = inlined_call_operand.hbm [shape: f32[2,256,160], index: 15, kind: output, shape index: {}]  }
   0x1   :  { %5885 = sst [smem:[#allocation68_spill]] %s5771_s0 }
   0x2   :  { %5886 = sst [smem:[#allocation69_spill]] %s5772_s1 }
   0x3   :  { %20 = vsyncpa [#allocation3], 0 }
   0x4   :  { %22 = vsyncpa [#allocation3 + $0x1], 0  ;;  %s3776_s18 = smov 0   ;;  %s3778_s19 = smov 0  }
   0x5   :  { %s3780_s20 = smov 0   ;;  %s3782_s21 = smov 0  }
   0x6 LB: > { %5887 = sst [smem:[#allocation5_spill]] %s3687_s20  ;;  %s3797_s22 = sadd.s32 4294967295, %s3691_s21   ;;  %s3691_s21 = sphi %s3782_s21, %s6050_s21   ;;  %s3687_s20 = sphi %s3780_s20, %s6052_s20   ;;  %s3683_s19 = sphi %s3778_s19, %s6054_s19   ;;  %s3679_s18 = sphi %s3776_s18, %s6053_s18  }
   0x7   : > { %s3120_s23 = sadd.s32 4294967294, %s3691_s21   ;;  %s3801_s24 = sadd.s32 1, %s3691_s21  }
   0x8   : > { %5888 = sst [smem:[#allocation6_spill]] %s3801_s24  ;;  %s355_s25 = sadd.s32 1, %s3687_s20 }
   0x9   : > { %s352_s26 = ssub.s32 %s3691_s21, %s3801_s24  ;;  %p365_p0 = scmp.ne.s32.totalorder %s3687_s20, %s3683_s19 }
   0xa   : > { %p353_p1 = scmp.eq.s32.totalorder %s352_s26, 0  ;;  %p366_p2 = scmp.eq.s32.totalorder %s3797_s22, 1 }
   0xb   : > { %p371_p3 = scmp.ne.s32.totalorder %s3683_s19, %s3679_s18  ;;  %p372_p4 = scmp.eq.s32.totalorder %s3120_s23, 1 }
   0xc   : > { %s3812_s27 = scalar_select %p353_p1, %s3687_s20, %s355_s25  }
   0xd   : > { %p3814_p5 = por %p366_p2, %p365_p0  ;;  %p3818_p6 = por %p372_p4, %p371_p3 }
   0xe   : > { %5889 = sst [smem:[#allocation7_spill]] %s3812_s27  ;;  %p3123_p7 = scmp.ge.s32.totalorder %s3691_s21, 1 }
   0xf   : > { %p440_p8 = scmp.lt.s32.totalorder %s3691_s21, 3 }
  0x11   : > { %p441_p9 = pnand %p3123_p7, %p440_p8 }
  0x13   : > { %444 = sbr.rel (%p441_p9) target bundleno = 2493 (0x9bd), region = 80 }
  0x18   : > { %p488_p10 = scmp.lt.s32.totalorder %s3797_s22, 1  ;;  %s5892_s0 = sld [smem:[#allocation68_spill]]  ;;  %v624_v48 = vld [vmem:[%s5776_s5 + $0x8] sm:$0xff]  ;;  %v623_v49 = vld [vmem:[%s5776_s5] sm:$0xff]  ;;  %vm629_vm0 = vcmask 130048   ;;  %vm848_vm1 = vcmask 1040384  }
  0x19   : > { %s5893_s1 = sld [smem:[#allocation69_spill]]  ;;  %668 = vmatpush.msra.mxu2 %v624_v48  ;;  %v966_v62 = vld [vmem:[%s5778_s7 + $0x8] sm:$0xff]  ;;  %v965_v63 = vld [vmem:[%s5778_s7] sm:$0xff]  ;;  %vm1220_vm2 = vcmask 261120   ;;  %vm751_vm3 = vcmask 465920   ;;  %s5840_s23 = smov 112  }
  0x1a   : > { %s489_s30 = scalar_select %p488_p10, %s3797_s22, 1  ;;  %vm2073_vm4 = vcmask 523264  }
  0x1b   : > { %669 = vmatpush.msra.mxu2 %v623_v49  ;;  %s5839_s24 = sand.u32 1, %s3683_s19   ;;  %s5973_s20 = smov 112  }
  0x1c   : > { %s3341_s16 = sshll.u32 %s489_s30, 8 }
  0x1d   : > { %1081 = vmatpush.msrb.mxu2 %v966_v62 }
  0x1e   : > { %s3829_s25 = scalar_lea.vmem %s5892_s0, %s3341_s16  ;;  %s6049_s16 = sand.u32 1, %s3683_s19  }
  0x1f   : > { %v3832_v0 = vld [vmem:[%s3829_s25 + $0x78] sm:$0xff]  ;;  %v3838_v2 = vld [vmem:[%s3829_s25 + $0x70] sm:$0xff]  ;;  %v3846_v4 = vld [vmem:[%s3829_s25 + $0x68] sm:$0xff]  ;;  %1082 = vmatpush.msrb.mxu2 %v965_v63  ;;  %s3043_s17 = scalar_lea.sflag [#allocation3], %s6049_s16 }
  0x20   : > { %v3835_v1 = vld [vmem:[%s3829_s25 + $0xf8] sm:$0xff]  ;;  %541 = vmatpush.msra.mxu0 %v3832_v0  ;;  %v3843_v3 = vld [vmem:[%s3829_s25 + $0xf0] sm:$0xff]  ;;  %v3849_v5 = vld [vmem:[%s3829_s25 + $0xe8] sm:$0xff] }
  0x21   : > { %582 = vmatpush.msra.mxu1 %v3835_v1  ;;  %v3854_v6 = vld [vmem:[%s3829_s25 + $0x60] sm:$0xff]  ;;  %v3862_v8 = vld [vmem:[%s3829_s25 + $0x58] sm:$0xff]  ;;  %v3870_v10 = vld [vmem:[%s3829_s25 + $0x50] sm:$0xff] }
  0x22   : > { %542 = vmatpush.msra.mxu0 %v3838_v2  ;;  %v3857_v7 = vld [vmem:[%s3829_s25 + $0xe0] sm:$0xff]  ;;  %v3865_v9 = vld [vmem:[%s3829_s25 + $0xd8] sm:$0xff]  ;;  %v3873_v11 = vld [vmem:[%s3829_s25 + $0xd0] sm:$0xff] }
  0x23   : > { %583 = vmatpush.msra.mxu1 %v3843_v3  ;;  %v3878_v12 = vld [vmem:[%s3829_s25 + $0x48] sm:$0xff]  ;;  %v3886_v14 = vld [vmem:[%s3829_s25 + $0x40] sm:$0xff]  ;;  %v3894_v16 = vld [vmem:[%s3829_s25 + $0x38] sm:$0xff] }
  0x24   : > { %543 = vmatpush.msra.mxu0 %v3846_v4  ;;  %v3881_v13 = vld [vmem:[%s3829_s25 + $0xc8] sm:$0xff]  ;;  %v3889_v15 = vld [vmem:[%s3829_s25 + $0xc0] sm:$0xff]  ;;  %v3897_v17 = vld [vmem:[%s3829_s25 + $0xb8] sm:$0xff] }
  0x25   : > { %584 = vmatpush.msra.mxu1 %v3849_v5  ;;  %v3902_v18 = vld [vmem:[%s3829_s25 + $0x30] sm:$0xff]  ;;  %v3910_v20 = vld [vmem:[%s3829_s25 + $0x28] sm:$0xff]  ;;  %v3918_v22 = vld [vmem:[%s3829_s25 + $0x20] sm:$0xff] }
  0x26   : > { %544 = vmatpush.msra.mxu0 %v3854_v6  ;;  %v3905_v19 = vld [vmem:[%s3829_s25 + $0xb0] sm:$0xff]  ;;  %v3913_v21 = vld [vmem:[%s3829_s25 + $0xa8] sm:$0xff]  ;;  %v3921_v23 = vld [vmem:[%s3829_s25 + $0xa0] sm:$0xff] }
  0x27   : > { %585 = vmatpush.msra.mxu1 %v3857_v7  ;;  %v3926_v24 = vld [vmem:[%s3829_s25 + $0x18] sm:$0xff]  ;;  %v3934_v26 = vld [vmem:[%s3829_s25 + $0x10] sm:$0xff]  ;;  %v3942_v28 = vld [vmem:[%s3829_s25 + $0x8] sm:$0xff] }
  0x28   : > { %545 = vmatpush.msra.mxu0 %v3862_v8  ;;  %v3929_v25 = vld [vmem:[%s3829_s25 + $0x98] sm:$0xff]  ;;  %v3937_v27 = vld [vmem:[%s3829_s25 + $0x90] sm:$0xff]  ;;  %v3945_v29 = vld [vmem:[%s3829_s25 + $0x88] sm:$0xff] }
  0x29   : > { %586 = vmatpush.msra.mxu1 %v3865_v9  ;;  %v3950_v30 = vld [vmem:[%s3829_s25] sm:$0xff]  ;;  %v526_v33 = vld [vmem:[%s5893_s1 + $0x8] sm:$0xff]  ;;  %v527_v34 = vld [vmem:[%s5893_s1 + $0x10] sm:$0xff] }
  0x2a   : > { %546 = vmatpush.msra.mxu0 %v3870_v10  ;;  %v3953_v31 = vld [vmem:[%s3829_s25 + $0x80] sm:$0xff]  ;;  %v528_v35 = vld [vmem:[%s5893_s1 + $0x18] sm:$0xff]  ;;  %v530_v37 = vld [vmem:[%s5893_s1 + $0x28] sm:$0xff]  ;;  %s3124_s25 = sshll.u32 %s5839_s24, 9  ;;  %s3649_s24 = scalar_lea.hbm %s5786_s15, 1024 }
  0x2b   : > { %587 = vmatpush.msra.mxu1 %v3873_v11  ;;  %v525_v32 = vld [vmem:[%s5893_s1] sm:$0xff]  ;;  %v531_v38 = vld [vmem:[%s5893_s1 + $0x30] sm:$0xff]  ;;  %v532_v39 = vld [vmem:[%s5893_s1 + $0x38] sm:$0xff]  ;;  %s4558_s26 = scalar_lea.vmem [#allocation2], %s3124_s25  ;;  %s3342_s25 = sshll.u32 %s3797_s22, 9 }
  0x2c   : > { %547 = vmatpush.msra.mxu0 %v3878_v12  ;;  %v529_v36 = vld [vmem:[%s5893_s1 + $0x20] sm:$0xff]  ;;  %v534_v41 = vld [vmem:[%s5893_s1 + $0x48] sm:$0xff]  ;;  %v535_v42 = vld [vmem:[%s5893_s1 + $0x50] sm:$0xff]  ;;  %s3054_s27 = scalar_lea.hbm %s5786_s15, %s3342_s25  ;;  %s3055_s22 = sshll.u32 %s4558_s26, 4  ;;  %s3056_s22 = int_to_ptr.vmem [resolvable:$true] %s3055_s22 }
  0x2d   : > { %588 = vmatpush.msra.mxu1 %v3881_v13  ;;  %v533_v40 = vld [vmem:[%s5893_s1 + $0x40] sm:$0xff]  ;;  %v536_v43 = vld [vmem:[%s5893_s1 + $0x58] sm:$0xff]  ;;  %v538_v45 = vld [vmem:[%s5893_s1 + $0x68] sm:$0xff]  ;;  %s3057_s30 = sshll.u32 %s3054_s27, 4  ;;  %s3058_s30 = int_to_ptr.hbm [resolvable:$true] %s3057_s30 }
  0x2e   : > { %548 = vmatpush.msra.mxu0 %v3886_v14  ;;  %v537_v44 = vld [vmem:[%s5893_s1 + $0x60] sm:$0xff]  ;;  %v539_v46 = vld [vmem:[%s5893_s1 + $0x70] sm:$0x1]  ;;  %v540_v47 = vld [vmem:[%s5893_s1 + $0x78] sm:$0x1]  ;;  %s3643_s1 = sshra.s32 %s3058_s30, 4  ;;  %s3644_s1 = int_to_ptr.hbm [resolvable:$true] %s3643_s1 }
  0x2f   : > { %589 = vmatpush.msra.mxu1 %v3889_v15  ;;  %v706_v63 = vld [vmem:[%s5774_s3 + $0x18] sm:$0xff]  ;;  %p3650_p0 = scmp.lt.s32.totalorder %s3644_s1, %s5786_s15 }
  0x30   : > { %549 = vmatpush.msra.mxu0 %v3894_v16 }
  0x31   : > { %590 = vmatpush.msra.mxu1 %v3897_v17 }
  0x32   : > { %550 = vmatpush.msra.mxu0 %v3902_v18 }
  0x33   : > { %591 = vmatpush.msra.mxu1 %v3905_v19 }
  0x34   : > { %551 = vmatpush.msra.mxu0 %v3910_v20 }
  0x35   : > { %592 = vmatpush.msra.mxu1 %v3913_v21 }
  0x36   : > { %552 = vmatpush.msra.mxu0 %v3918_v22 }
  0x37   : > { %593 = vmatpush.msra.mxu1 %v3921_v23 }
  0x38   : > { %553 = vmatpush.msra.mxu0 %v3926_v24 }
  0x39   : > { %594 = vmatpush.msra.mxu1 %v3929_v25 }
  0x3a   : > { %554 = vmatpush.msra.mxu0 %v3934_v26 }
  0x3b   : > { %595 = vmatpush.msra.mxu1 %v3937_v27 }
  0x3c   : > { %555 = vmatpush.msra.mxu0 %v3942_v28 }
  0x3d   : > { %596 = vmatpush.msra.mxu1 %v3945_v29 }
  0x3e   : > { %556 = vmatpush.msra.mxu0 %v3950_v30 }
  0x3f   : > { %597 = vmatpush.msra.mxu1 %v3953_v31  ;;  %557 = vmatmul.f32.vlgmr.msra.gmra.mxu0 %v525_v32 }
  0x40   : > { %598 = vmatmul.f32.vlgmr.msra.gmra.mxu1 %v526_v33 }
  0x47   : > { %560 = vmatmul.f32.gmra.mxu0 %v527_v34 }
  0x48   : > { %601 = vmatmul.f32.gmra.mxu1 %v528_v35 }
  0x4f   : > { %563 = vmatmul.f32.gmra.mxu0 %v529_v36 }
  0x50   : > { %604 = vmatmul.f32.gmra.mxu1 %v530_v37 }
  0x57   : > { %566 = vmatmul.f32.gmra.mxu0 %v531_v38 }
  0x58   : > { %607 = vmatmul.f32.gmra.mxu1 %v532_v39 }
  0x5f   : > { %569 = vmatmul.f32.gmra.mxu0 %v533_v40 }
  0x60   : > { %610 = vmatmul.f32.gmra.mxu1 %v534_v41 }
  0x67   : > { %572 = vmatmul.f32.gmra.mxu0 %v535_v42 }
  0x68   : > { %613 = vmatmul.f32.gmra.mxu1 %v536_v43 }
  0x6f   : > { %575 = vmatmul.f32.gmra.mxu0 %v537_v44 }
  0x70   : > { %616 = vmatmul.f32.gmra.mxu1 %v538_v45 }
  0x77   : > { %578 = vmatmul.f32.gmra.mxu0 %v539_v46 }
  0x78   : > { %619 = vmatmul.f32.gmra.mxu1 %v540_v47 }
  0xbc   : > { %v558_v50 = vpop.f32.mrf.mxu0 }
  0xbd   : > { %v599_v51 = vpop.f32.mrf.mxu1 }
  0xbe   : > { %v600_v52 = vadd.f32 %v599_v51, %v558_v50 }
  0xc0   : > { %3127 = vmatmul.msk.f32.vlgmr.msra.gmra.mxu2 %vm629_vm0, %v600_v52  ;;  %v4085_v52 = vld [vmem:[%s5779_s8] ss:$0 sm:$0xff] }
  0xc4   : > { %v561_v53 = vpop.f32.mrf.mxu0 }
  0xc5   : > { %v602_v54 = vpop.f32.mrf.mxu1 }
  0xc6   : > { %v603_v55 = vadd.f32 %v602_v54, %v561_v53  ;;  %v708_v53 = vld [vmem:[%s5774_s3 + $0x28] sm:$0xff] }
  0xc8   : > { %3128 = vmatmul.msk.f32.gmra.mxu2 %vm629_vm0, %v603_v55 }
  0xcc   : > { %v564_v56 = vpop.f32.mrf.mxu0 }
  0xcd   : > { %v605_v57 = vpop.f32.mrf.mxu1 }
  0xce   : > { %v606_v58 = vadd.f32 %v605_v57, %v564_v56 }
  0xd0   : > { %3129 = vmatmul.msk.f32.gmra.mxu2 %vm629_vm0, %v606_v58  ;;  %v707_v58 = vld [vmem:[%s5774_s3 + $0x20] sm:$0xff] }
  0xd4   : > { %v567_v59 = vpop.f32.mrf.mxu0 }
  0xd5   : > { %v608_v60 = vpop.f32.mrf.mxu1 }
  0xd6   : > { %v609_v61 = vadd.f32 %v608_v60, %v567_v59 }
  0xd8   : > { %3130 = vmatmul.msk.f32.gmra.mxu2 %vm629_vm0, %v609_v61 }
  0xdc   : > { %v570_v32 = vpop.f32.mrf.mxu0 }
  0xdd   : > { %v611_v33 = vpop.f32.mrf.mxu1 }
  0xde   : > { %v612_v34 = vadd.f32 %v611_v33, %v570_v32 }
  0xe0   : > { %3131 = vmatmul.msk.f32.gmra.mxu2 %vm629_vm0, %v612_v34 }
  0xe4   : > { %v573_v35 = vpop.f32.mrf.mxu0 }
  0xe5   : > { %v614_v36 = vpop.f32.mrf.mxu1 }
  0xe6   : > { %v615_v37 = vadd.f32 %v614_v36, %v573_v35  ;;  %v705_v35 = vld [vmem:[%s5774_s3 + $0x10] sm:$0xff] }
  0xe8   : > { %3132 = vmatmul.msk.f32.gmra.mxu2 %vm629_vm0, %v615_v37 }
  0xec   : > { %v576_v38 = vpop.f32.mrf.mxu0 }
  0xed   : > { %v617_v39 = vpop.f32.mrf.mxu1 }
  0xee   : > { %v618_v40 = vadd.f32 %v617_v39, %v576_v38  ;;  %v704_v38 = vld [vmem:[%s5774_s3 + $0x8] sm:$0xff] }
  0xf0   : > { %3133 = vmatmul.msk.f32.gmra.mxu2 %vm629_vm0, %v618_v40 }
  0xf4   : > { %v579_v41 = vpop.f32.mrf.mxu0 }
  0xf5   : > { %v620_v42 = vpop.f32.mrf.mxu1 }
  0xf6   : > { %v621_v43 = vadd.f32 %v620_v42, %v579_v41  ;;  %v703_v42 = vld [vmem:[%s5774_s3] sm:$0xff] }
  0xf8   : > { %3134 = vmatmul.msk.f32.gmra.mxu2 %vm629_vm0, %v621_v43 }
 0x100   : > { %3168 = vmatmul.msk.f32.vlgmr.msrb.gmra.mxu2 %vm629_vm0, %v3950_v30 }
 0x108   : > { %3169 = vmatmul.msk.f32.gmra.mxu2 %vm629_vm0, %v3942_v28 }
 0x110   : > { %3170 = vmatmul.msk.f32.gmra.mxu2 %vm629_vm0, %v3934_v26  ;;  %v3495_v26 = vld [vmem:[%s5777_s6] ss:$0 sm:$0xff] }
 0x118   : > { %3171 = vmatmul.msk.f32.gmra.mxu2 %vm629_vm0, %v3926_v24 }
 0x120   : > { %3172 = vmatmul.msk.f32.gmra.mxu2 %vm629_vm0, %v3918_v22 }
 0x128   : > { %3173 = vmatmul.msk.f32.gmra.mxu2 %vm629_vm0, %v3910_v20 }
 0x130   : > { %3174 = vmatmul.msk.f32.gmra.mxu2 %vm629_vm0, %v3902_v18 }
 0x138   : > { %3175 = vmatmul.msk.f32.gmra.mxu2 %vm629_vm0, %v3894_v16 }
 0x140   : > { %3176 = vmatmul.msk.f32.gmra.mxu2 %vm629_vm0, %v3886_v14  ;;  %v1215_v14 = vld [vmem:[%s5780_s9 + $0x18] sm:$0xff] }
 0x141   : > { %1329 = vmatpush.msrb.mxu0 %v1215_v14 }
 0x143   : > { %v671_v28 = vpop.f32.mrf.mxu2 }
 0x144   : > { %v672_v62 = vadd.f32 %v3495_v26, %v671_v28 }
 0x146   : > { %v695_v39 = vmax.f32 %v672_v62, 0.0 }
 0x148   : > { %3177 = vmatmul.msk.f32.gmra.mxu2 %vm629_vm0, %v3878_v12  ;;  %v1214_v12 = vld [vmem:[%s5780_s9 + $0x10] sm:$0xff] }
 0x149   : > { %1330 = vmatpush.msrb.mxu0 %v1214_v12 }
 0x14b   : > { %v674_v24 = vpop.f32.mrf.mxu2 }
 0x150   : > { %3178 = vmatmul.msk.f32.gmra.mxu2 %vm629_vm0, %v3870_v10  ;;  %v1213_v10 = vld [vmem:[%s5780_s9 + $0x8] sm:$0xff] }
 0x151   : > { %1331 = vmatpush.msrb.mxu0 %v1213_v10 }
 0x153   : > { %v677_v22 = vpop.f32.mrf.mxu2 }
 0x154   : > { %v678_v54 = vadd.f32 %v3495_v26, %v677_v22 }
 0x156   : > { %v697_v32 = vmax.f32 %v678_v54, 0.0 }
 0x158   : > { %3179 = vmatmul.msk.f32.gmra.mxu2 %vm629_vm0, %v3862_v8  ;;  %v713_v40 = vmul.f32 %v705_v35, %v697_v32 }
 0x15b   : > { %v680_v20 = vpop.f32.mrf.mxu2 }
 0x15c   : > { %v681_v50 = vadd.f32 %v3495_v26, %v680_v20 }
 0x15e   : > { %v698_v59 = vmax.f32 %v681_v50, 0.0 }
 0x160   : > { %3180 = vmatmul.msk.f32.gmra.mxu2 %vm629_vm0, %v3854_v6  ;;  %v1212_v6 = vld [vmem:[%s5780_s9] sm:$0xff]  ;;  %v714_v37 = vmul.f32 %v706_v63, %v698_v59 }
 0x161   : > { %1332 = vmatpush.msrb.mxu0 %v1212_v6 }
 0x163   : > { %v683_v16 = vpop.f32.mrf.mxu2 }
 0x164   : > { %v684_v47 = vadd.f32 %v3495_v26, %v683_v16 }
 0x166   : > { %v699_v55 = vmax.f32 %v684_v47, 0.0 }
 0x168   : > { %3181 = vmatmul.msk.f32.gmra.mxu2 %vm629_vm0, %v3846_v4  ;;  %v710_v4 = vld [vmem:[%s5774_s3 + $0x38] sm:$0x1]  ;;  %v715_v34 = vmul.f32 %v707_v58, %v699_v55 }
 0x16b   : > { %v686_v8 = vpop.f32.mrf.mxu2 }
 0x16c   : > { %v687_v45 = vadd.f32 %v3495_v26, %v686_v8 }
 0x16e   : > { %v700_v51 = vmax.f32 %v687_v45, 0.0 }
 0x170   : > { %3182 = vmatmul.msk.f32.gmra.mxu2 %vm629_vm0, %v3838_v2  ;;  %v709_v2 = vld [vmem:[%s5774_s3 + $0x30] sm:$0xff]  ;;  %v716_v61 = vmul.f32 %v708_v53, %v700_v51 }
 0x173   : > { %v689_v18 = vpop.f32.mrf.mxu2 }
 0x174   : > { %v690_v30 = vadd.f32 %v3495_v26, %v689_v18 }
 0x176   : > { %v701_v48 = vmax.f32 %v690_v30, 0.0 }
 0x178   : > { %3183 = vmatmul.msk.f32.gmra.mxu2 %vm629_vm0, %v3832_v0  ;;  %v717_v56 = vmul.f32 %v709_v2, %v701_v48 }
 0x17b   : > { %v692_v44 = vpop.f32.mrf.mxu2 }
 0x17c   : > { %v693_v46 = vadd.f32 %v3495_v26, %v692_v44 }
 0x17e   : > { %v702_v49 = vmax.f32 %v693_v46, 0.0 }
 0x180   : > { %3184 = vmatmul.msk.f32.gmra.mxu2 %vm629_vm0, %v3953_v31  ;;  %v718_v0 = vmul.f32 %v710_v4, %v702_v49  ;;  %v675_v31 = vadd.f32 %v3495_v26, %v674_v24  ;;  %v711_v24 = vmul.f32 %v703_v42, %v695_v39 }
 0x182   : > { %3135 = vmatpush.msk.msra.mxu3 %vm848_vm1, %v718_v0  ;;  %v696_v36 = vmax.f32 %v675_v31, 0.0 }
 0x183   : > { %v1084_v57 = vpop.f32.mrf.mxu2 }
 0x184   : > { %v4094_v60 = vadd.f32 %v4085_v52, %v1084_v57  ;;  %861 = vmatpush.msra.mxu3 %v717_v56 }
 0x186   : > { %5894 = vst [vmem:[#allocation8_spill] sm:$0xff] %v4094_v60  ;;  %v5821_v33 = vmax.f32 %v4094_v60, 0.0  ;;  %862 = vmatpush.msra.mxu3 %v716_v61 }
 0x188   : > { %863 = vmatpush.msra.mxu3 %v715_v34  ;;  %3185 = vmatmul.msk.f32.gmra.mxu2 %vm629_vm0, %v3945_v29  ;;  %v712_v29 = vmul.f32 %v704_v38, %v696_v36 }
 0x189   : > { %3200 = vmatmul.msk.f32.vlgmr.msrb.gmra.mxu0 %vm1220_vm2, %v5821_v33 }
 0x18a   : > { %864 = vmatpush.msra.mxu3 %v714_v37 }
 0x18b   : > { %v1087_v41 = vpop.f32.mrf.mxu2 }
 0x18c   : > { %v4115_v43 = vadd.f32 %v4085_v52, %v1087_v41  ;;  %865 = vmatpush.msra.mxu3 %v713_v40 }
 0x18e   : > { %5895 = vst [vmem:[#allocation9_spill] sm:$0xff] %v4115_v43  ;;  %v5820_v28 = vmax.f32 %v4115_v43, 0.0  ;;  %866 = vmatpush.msra.mxu3 %v712_v29 }
 0x190   : > { %867 = vmatpush.msra.mxu3 %v711_v24  ;;  %3186 = vmatmul.msk.f32.gmra.mxu2 %vm629_vm0, %v3937_v27 }
 0x191   : > { %3201 = vmatmul.msk.f32.gmra.mxu0 %vm1220_vm2, %v5820_v28 }
 0x193   : > { %v1090_v22 = vpop.f32.mrf.mxu2 }
 0x194   : > { %v4124_v20 = vadd.f32 %v4085_v52, %v1090_v22 }
 0x196   : > { %5896 = vst [vmem:[#allocation10_spill] sm:$0xff] %v4124_v20  ;;  %v5819_v14 = vmax.f32 %v4124_v20, 0.0 }
 0x198   : > { %3187 = vmatmul.msk.f32.gmra.mxu2 %vm629_vm0, %v3929_v25 }
 0x199   : > { %3202 = vmatmul.msk.f32.gmra.mxu0 %vm1220_vm2, %v5819_v14  ;;  %v4450_v14 = vld [vmem:[%s5781_s10] ss:$0 sm:$0xff] }
 0x19b   : > { %v1093_v12 = vpop.f32.mrf.mxu2 }
 0x19c   : > { %v4133_v27 = vadd.f32 %v4085_v52, %v1093_v12 }
 0x19e   : > { %5897 = vst [vmem:[#allocation11_spill] sm:$0xff] %v4133_v27  ;;  %v5818_v16 = vmax.f32 %v4133_v27, 0.0 }
 0x1a0   : > { %3188 = vmatmul.msk.f32.gmra.mxu2 %vm629_vm0, %v3921_v23 }
 0x1a1   : > { %3203 = vmatmul.msk.f32.gmra.mxu0 %vm1220_vm2, %v5818_v16 }
 0x1a3   : > { %v1096_v10 = vpop.f32.mrf.mxu2 }
 0x1a4   : > { %v4142_v25 = vadd.f32 %v4085_v52, %v1096_v10 }
 0x1a6   : > { %5898 = vst [vmem:[#allocation12_spill] sm:$0xff] %v4142_v25  ;;  %v5817_v6 = vmax.f32 %v4142_v25, 0.0 }
 0x1a8   : > { %3189 = vmatmul.msk.f32.gmra.mxu2 %vm629_vm0, %v3913_v21 }
 0x1a9   : > { %3204 = vmatmul.msk.f32.gmra.mxu0 %vm1220_vm2, %v5817_v6 }
 0x1ab   : > { %v1099_v8 = vpop.f32.mrf.mxu2 }
 0x1ac   : > { %v4151_v23 = vadd.f32 %v4085_v52, %v1099_v8 }
 0x1ae   : > { %5899 = vst [vmem:[#allocation13_spill] sm:$0xff] %v4151_v23  ;;  %v5816_v18 = vmax.f32 %v4151_v23, 0.0 }
 0x1b0   : > { %3190 = vmatmul.msk.f32.gmra.mxu2 %vm629_vm0, %v3905_v19 }
 0x1b1   : > { %3205 = vmatmul.msk.f32.gmra.mxu0 %vm1220_vm2, %v5816_v18 }
 0x1b3   : > { %v1102_v26 = vpop.f32.mrf.mxu2 }
 0x1b4   : > { %v4160_v21 = vadd.f32 %v4085_v52, %v1102_v26 }
 0x1b6   : > { %5900 = vst [vmem:[#allocation14_spill] sm:$0xff] %v4160_v21  ;;  %v5815_v30 = vmax.f32 %v4160_v21, 0.0 }
 0x1b8   : > { %3191 = vmatmul.msk.f32.gmra.mxu2 %vm629_vm0, %v3897_v17 }
 0x1b9   : > { %3206 = vmatmul.msk.f32.gmra.mxu0 %vm1220_vm2, %v5815_v30 }
 0x1bb   : > { %v1105_v44 = vpop.f32.mrf.mxu2 }
 0x1bc   : > { %v4169_v19 = vadd.f32 %v4085_v52, %v1105_v44 }
 0x1be   : > { %5901 = vst [vmem:[#allocation15_spill] sm:$0xff] %v4169_v19  ;;  %v5814_v45 = vmax.f32 %v4169_v19, 0.0 }
 0x1c0   : > { %3192 = vmatmul.msk.f32.gmra.mxu2 %vm629_vm0, %v3889_v15 }
 0x1c1   : > { %3207 = vmatmul.msk.f32.gmra.mxu0 %vm1220_vm2, %v5814_v45 }
 0x1c3   : > { %v1108_v46 = vpop.f32.mrf.mxu2 }
 0x1c4   : > { %v4178_v17 = vadd.f32 %v4085_v52, %v1108_v46 }
 0x1c6   : > { %5902 = vst [vmem:[#allocation16_spill] sm:$0xff] %v4178_v17  ;;  %v5813_v4 = vmax.f32 %v4178_v17, 0.0 }
 0x1c8   : > { %3193 = vmatmul.msk.f32.gmra.mxu2 %vm629_vm0, %v3881_v13 }
 0x1c9   : > { %3208 = vmatmul.msk.f32.gmra.mxu0 %vm1220_vm2, %v5813_v4 }
 0x1cb   : > { %v1111_v47 = vpop.f32.mrf.mxu2 }
 0x1cc   : > { %v4187_v15 = vadd.f32 %v4085_v52, %v1111_v47 }
 0x1ce   : > { %5903 = vst [vmem:[#allocation17_spill] sm:$0xff] %v4187_v15  ;;  %v5812_v48 = vmax.f32 %v4187_v15, 0.0 }
 0x1d0   : > { %3194 = vmatmul.msk.f32.gmra.mxu2 %vm629_vm0, %v3873_v11 }
 0x1d1   : > { %3209 = vmatmul.msk.f32.gmra.mxu0 %vm1220_vm2, %v5812_v48 }
 0x1d3   : > { %v1114_v49 = vpop.f32.mrf.mxu2 }
 0x1d4   : > { %v4196_v13 = vadd.f32 %v4085_v52, %v1114_v49 }
 0x1d6   : > { %5904 = vst [vmem:[#allocation18_spill] sm:$0xff] %v4196_v13  ;;  %v5810_v2 = vmax.f32 %v4196_v13, 0.0 }
 0x1d8   : > { %3195 = vmatmul.msk.f32.gmra.mxu2 %vm629_vm0, %v3865_v9 }
 0x1d9   : > { %3210 = vmatmul.msk.f32.gmra.mxu0 %vm1220_vm2, %v5810_v2 }
 0x1db   : > { %v1117_v50 = vpop.f32.mrf.mxu2 }
 0x1dc   : > { %v4205_v11 = vadd.f32 %v4085_v52, %v1117_v50 }
 0x1de   : > { %5905 = vst [vmem:[#allocation19_spill] sm:$0xff] %v4205_v11  ;;  %v5808_v51 = vmax.f32 %v4205_v11, 0.0  ;;  %v1476_v11 = vld [vmem:[%s5775_s4 + $0x170] sm:$0xff] }
 0x1e0   : > { %3196 = vmatmul.msk.f32.gmra.mxu2 %vm629_vm0, %v3857_v7 }
 0x1e1   : > { %3211 = vmatmul.msk.f32.gmra.mxu0 %vm1220_vm2, %v5808_v51 }
 0x1e3   : > { %v1120_v0 = vpop.f32.mrf.mxu2 }
 0x1e4   : > { %v4214_v9 = vadd.f32 %v4085_v52, %v1120_v0 }
 0x1e6   : > { %5906 = vst [vmem:[#allocation20_spill] sm:$0xff] %v4214_v9  ;;  %v5805_v53 = vmax.f32 %v4214_v9, 0.0 }
 0x1e8   : > { %3197 = vmatmul.msk.f32.gmra.mxu2 %vm629_vm0, %v3849_v5 }
 0x1e9   : > { %3212 = vmatmul.msk.f32.gmra.mxu0 %vm1220_vm2, %v5805_v53 }
 0x1eb   : > { %v1123_v54 = vpop.f32.mrf.mxu2 }
 0x1ec   : > { %v4223_v7 = vadd.f32 %v4085_v52, %v1123_v54 }
 0x1ee   : > { %5907 = vst [vmem:[#allocation21_spill] sm:$0xff] %v4223_v7  ;;  %v5804_v55 = vmax.f32 %v4223_v7, 0.0 }
 0x1f0   : > { %3198 = vmatmul.msk.f32.gmra.mxu2 %vm629_vm0, %v3843_v3 }
 0x1f1   : > { %3213 = vmatmul.msk.f32.gmra.mxu0 %vm1220_vm2, %v5804_v55 }
 0x1f3   : > { %v1126_v56 = vpop.f32.mrf.mxu2 }
 0x1f4   : > { %v4232_v5 = vadd.f32 %v4085_v52, %v1126_v56 }
 0x1f6   : > { %5908 = vst [vmem:[#allocation22_spill] sm:$0xff] %v4232_v5  ;;  %v5802_v57 = vmax.f32 %v4232_v5, 0.0 }
 0x1f8   : > { %3199 = vmatmul.msk.f32.gmra.mxu2 %vm629_vm0, %v3835_v1 }
 0x1f9   : > { %3214 = vmatmul.msk.f32.gmra.mxu0 %vm1220_vm2, %v5802_v57 }
 0x1fb   : > { %v1129_v58 = vpop.f32.mrf.mxu2 }
 0x1fc   : > { %v4241_v3 = vadd.f32 %v4085_v52, %v1129_v58 }
 0x1fe   : > { %5909 = vst [vmem:[#allocation23_spill] sm:$0xff] %v4241_v3  ;;  %v5801_v31 = vmax.f32 %v4241_v3, 0.0 }
 0x201   : > { %3215 = vmatmul.msk.f32.gmra.mxu0 %vm1220_vm2, %v5801_v31 }
 0x203   : > { %v1132_v59 = vpop.f32.mrf.mxu2 }
 0x204   : > { %v4248_v61 = vadd.f32 %v4085_v52, %v1132_v59 }
 0x206   : > { %5910 = vst [vmem:[#allocation24_spill] sm:$0xff] %v4248_v61  ;;  %v5799_v1 = vmax.f32 %v4248_v61, 0.0  ;;  %v4251_v62 = vpop.f32.mrf.mxu0 }
 0x209   : > { %3216 = vmatmul.msk.f32.gmra.mxu0 %vm1220_vm2, %v5799_v1 }
 0x20b   : > { %v1135_v63 = vpop.f32.mrf.mxu2 }
 0x20c   : > { %v4257_v32 = vadd.f32 %v4085_v52, %v1135_v63 }
 0x20e   : > { %5911 = vst [vmem:[#allocation25_spill] sm:$0xff] %v4257_v32  ;;  %v5798_v34 = vmax.f32 %v4257_v32, 0.0  ;;  %v4260_v35 = vpop.f32.mrf.mxu0 }
 0x211   : > { %3217 = vmatmul.msk.f32.gmra.mxu0 %vm1220_vm2, %v5798_v34 }
 0x213   : > { %v1138_v36 = vpop.f32.mrf.mxu2 }
 0x214   : > { %v4266_v37 = vadd.f32 %v4085_v52, %v1138_v36 }
 0x216   : > { %5912 = vst [vmem:[#allocation26_spill] sm:$0xff] %v4266_v37  ;;  %v5796_v38 = vmax.f32 %v4266_v37, 0.0  ;;  %v4269_v39 = vpop.f32.mrf.mxu0 }
 0x219   : > { %3218 = vmatmul.msk.f32.gmra.mxu0 %vm1220_vm2, %v5796_v38 }
 0x21b   : > { %v1141_v40 = vpop.f32.mrf.mxu2 }
 0x21c   : > { %v4275_v41 = vadd.f32 %v4085_v52, %v1141_v40 }
 0x21e   : > { %5913 = vst [vmem:[#allocation27_spill] sm:$0xff] %v4275_v41  ;;  %v5795_v42 = vmax.f32 %v4275_v41, 0.0  ;;  %v4278_v29 = vpop.f32.mrf.mxu0 }
 0x221   : > { %3219 = vmatmul.msk.f32.gmra.mxu0 %vm1220_vm2, %v5795_v42 }
 0x223   : > { %v1144_v24 = vpop.f32.mrf.mxu2 }
 0x224   : > { %v4284_v22 = vadd.f32 %v4085_v52, %v1144_v24 }
 0x226   : > { %5914 = vst [vmem:[#allocation28_spill] sm:$0xff] %v4284_v22  ;;  %v5793_v12 = vmax.f32 %v4284_v22, 0.0  ;;  %v4287_v10 = vpop.f32.mrf.mxu0 }
 0x229   : > { %3220 = vmatmul.msk.f32.gmra.mxu0 %vm1220_vm2, %v5793_v12 }
 0x22b   : > { %v1147_v8 = vpop.f32.mrf.mxu2 }
 0x22c   : > { %v4293_v26 = vadd.f32 %v4085_v52, %v1147_v8 }
 0x22e   : > { %5915 = vst [vmem:[#allocation29_spill] sm:$0xff] %v4293_v26  ;;  %v5792_v44 = vmax.f32 %v4293_v26, 0.0  ;;  %v4296_v46 = vpop.f32.mrf.mxu0 }
 0x231   : > { %3221 = vmatmul.msk.f32.gmra.mxu0 %vm1220_vm2, %v5792_v44 }
 0x233   : > { %v1150_v47 = vpop.f32.mrf.mxu2 }
 0x234   : > { %v4302_v49 = vadd.f32 %v4085_v52, %v1150_v47 }
 0x236   : > { %5916 = vst [vmem:[#allocation30_spill] sm:$0xff] %v4302_v49  ;;  %v5790_v50 = vmax.f32 %v4302_v49, 0.0  ;;  %v4305_v0 = vpop.f32.mrf.mxu0 }
 0x239   : > { %3222 = vmatmul.msk.f32.gmra.mxu0 %vm1220_vm2, %v5790_v50 }
 0x23b   : > { %v1153_v54 = vpop.f32.mrf.mxu2 }
 0x23c   : > { %v4311_v56 = vadd.f32 %v4085_v52, %v1153_v54 }
 0x23e   : > { %5917 = vst [vmem:[#allocation31_spill] sm:$0xff] %v4311_v56  ;;  %v5791_v58 = vmax.f32 %v4311_v56, 0.0  ;;  %v4314_v59 = vpop.f32.mrf.mxu0 }
 0x241   : > { %3223 = vmatmul.msk.f32.gmra.mxu0 %vm1220_vm2, %v5791_v58 }
 0x243   : > { %v1156_v63 = vpop.f32.mrf.mxu2 }
 0x244   : > { %v4320_v36 = vadd.f32 %v4085_v52, %v1156_v63 }
 0x246   : > { %5918 = vst [vmem:[#allocation32_spill] sm:$0xff] %v4320_v36  ;;  %v5794_v40 = vmax.f32 %v4320_v36, 0.0  ;;  %v4323_v24 = vpop.f32.mrf.mxu0 }
 0x249   : > { %3224 = vmatmul.msk.f32.gmra.mxu0 %vm1220_vm2, %v5794_v40 }
 0x24b   : > { %v1159_v8 = vpop.f32.mrf.mxu2 }
 0x24c   : > { %v4329_v47 = vadd.f32 %v4085_v52, %v1159_v8 }
 0x24e   : > { %5919 = vst [vmem:[#allocation33_spill] sm:$0xff] %v4329_v47  ;;  %v5797_v54 = vmax.f32 %v4329_v47, 0.0  ;;  %v4332_v50 = vpop.f32.mrf.mxu0 }
 0x251   : > { %3225 = vmatmul.msk.f32.gmra.mxu0 %vm1220_vm2, %v5797_v54 }
 0x253   : > { %v1162_v63 = vpop.f32.mrf.mxu2 }
 0x254   : > { %v4338_v58 = vadd.f32 %v4085_v52, %v1162_v63 }
 0x256   : > { %5920 = vst [vmem:[#allocation34_spill] sm:$0xff] %v4338_v58  ;;  %v5800_v44 = vmax.f32 %v4338_v58, 0.0  ;;  %v4341_v12 = vpop.f32.mrf.mxu0 }
 0x259   : > { %3226 = vmatmul.msk.f32.gmra.mxu0 %vm1220_vm2, %v5800_v44 }
 0x25b   : > { %v1165_v8 = vpop.f32.mrf.mxu2 }
 0x25c   : > { %v4347_v40 = vadd.f32 %v4085_v52, %v1165_v8 }
 0x25e   : > { %5921 = vst [vmem:[#allocation35_spill] sm:$0xff] %v4347_v40  ;;  %v5803_v42 = vmax.f32 %v4347_v40, 0.0  ;;  %v4350_v38 = vpop.f32.mrf.mxu0  ;;  %v4484_v40 = vadd.f32 %v4450_v14, %v4323_v24 }
 0x260   : > { %5931 = vst [vmem:[#allocation45_spill] sm:$0xff] %v4484_v40 }
 0x261   : > { %3227 = vmatmul.msk.f32.gmra.mxu0 %vm1220_vm2, %v5803_v42 }
 0x263   : > { %v1168_v63 = vpop.f32.mrf.mxu2 }
 0x264   : > { %v4356_v54 = vadd.f32 %v4085_v52, %v1168_v63 }
 0x266   : > { %5922 = vst [vmem:[#allocation36_spill] sm:$0xff] %v4356_v54  ;;  %v5806_v34 = vmax.f32 %v4356_v54, 0.0  ;;  %v1370_v1 = vpop.f32.mrf.mxu0 }
 0x267   : > { %v4453_v28 = vadd.f32 %v4450_v14, %v1370_v1 }
 0x269   : > { %3228 = vmatmul.msk.f32.gmra.mxu0 %vm1220_vm2, %v5806_v34  ;;  %5926 = vst [vmem:[#allocation40_spill] sm:$0xff] %v4453_v28 }
 0x26b   : > { %v1171_v8 = vpop.f32.mrf.mxu2 }
 0x26c   : > { %v4363_v44 = vadd.f32 %v4085_v52, %v1171_v8  ;;  %v719_v8 = vld [vmem:[%s5773_s2] sm:$0xff] }
 0x26d   : > { %3136 = vmatmul.msk.f32.vlgmr.msra.gmra.mxu3 %vm751_vm3, %v719_v8  ;;  %v722_v8 = vld [vmem:[%s5773_s2 + $0x18] sm:$0xff] }
 0x26e   : > { %5923 = vst [vmem:[#allocation37_spill] sm:$0xff] %v4363_v44  ;;  %v5807_v31 = vmax.f32 %v4363_v44, 0.0  ;;  %v4366_v57 = vpop.f32.mrf.mxu0 }
 0x271   : > { %3229 = vmatmul.msk.f32.gmra.mxu0 %vm1220_vm2, %v5807_v31 }
 0x273   : > { %v1174_v63 = vpop.f32.mrf.mxu2 }
 0x274   : > { %v4372_v42 = vadd.f32 %v4085_v52, %v1174_v63 }
 0x276   : > { %5924 = vst [vmem:[#allocation38_spill] sm:$0xff] %v4372_v42  ;;  %v5809_v55 = vmax.f32 %v4372_v42, 0.0  ;;  %v1376_v53 = vpop.f32.mrf.mxu0 }
 0x279   : > { %3230 = vmatmul.msk.f32.gmra.mxu0 %vm1220_vm2, %v5809_v55  ;;  %v720_v55 = vld [vmem:[%s5773_s2 + $0x8] sm:$0xff] }
 0x27a   : > { %3137 = vmatmul.msk.f32.gmra.mxu3 %vm751_vm3, %v720_v55  ;;  %v723_v55 = vld [vmem:[%s5773_s2 + $0x20] sm:$0xff] }
 0x27b   : > { %v1177_v34 = vpop.f32.mrf.mxu2 }
 0x27c   : > { %v4383_v31 = vadd.f32 %v4085_v52, %v1177_v34  ;;  %v721_v52 = vld [vmem:[%s5773_s2 + $0x10] sm:$0xff] }
 0x27e   : > { %5925 = vst [vmem:[#allocation39_spill] sm:$0xff] %v4383_v31  ;;  %v5811_v63 = vmax.f32 %v4383_v31, 0.0  ;;  %v4386_v51 = vpop.f32.mrf.mxu0 }
 0x281   : > { %3231 = vmatmul.msk.f32.gmra.mxu0 %vm1220_vm2, %v5811_v63 }
 0x282   : > { %3138 = vmatmul.msk.f32.gmra.mxu3 %vm751_vm3, %v721_v52  ;;  %v724_v52 = vld [vmem:[%s5773_s2 + $0x28] sm:$0xff] }
 0x286   : > { %v4395_v2 = vpop.f32.mrf.mxu0 }
 0x28a   : > { %3139 = vmatmul.msk.f32.gmra.mxu3 %vm751_vm3, %v722_v8  ;;  %v725_v8 = vld [vmem:[%s5773_s2 + $0x30] sm:$0xff] }
 0x28e   : > { %v4401_v34 = vpop.f32.mrf.mxu0 }
 0x292   : > { %3140 = vmatmul.msk.f32.gmra.mxu3 %vm751_vm3, %v723_v55  ;;  %v726_v55 = vld [vmem:[%s5773_s2 + $0x38] sm:$0xff] }
 0x296   : > { %v4407_v63 = vpop.f32.mrf.mxu0 }
 0x29a   : > { %3141 = vmatmul.msk.f32.gmra.mxu3 %vm751_vm3, %v724_v52  ;;  %v727_v52 = vld [vmem:[%s5773_s2 + $0x40] sm:$0xff] }
 0x29e   : > { %v1391_v48 = vpop.f32.mrf.mxu0 }
 0x2a2   : > { %3142 = vmatmul.msk.f32.gmra.mxu3 %vm751_vm3, %v725_v8  ;;  %v728_v8 = vld [vmem:[%s5773_s2 + $0x48] sm:$0xff] }
 0x2a6   : > { %v4417_v4 = vpop.f32.mrf.mxu0 }
 0x2aa   : > { %3143 = vmatmul.msk.f32.gmra.mxu3 %vm751_vm3, %v726_v55  ;;  %v729_v55 = vld [vmem:[%s5773_s2 + $0x50] sm:$0xff] }
 0x2ae   : > { %v4423_v45 = vpop.f32.mrf.mxu0 }
 0x2b2   : > { %3144 = vmatmul.msk.f32.gmra.mxu3 %vm751_vm3, %v727_v52  ;;  %v730_v52 = vld [vmem:[%s5773_s2 + $0x58] sm:$0xff] }
 0x2b6   : > { %v1400_v30 = vpop.f32.mrf.mxu0 }
 0x2ba   : > { %3145 = vmatmul.msk.f32.gmra.mxu3 %vm751_vm3, %v728_v8 }
 0x2be   : > { %v1403_v18 = vpop.f32.mrf.mxu0 }
 0x2c2   : > { %3146 = vmatmul.msk.f32.gmra.mxu3 %vm751_vm3, %v729_v55 }
 0x2c6   : > { %v4437_v6 = vpop.f32.mrf.mxu0 }
 0x2ca   : > { %3147 = vmatmul.msk.f32.gmra.mxu3 %vm751_vm3, %v730_v52  ;;  %v731_v52 = vld [vmem:[%s5773_s2 + $0x60] sm:$0xff] }
 0x2ce   : > { %v1409_v16 = vpop.f32.mrf.mxu0 }
 0x2cf   : > { %v4466_v54 = vadd.f32 %v4450_v14, %v1409_v16 }
 0x2d1   : > { %5928 = vst [vmem:[#allocation42_spill] sm:$0xff] %v4466_v54 }
 0x2d2   : > { %3148 = vmatmul.msk.f32.gmra.mxu3 %vm751_vm3, %v731_v52  ;;  %v4480_v52 = vadd.f32 %v4450_v14, %v1400_v30  ;;  %v733_v30 = vld [vmem:[%s5773_s2 + $0x70] sm:$0xff] }
 0x2d4   : > { %5930 = vst [vmem:[#allocation44_spill] sm:$0xff] %v4480_v52 }
 0x2d6   : > { %v1412_v8 = vpop.f32.mrf.mxu0 }
 0x2d7   : > { %v4456_v33 = vadd.f32 %v4450_v14, %v1412_v8  ;;  %v4470_v8 = vadd.f32 %v4450_v14, %v4350_v38  ;;  %v4487_v38 = vadd.f32 %v4450_v14, %v1376_v53  ;;  %v4503_v53 = vadd.f32 %v4450_v14, %v1391_v48 }
 0x2d9   : > { %5927 = vst [vmem:[#allocation41_spill] sm:$0xff] %v4456_v33  ;;  %v3415_v55 = vpack.i.bf16 %v4453_v28, %v4456_v33  ;;  %v3420_v31 = vpack.i.bf16 %v4470_v8, %v4466_v54  ;;  %v1492_v33 = vld [vmem:[%s5775_s4 + $0x1f0] sm:$0xff] }
 0x2da   : > { %5929 = vst [vmem:[#allocation43_spill] sm:$0xff] %v4470_v8 }
 0x2db   : > { %3416 = vrot.lane.b32.xlu2 %v3415_v55, %s5840_s23  ;;  %v732_v55 = vld [vmem:[%s5773_s2 + $0x68] sm:$0xff]  ;;  %5932 = vst [vmem:[#allocation46_spill] sm:$0xff] %v4487_v38 }
 0x2dc   : > { %3149 = vmatmul.msk.f32.gmra.mxu3 %vm751_vm3, %v732_v55  ;;  %5934 = vst [vmem:[#allocation48_spill] sm:$0xff] %v4503_v53 }
 0x2de   : > { %v1415_v1 = vpop.f32.mrf.mxu0 }
 0x2df   : > { %v4506_v24 = vadd.f32 %v4450_v14, %v1415_v1  ;;  %v734_v1 = vld [vmem:[%s5773_s2 + $0x78] sm:$0xff] }
 0x2e1   : > { %5935 = vst [vmem:[#allocation49_spill] sm:$0xff] %v4506_v24 }
 0x2e3   : > { %3421 = vrot.lane.b32.xlu2 %v3420_v31, %s5840_s23  ;;  %v3435_v31 = vpack.i.bf16 %v4484_v40, %v4480_v52 }
 0x2e4   : > { %3150 = vmatmul.msk.f32.gmra.mxu3 %vm751_vm3, %v733_v30 }
 0x2e6   : > { %v1418_v16 = vpop.f32.mrf.mxu0 }
 0x2e7   : > { %v4490_v42 = vadd.f32 %v4450_v14, %v1418_v16 }
 0x2e9   : > { %5933 = vst [vmem:[#allocation47_spill] sm:$0xff] %v4490_v42  ;;  %v3405_v55 = vpack.i.bf16 %v4487_v38, %v4490_v42  ;;  %v1493_v42 = vld [vmem:[%s5775_s4 + $0x1f8] sm:$0xff] }
 0x2eb   : > { %3406 = vrot.lane.b32.xlu1 %v3405_v55, %s5840_s23  ;;  %3436 = vrot.lane.b32.xlu2 %v3435_v31, %s5840_s23  ;;  %v4510_v55 = vadd.f32 %v4450_v14, %v4296_v46  ;;  %v4514_v31 = vadd.f32 %v4450_v14, %v4366_v57  ;;  %v4528_v57 = vadd.f32 %v4450_v14, %v4395_v2 }
 0x2ec   : > { %3151 = vmatmul.msk.f32.gmra.mxu3 %vm751_vm3, %v734_v1  ;;  %v4531_v46 = vadd.f32 %v4450_v14, %v1403_v18  ;;  %v735_v18 = vld [vmem:[%s5773_s2 + $0x80] sm:$0xff] }
 0x2ed   : > { %5936 = vst [vmem:[#allocation50_spill] sm:$0xff] %v4510_v55  ;;  %v3450_v58 = vpack.i.bf16 %v4510_v55, %v4503_v53  ;;  %v3410_v48 = vpack.i.bf16 %v4514_v31, %v4506_v24 }
 0x2ee   : > { %v1421_v16 = vpop.f32.mrf.mxu0  ;;  %5937 = vst [vmem:[#allocation51_spill] sm:$0xff] %v4514_v31 }
 0x2ef   : > { %5938 = vst [vmem:[#allocation52_spill] sm:$0xff] %v4528_v57 }
 0x2f0   : > { %5939 = vst [vmem:[#allocation53_spill] sm:$0xff] %v4531_v46 }
 0x2f3   : > { %3411 = vrot.lane.b32.xlu1 %v3410_v48, %s5840_s23  ;;  %3451 = vrot.lane.b32.xlu2 %v3450_v58, %s5840_s23  ;;  %v4536_v48 = vadd.f32 %v4450_v14, %v4269_v39  ;;  %v4540_v58 = vadd.f32 %v4450_v14, %v4332_v50  ;;  %v4556_v39 = vadd.f32 %v4450_v14, %v4417_v4  ;;  %v869_v50 = vpop.f32.mrf.mxu3 }
 0x2f4   : > { %3152 = vmatmul.msk.f32.gmra.mxu3 %vm751_vm3, %v735_v18  ;;  %2978 = vst [vmem:[%s4558_s26] sm:$0xff] %v869_v50 }
 0x2f5   : > { %5940 = vst [vmem:[#allocation54_spill] sm:$0xff] %v4540_v58  ;;  %v3465_v1 = vpack.i.bf16 %v4536_v48, %v4528_v57  ;;  %v3430_v2 = vpack.i.bf16 %v4540_v58, %v4531_v46 }
 0x2f6   : > { %v1424_v30 = vpop.f32.mrf.mxu0  ;;  %5941 = vst [vmem:[#allocation55_spill] sm:$0xff] %v4556_v39 }
 0x2fb   : > { %3431 = vrot.lane.b32.xlu1 %v3430_v2, %s5840_s23  ;;  %3466 = vrot.lane.b32.xlu2 %v3465_v1, %s5840_s23  ;;  %v4563_v1 = vadd.f32 %v4450_v14, %v4305_v0  ;;  %v4566_v2 = vadd.f32 %v4450_v14, %v1424_v30  ;;  %v736_v0 = vld [vmem:[%s5773_s2 + $0x88] sm:$0xff]  ;;  %v4586_v30 = vadd.f32 %v4450_v14, %v1421_v16 }
 0x2fc   : > { %3153 = vmatmul.msk.f32.gmra.mxu3 %vm751_vm3, %v736_v0 }
 0x2fd   : > { %5942 = vst [vmem:[#allocation56_spill] sm:$0xff] %v4563_v1  ;;  %v3445_v4 = vpack.i.bf16 %v4563_v1, %v4556_v39  ;;  %v872_v50 = vpop.f32.mrf.mxu3 }
 0x2fe   : > { %v1427_v47 = vpop.f32.mrf.mxu0  ;;  %5943 = vst [vmem:[#allocation57_spill] sm:$0xff] %v4566_v2 }
 0x2ff   : > { %v4569_v18 = vadd.f32 %v4450_v14, %v1427_v47  ;;  %v4583_v47 = vadd.f32 %v4450_v14, %v4401_v34  ;;  %5946 = vst [vmem:[#allocation60_spill] sm:$0xff] %v4586_v30 }
 0x300   : > { %2980 = vst [vmem:[%s4558_s26 + $0x10] sm:$0xff] %v872_v50  ;;  %v4614_v50 = vadd.f32 %v4450_v14, %v4341_v12  ;;  %v4630_v12 = vadd.f32 %v4450_v14, %v4314_v59  ;;  %v4646_v59 = vadd.f32 %v4450_v14, %v4287_v10  ;;  %v4662_v10 = vadd.f32 %v4450_v14, %v4251_v62 }
 0x301   : > { %5944 = vst [vmem:[#allocation58_spill] sm:$0xff] %v4569_v18  ;;  %v3395_v36 = vpack.i.bf16 %v4566_v2, %v4569_v18 }
 0x302   : > { %5945 = vst [vmem:[#allocation59_spill] sm:$0xff] %v4583_v47 }
 0x303   : > { %3396 = vrot.lane.b32.xlu0 %v3395_v36, %s5840_s23  ;;  %3446 = vrot.lane.b32.xlu1 %v3445_v4, %s5840_s23  ;;  %v4591_v36 = vadd.f32 %v4450_v14, %v4278_v29  ;;  %v4595_v4 = vadd.f32 %v4450_v14, %v4386_v51  ;;  %v737_v29 = vld [vmem:[%s5773_s2 + $0x90] sm:$0xff]  ;;  %v4609_v51 = vadd.f32 %v4450_v14, %v4437_v6 }
 0x304   : > { %3154 = vmatmul.msk.f32.gmra.mxu3 %vm751_vm3, %v737_v29  ;;  %5949 = vst [vmem:[#allocation63_spill] sm:$0xff] %v4614_v50  ;;  %v4624_v6 = vadd.f32 %v4450_v14, %v4423_v45  ;;  %v4640_v45 = vadd.f32 %v4450_v14, %v4407_v63  ;;  %v740_v63 = vld [vmem:[%s5773_s2 + $0xa8] sm:$0xff] }
 0x305   : > { %5947 = vst [vmem:[#allocation61_spill] sm:$0xff] %v4595_v4  ;;  %v3460_v0 = vpack.i.bf16 %v4591_v36, %v4583_v47  ;;  %v3400_v34 = vpack.i.bf16 %v4595_v4, %v4586_v30  ;;  %v875_v16 = vpop.f32.mrf.mxu3 }
 0x306   : > { %5948 = vst [vmem:[#allocation62_spill] sm:$0xff] %v4609_v51 }
 0x307   : > { %2982 = vst [vmem:[%s4558_s26 + $0x20] sm:$0xff] %v875_v16  ;;  %v3440_v16 = vpack.i.bf16 %v4630_v12, %v4624_v6 }
 0x308   : > { %5950 = vst [vmem:[#allocation64_spill] sm:$0xff] %v4624_v6 }
 0x309   : > { %5951 = vst [vmem:[#allocation65_spill] sm:$0xff] %v4630_v12 }
 0x30a   : > { %5952 = vst [vmem:[#allocation66_spill] sm:$0xff] %v4640_v45 }
 0x30b   : > { %3401 = vrot.lane.b32.xlu0 %v3400_v34, %s5840_s23  ;;  %3461 = vrot.lane.b32.xlu1 %v3460_v0, %s5840_s23  ;;  %v3425_v0 = vpack.i.bf16 %v4614_v50, %v4609_v51  ;;  %v738_v34 = vld [vmem:[%s5773_s2 + $0x98] sm:$0xff]  ;;  %5953 = vst [vmem:[#allocation67_spill] sm:$0xff] %v4646_v59 }
 0x30c   : > { %3155 = vmatmul.msk.f32.gmra.mxu3 %vm751_vm3, %v738_v34 }
 0x30d   : > { %v878_v29 = vpop.f32.mrf.mxu3 }
 0x30e   : > { %2984 = vst [vmem:[%s4558_s26 + $0x30] sm:$0xff] %v878_v29  ;;  %v3455_v29 = vpack.i.bf16 %v4646_v59, %v4640_v45 }
 0x313   : > { %3426 = vrot.lane.b32.xlu0 %v3425_v0, %s5840_s23  ;;  %v739_v0 = vld [vmem:[%s5773_s2 + $0xa0] sm:$0xff] }
 0x314   : > { %3156 = vmatmul.msk.f32.gmra.mxu3 %vm751_vm3, %v739_v0 }
 0x315   : > { %v881_v34 = vpop.f32.mrf.mxu3 }
 0x316   : > { %2986 = vst [vmem:[%s4558_s26 + $0x40] sm:$0xff] %v881_v34 }
 0x31b   : > { %3441 = vrot.lane.b32.xlu0 %v3440_v16, %s5840_s23  ;;  %v4656_v16 = vadd.f32 %v4450_v14, %v4260_v35  ;;  %v741_v35 = vld [vmem:[%s5773_s2 + $0xb0] sm:$0xff]  ;;  %v742_v14 = vld [vmem:[%s5773_s2 + $0xb8] sm:$0xff] }
 0x31c   : > { %3157 = vmatmul.msk.f32.gmra.mxu3 %vm751_vm3, %v740_v63  ;;  %v743_v63 = vld [vmem:[%s5773_s2 + $0xc0] sm:$0xff] }
 0x31d   : > { %v884_v0 = vpop.f32.mrf.mxu3  ;;  %v3470_v34 = vpack.i.bf16 %v4662_v10, %v4656_v16 }
 0x31e   : > { %2988 = vst [vmem:[%s4558_s26 + $0x50] sm:$0xff] %v884_v0 }
 0x323   : > { %3456 = vrot.lane.b32.xlu0 %v3455_v29, %s5840_s23 }
 0x324   : > { %3158 = vmatmul.msk.f32.gmra.mxu3 %vm751_vm3, %v741_v35 }
 0x325   : > { %v887_v29 = vpop.f32.mrf.mxu3 }
 0x326   : > { %2990 = vst [vmem:[%s4558_s26 + $0x60] sm:$0xff] %v887_v29  ;;  %v745_v29 = vld [vmem:[%s5773_s2 + $0xd0] sm:$0xff] }
 0x32b   : > { %3471 = vrot.lane.b32.xlu0 %v3470_v34, %s5840_s23  ;;  %v744_v34 = vld [vmem:[%s5773_s2 + $0xc8] sm:$0xff]  ;;  %s3645_s23 = scalar_lea.hbm %s3644_s1, 512 }
 0x32c   : > { %3159 = vmatmul.msk.f32.gmra.mxu3 %vm751_vm3, %v742_v14  ;;  %p3646_p11 = scmp.ne.s32.totalorder %s3644_s1, %s3645_s23  ;;  %p3651_p1 = scmp.lt.s32.totalorder %s3649_s24, %s3645_s23 }
 0x32d   : > { %v890_v62 = vpop.f32.mrf.mxu3 }
 0x32e   : > { %2992 = vst [vmem:[%s4558_s26 + $0x70] sm:$0xff] %v890_v62  ;;  %v746_v62 = vld [vmem:[%s5773_s2 + $0xd8] sm:$0xff]  ;;  %p3647_p12 = pnand %p3646_p11, %p3814_p5  ;;  %p3652_p2 = por %p3651_p1, %p3650_p0 }
 0x330   : > { %p3648_p13 = pneg %p3647_p12 }
 0x332   : > { %p3653_p3 = pnand %p3652_p2, %p3648_p13 }
 0x334   : > { %3160 = vmatmul.msk.f32.gmra.mxu3 %vm751_vm3, %v743_v63 }
 0x335   : > { %v893_v0 = vpop.f32.mrf.mxu3 }
 0x336   : > { %2994 = vst [vmem:[%s4558_s26 + $0x80] sm:$0xff] %v893_v0  ;;  %v747_v0 = vld [vmem:[%s5773_s2 + $0xe0] sm:$0xff] }
 0x33c   : > { %3161 = vmatmul.msk.f32.gmra.mxu3 %vm751_vm3, %v744_v34 }
 0x33d   : > { %v896_v35 = vpop.f32.mrf.mxu3 }
 0x33e   : > { %2996 = vst [vmem:[%s4558_s26 + $0x90] sm:$0xff] %v896_v35  ;;  %v748_v35 = vld [vmem:[%s5773_s2 + $0xe8] sm:$0xff] }
 0x344   : > { %3162 = vmatmul.msk.f32.gmra.mxu3 %vm751_vm3, %v745_v29 }
 0x345   : > { %v899_v14 = vpop.f32.mrf.mxu3 }
 0x346   : > { %2998 = vst [vmem:[%s4558_s26 + $0xa0] sm:$0xff] %v899_v14  ;;  %v749_v14 = vld [vmem:[%s5773_s2 + $0xf0] sm:$0xff] }
 0x34c   : > { %3163 = vmatmul.msk.f32.gmra.mxu3 %vm751_vm3, %v746_v62 }
 0x34d   : > { %v902_v63 = vpop.f32.mrf.mxu3 }
 0x34e   : > { %3000 = vst [vmem:[%s4558_s26 + $0xb0] sm:$0xff] %v902_v63  ;;  %v3417_v63 = vpop.permute.xlu2 %3416 }
 0x354   : > { %3164 = vmatmul.msk.f32.gmra.mxu3 %vm751_vm3, %v747_v0 }
 0x355   : > { %v905_v34 = vpop.f32.mrf.mxu3 }
 0x356   : > { %3002 = vst [vmem:[%s4558_s26 + $0xc0] sm:$0xff] %v905_v34  ;;  %v750_v34 = vld [vmem:[%s5773_s2 + $0xf8] sm:$0xff]  ;;  %v3422_v26 = vpop.permute.xlu2 %3421 }
 0x35c   : > { %3165 = vmatmul.msk.f32.gmra.mxu3 %vm751_vm3, %v748_v35 }
 0x35d   : > { %v3407_v62 = vpop.permute.xlu1 %3406 }
 0x35e   : > { %v3409_v37 = vunpack.i.h.bf16 %v3407_v62  ;;  %v3408_v32 = vunpack.i.l.bf16 %v3407_v62 }
 0x35f   : > { %v908_v29 = vpop.f32.mrf.mxu3 }
 0x360   : > { %3004 = vst [vmem:[%s4558_s26 + $0xd0] sm:$0xff] %v908_v29 }
 0x364   : > { %3166 = vmatmul.msk.f32.gmra.mxu3 %vm751_vm3, %v749_v14 }
 0x365   : > { %v3412_v29 = vpop.permute.xlu1 %3411 }
 0x366   : > { %v3413_v3 = vunpack.i.l.bf16 %v3412_v29 }
 0x367   : > { %v911_v0 = vpop.f32.mrf.mxu3 }
 0x368   : > { %3006 = vst [vmem:[%s4558_s26 + $0xe0] sm:$0xff] %v911_v0 }
 0x36c   : > { %3167 = vmatmul.msk.f32.gmra.mxu3 %vm751_vm3, %v750_v34  ;;  %v3414_v34 = vunpack.i.h.bf16 %v3412_v29 }
 0x36d   : > { %v3432_v61 = vpop.permute.xlu1 %3431 }
 0x36f   : > { %v914_v56 = vpop.f32.mrf.mxu3 }
 0x370   : > { %3008 = vst [vmem:[%s4558_s26 + $0xf0] sm:$0xff] %v914_v56 }
 0x375   : > { %v3397_v44 = vpop.permute.xlu0 %3396  ;;  %v3447_v29 = vpop.permute.xlu1 %3446 }
 0x376   : > { %v3398_v35 = vunpack.i.l.bf16 %v3397_v44  ;;  %v3399_v49 = vunpack.i.h.bf16 %v3397_v44  ;;  %v3419_v44 = vunpack.i.h.bf16 %v3417_v63 }
 0x377   : > { %v917_v0 = vpop.f32.mrf.mxu3 }
 0x378   : > { %1735 = vmatpush.msrb.mxu3 %v3398_v35  ;;  %3010 = vst [vmem:[%s4558_s26 + $0x100] sm:$0xff] %v917_v0  ;;  %v3437_v35 = vpop.permute.xlu2 %3436 }
 0x37a   : > { %1736 = vmatpush.msrb.mxu3 %v3399_v49  ;;  %v3418_v49 = vunpack.i.l.bf16 %v3417_v63  ;;  %v3438_v63 = vunpack.i.l.bf16 %v3437_v35 }
 0x37d   : > { %v3402_v14 = vpop.permute.xlu0 %3401 }
 0x37e   : > { %v3404_v22 = vunpack.i.h.bf16 %v3402_v14  ;;  %v3403_v41 = vunpack.i.l.bf16 %v3402_v14  ;;  %v3424_v14 = vunpack.i.h.bf16 %v3422_v26 }
 0x380   : > { %1622 = vmatpush.msrb.mxu1 %v3404_v22  ;;  %1737 = vmatpush.msrb.mxu3 %v3403_v41  ;;  %v3423_v22 = vunpack.i.l.bf16 %v3422_v26  ;;  %v920_v41 = vpop.f32.mrf.mxu3 }
 0x381   : > { %3012 = vst [vmem:[%s4558_s26 + $0x110] sm:$0xff] %v920_v41 }
 0x382   : > { %1623 = vmatpush.msrb.mxu1 %v3409_v37  ;;  %1738 = vmatpush.msrb.mxu3 %v3408_v32  ;;  %v3434_v32 = vunpack.i.h.bf16 %v3432_v61  ;;  %v3433_v37 = vunpack.i.l.bf16 %v3432_v61 }
 0x384   : > { %1624 = vmatpush.msrb.mxu1 %v3414_v34  ;;  %1739 = vmatpush.msrb.mxu3 %v3413_v3  ;;  %v3439_v3 = vunpack.i.h.bf16 %v3437_v35  ;;  %v3452_v34 = vpop.permute.xlu2 %3451  ;;  %v3462_v35 = vpop.permute.xlu1 %3461 }
 0x385   : > { %v3427_v56 = vpop.permute.xlu0 %3426  ;;  %v3454_v61 = vunpack.i.h.bf16 %v3452_v34  ;;  %v3453_v41 = vunpack.i.l.bf16 %v3452_v34  ;;  %v1431_v34 = vld [vmem:[%s5775_s4 + $0x8] sm:$0xff] }
 0x386   : > { %1625 = vmatpush.msrb.mxu1 %v3419_v44  ;;  %1740 = vmatpush.msrb.mxu3 %v3418_v49  ;;  %v3429_v62 = vunpack.i.h.bf16 %v3427_v56  ;;  %v3428_v0 = vunpack.i.l.bf16 %v3427_v56  ;;  %v3449_v56 = vunpack.i.h.bf16 %v3447_v29 }
 0x388   : > { %1626 = vmatpush.msrb.mxu1 %v3424_v14  ;;  %1741 = vmatpush.msrb.mxu3 %v3423_v22  ;;  %v923_v14 = vpop.f32.mrf.mxu3  ;;  %v3448_v22 = vunpack.i.l.bf16 %v3447_v29 }
 0x389   : > { %3014 = vst [vmem:[%s4558_s26 + $0x120] sm:$0xff] %v923_v14 }
 0x38a   : > { %1627 = vmatpush.msrb.mxu1 %v3429_v62  ;;  %1742 = vmatpush.msrb.mxu3 %v3428_v0 }
 0x38c   : > { %1628 = vmatpush.msrb.mxu1 %v3434_v32  ;;  %1743 = vmatpush.msrb.mxu3 %v3433_v37  ;;  %v3467_v37 = vpop.permute.xlu2 %3466 }
 0x38d   : > { %v3442_v44 = vpop.permute.xlu0 %3441  ;;  %v3469_v29 = vunpack.i.h.bf16 %v3467_v37 }
 0x38e   : > { %1629 = vmatpush.msrb.mxu1 %v3439_v3  ;;  %1744 = vmatpush.msrb.mxu3 %v3438_v63  ;;  %v3444_v26 = vunpack.i.h.bf16 %v3442_v44  ;;  %v3443_v49 = vunpack.i.l.bf16 %v3442_v44  ;;  %v3464_v3 = vunpack.i.h.bf16 %v3462_v35  ;;  %v3463_v63 = vunpack.i.l.bf16 %v3462_v35  ;;  %v1432_v35 = vld [vmem:[%s5775_s4 + $0x10] sm:$0xff] }
 0x390   : > { %1630 = vmatpush.msrb.mxu1 %v3444_v26  ;;  %1745 = vmatpush.msrb.mxu3 %v3443_v49  ;;  %v926_v44 = vpop.f32.mrf.mxu3  ;;  %v3468_v26 = vunpack.i.l.bf16 %v3467_v37 }
 0x391   : > { %3016 = vst [vmem:[%s4558_s26 + $0x130] sm:$0xff] %v926_v44 }
 0x392   : > { %1631 = vmatpush.msrb.mxu1 %v3449_v56  ;;  %1746 = vmatpush.msrb.mxu3 %v3448_v22  ;;  %v1430_v22 = vld [vmem:[%s5775_s4] sm:$0xff] }
 0x394   : > { %1632 = vmatpush.msrb.mxu1 %v3454_v61  ;;  %1747 = vmatpush.msrb.mxu3 %v3453_v41  ;;  %v1433_v41 = vld [vmem:[%s5775_s4 + $0x18] sm:$0xff] }
 0x395   : > { %v3457_v62 = vpop.permute.xlu0 %3456 }
 0x396   : > { %v3459_v0 = vunpack.i.h.bf16 %v3457_v62  ;;  %v3458_v32 = vunpack.i.l.bf16 %v3457_v62 }
 0x398   : > { %1633 = vmatpush.msrb.mxu1 %v3459_v0  ;;  %1748 = vmatpush.msrb.mxu3 %v3458_v32  ;;  %v929_v61 = vpop.f32.mrf.mxu3  ;;  %v1435_v0 = vld [vmem:[%s5775_s4 + $0x28] sm:$0xff]  ;;  %v1434_v32 = vld [vmem:[%s5775_s4 + $0x20] sm:$0xff] }
 0x399   : > { %3018 = vst [vmem:[%s4558_s26 + $0x140] sm:$0xff] %v929_v61  ;;  %v1442_v61 = vld [vmem:[%s5775_s4 + $0x60] sm:$0xff] }
 0x39a   : > { %1634 = vmatpush.msrb.mxu1 %v3464_v3  ;;  %1749 = vmatpush.msrb.mxu3 %v3463_v63  ;;  %v1437_v3 = vld [vmem:[%s5775_s4 + $0x38] sm:$0xff]  ;;  %v1436_v63 = vld [vmem:[%s5775_s4 + $0x30] sm:$0xff] }
 0x39c   : > { %1635 = vmatpush.msrb.mxu1 %v3469_v29  ;;  %1750 = vmatpush.msrb.mxu3 %v3468_v26  ;;  %v1439_v29 = vld [vmem:[%s5775_s4 + $0x48] sm:$0xff]  ;;  %v1438_v26 = vld [vmem:[%s5775_s4 + $0x40] sm:$0xff] }
 0x39d   : > { %v3472_v49 = vpop.permute.xlu0 %3471  ;;  %1751 = vmatmul.f32.vlgmr.msrb.gmra.mxu3 %v1431_v34 }
 0x39e   : > { %v3473_v14 = vunpack.i.l.bf16 %v3472_v49  ;;  %v3474_v56 = vunpack.i.h.bf16 %v3472_v49  ;;  %v1441_v49 = vld [vmem:[%s5775_s4 + $0x58] sm:$0xff] }
 0x3a0   : > { %1636 = vmatpush.msrb.mxu1 %v3473_v14  ;;  %v932_v62 = vpop.f32.mrf.mxu3  ;;  %v1440_v14 = vld [vmem:[%s5775_s4 + $0x50] sm:$0xff] }
 0x3a1   : > { %3020 = vst [vmem:[%s4558_s26 + $0x150] sm:$0xff] %v932_v62  ;;  %v1444_v62 = vld [vmem:[%s5775_s4 + $0x70] sm:$0xff] }
 0x3a2   : > { %1637 = vmatpush.msrb.mxu1 %v3474_v56 }
 0x3a3   : > { %1638 = vmatmul.f32.vlgmr.msrb.gmra.mxu1 %v1430_v22  ;;  %v1443_v22 = vld [vmem:[%s5775_s4 + $0x68] sm:$0xff] }
 0x3a5   : > { %1754 = vmatmul.f32.gmra.mxu3 %v1433_v41 }
 0x3a8   : > { %v935_v37 = vpop.f32.mrf.mxu3 }
 0x3a9   : > { %3022 = vst [vmem:[%s4558_s26 + $0x160] sm:$0xff] %v935_v37  ;;  %v1446_v37 = vld [vmem:[%s5775_s4 + $0x80] sm:$0xff] }
 0x3ab   : > { %1641 = vmatmul.f32.gmra.mxu1 %v1432_v35  ;;  %v1445_v35 = vld [vmem:[%s5775_s4 + $0x78] sm:$0xff] }
 0x3ad   : > { %1757 = vmatmul.f32.gmra.mxu3 %v1435_v0 }
 0x3b0   : > { %v938_v44 = vpop.f32.mrf.mxu3 }
 0x3b1   : > { %3024 = vst [vmem:[%s4558_s26 + $0x170] sm:$0xff] %v938_v44  ;;  %v1448_v44 = vld [vmem:[%s5775_s4 + $0x90] sm:$0xff] }
 0x3b3   : > { %1644 = vmatmul.f32.gmra.mxu1 %v1434_v32  ;;  %v1447_v32 = vld [vmem:[%s5775_s4 + $0x88] sm:$0xff] }
 0x3b5   : > { %1760 = vmatmul.f32.gmra.mxu3 %v1437_v3 }
 0x3b8   : > { %v941_v34 = vpop.f32.mrf.mxu3 }
 0x3b9   : > { %3026 = vst [vmem:[%s4558_s26 + $0x180] sm:$0xff] %v941_v34  ;;  %v1450_v34 = vld [vmem:[%s5775_s4 + $0xa0] sm:$0xff] }
 0x3bb   : > { %1647 = vmatmul.f32.gmra.mxu1 %v1436_v63  ;;  %v1449_v63 = vld [vmem:[%s5775_s4 + $0x98] sm:$0xff] }
 0x3bd   : > { %1763 = vmatmul.f32.gmra.mxu3 %v1439_v29 }
 0x3c0   : > { %v944_v56 = vpop.f32.mrf.mxu3 }
 0x3c1   : > { %3028 = vst [vmem:[%s4558_s26 + $0x190] sm:$0xff] %v944_v56  ;;  %v1452_v56 = vld [vmem:[%s5775_s4 + $0xb0] sm:$0xff] }
 0x3c3   : > { %1650 = vmatmul.f32.gmra.mxu1 %v1438_v26  ;;  %v1451_v26 = vld [vmem:[%s5775_s4 + $0xa8] sm:$0xff] }
 0x3c5   : > { %1766 = vmatmul.f32.gmra.mxu3 %v1441_v49 }
 0x3c8   : > { %v947_v41 = vpop.f32.mrf.mxu3 }
 0x3c9   : > { %3030 = vst [vmem:[%s4558_s26 + $0x1a0] sm:$0xff] %v947_v41  ;;  %v1454_v41 = vld [vmem:[%s5775_s4 + $0xc0] sm:$0xff] }
 0x3cb   : > { %1653 = vmatmul.f32.gmra.mxu1 %v1440_v14  ;;  %v1453_v14 = vld [vmem:[%s5775_s4 + $0xb8] sm:$0xff] }
 0x3cd   : > { %1769 = vmatmul.f32.gmra.mxu3 %v1443_v22 }
 0x3d0   : > { %v950_v0 = vpop.f32.mrf.mxu3 }
 0x3d1   : > { %3032 = vst [vmem:[%s4558_s26 + $0x1b0] sm:$0xff] %v950_v0  ;;  %v1459_v0 = vld [vmem:[%s5775_s4 + $0xe8] sm:$0xff] }
 0x3d3   : > { %1656 = vmatmul.f32.gmra.mxu1 %v1442_v61  ;;  %v1455_v61 = vld [vmem:[%s5775_s4 + $0xc8] sm:$0xff] }
 0x3d5   : > { %1772 = vmatmul.f32.gmra.mxu3 %v1445_v35  ;;  %v1457_v35 = vld [vmem:[%s5775_s4 + $0xd8] sm:$0xff] }
 0x3d8   : > { %v953_v3 = vpop.f32.mrf.mxu3 }
 0x3d9   : > { %3034 = vst [vmem:[%s4558_s26 + $0x1c0] sm:$0xff] %v953_v3  ;;  %v1460_v3 = vld [vmem:[%s5775_s4 + $0xf0] sm:$0xff] }
 0x3db   : > { %1659 = vmatmul.f32.gmra.mxu1 %v1444_v62  ;;  %v1456_v62 = vld [vmem:[%s5775_s4 + $0xd0] sm:$0xff] }
 0x3dd   : > { %1775 = vmatmul.f32.gmra.mxu3 %v1447_v32  ;;  %v1458_v32 = vld [vmem:[%s5775_s4 + $0xe0] sm:$0xff] }
 0x3e0   : > { %v956_v29 = vpop.f32.mrf.mxu3 }
 0x3e1   : > { %3036 = vst [vmem:[%s4558_s26 + $0x1d0] sm:$0xff] %v956_v29 }
 0x3e3   : > { %1662 = vmatmul.f32.gmra.mxu1 %v1446_v37  ;;  %v1461_v37 = vld [vmem:[%s5775_s4 + $0xf8] sm:$0xff] }
 0x3e5   : > { %1778 = vmatmul.f32.gmra.mxu3 %v1449_v63  ;;  %v1463_v63 = vld [vmem:[%s5775_s4 + $0x108] sm:$0xff] }
 0x3e8   : > { %v959_v49 = vpop.f32.mrf.mxu3 }
 0x3e9   : > { %3038 = vst [vmem:[%s4558_s26 + $0x1e0] sm:$0xff] %v959_v49 }
 0x3eb   : > { %1665 = vmatmul.f32.gmra.mxu1 %v1448_v44 }
 0x3ed   : > { %1781 = vmatmul.f32.gmra.mxu3 %v1451_v26  ;;  %v1462_v26 = vld [vmem:[%s5775_s4 + $0x100] sm:$0xff] }
 0x3f0   : > { %v962_v22 = vpop.f32.mrf.mxu3 }
 0x3f1   : > { %3040 = vst [vmem:[%s4558_s26 + $0x1f0] sm:$0xff] %v962_v22  ;;  %v1467_v22 = vld [vmem:[%s5775_s4 + $0x128] sm:$0xff] }
 0x3f3   : > { %1668 = vmatmul.f32.gmra.mxu1 %v1450_v34  ;;  %v1465_v34 = vld [vmem:[%s5775_s4 + $0x118] sm:$0xff] }
 0x3f5   : > { %1784 = vmatmul.f32.gmra.mxu3 %v1453_v14 }
 0x3fb   : > { %1671 = vmatmul.f32.gmra.mxu1 %v1452_v56  ;;  %v1464_v56 = vld [vmem:[%s5775_s4 + $0x110] sm:$0xff] }
 0x3fd   : > { %1787 = vmatmul.f32.gmra.mxu3 %v1455_v61 }
 0x403   : > { %1674 = vmatmul.f32.gmra.mxu1 %v1454_v41 }
 0x405   : > { %1790 = vmatmul.f32.gmra.mxu3 %v1457_v35  ;;  %v1466_v35 = vld [vmem:[%s5775_s4 + $0x120] sm:$0xff] }
 0x40b   : > { %1677 = vmatmul.f32.gmra.mxu1 %v1456_v62  ;;  %v1469_v62 = vld [vmem:[%s5775_s4 + $0x138] sm:$0xff] }
 0x40d   : > { %1793 = vmatmul.f32.gmra.mxu3 %v1459_v0 }
 0x413   : > { %1680 = vmatmul.f32.gmra.mxu1 %v1458_v32 }
 0x415   : > { %1796 = vmatmul.f32.gmra.mxu3 %v1461_v37  ;;  %v1468_v37 = vld [vmem:[%s5775_s4 + $0x130] sm:$0xff] }
 0x41b   : > { %1683 = vmatmul.f32.gmra.mxu1 %v1460_v3  ;;  %v1471_v3 = vld [vmem:[%s5775_s4 + $0x148] sm:$0xff] }
 0x41d   : > { %1799 = vmatmul.f32.gmra.mxu3 %v1463_v63 }
 0x420   : > { %v4832_v44 = vpop.f32.mrf.mxu1  ;;  %v4834_v29 = vpop.f32.mrf.mxu3 }
 0x421   : > { %v1753_v57 = vadd.f32 %v4834_v29, %v4832_v44 }
 0x423   : > { %1686 = vmatmul.f32.gmra.mxu1 %v1462_v26 }
 0x425   : > { %1802 = vmatmul.f32.gmra.mxu3 %v1465_v34  ;;  %v1470_v34 = vld [vmem:[%s5775_s4 + $0x140] sm:$0xff] }
 0x428   : > { %v4842_v49 = vpop.f32.mrf.mxu1  ;;  %v4844_v14 = vpop.f32.mrf.mxu3 }
 0x429   : > { %v1756_v12 = vadd.f32 %v4844_v14, %v4842_v49 }
 0x42b   : > { %1689 = vmatmul.f32.gmra.mxu1 %v1464_v56  ;;  %v1473_v56 = vld [vmem:[%s5775_s4 + $0x158] sm:$0xff] }
 0x42d   : > { %1805 = vmatmul.f32.gmra.mxu3 %v1467_v22 }
 0x430   : > { %v4852_v61 = vpop.f32.mrf.mxu1  ;;  %v4854_v41 = vpop.f32.mrf.mxu3 }
 0x433   : > { %1692 = vmatmul.f32.gmra.mxu1 %v1466_v35 }
 0x435   : > { %1808 = vmatmul.f32.gmra.mxu3 %v1469_v62  ;;  %v1472_v62 = vld [vmem:[%s5775_s4 + $0x150] sm:$0xff] }
 0x438   : > { %v4862_v0 = vpop.f32.mrf.mxu1  ;;  %v4864_v32 = vpop.f32.mrf.mxu3 }
 0x43b   : > { %1695 = vmatmul.f32.gmra.mxu1 %v1468_v37  ;;  %v1475_v37 = vld [vmem:[%s5775_s4 + $0x168] sm:$0xff] }
 0x43d   : > { %1811 = vmatmul.f32.gmra.mxu3 %v1471_v3 }
 0x440   : > { %v4872_v63 = vpop.f32.mrf.mxu1  ;;  %v4874_v26 = vpop.f32.mrf.mxu3 }
 0x443   : > { %1698 = vmatmul.f32.gmra.mxu1 %v1470_v34  ;;  %v1474_v34 = vld [vmem:[%s5775_s4 + $0x160] sm:$0xff] }
 0x445   : > { %1814 = vmatmul.f32.gmra.mxu3 %v1473_v56  ;;  %v1477_v56 = vld [vmem:[%s5775_s4 + $0x178] sm:$0xff] }
 0x448   : > { %v4882_v22 = vpop.f32.mrf.mxu1  ;;  %v4884_v35 = vpop.f32.mrf.mxu3 }
 0x44b   : > { %1701 = vmatmul.f32.gmra.mxu1 %v1472_v62  ;;  %v1479_v62 = vld [vmem:[%s5775_s4 + $0x188] sm:$0xff] }
 0x44d   : > { %1817 = vmatmul.f32.gmra.mxu3 %v1475_v37 }
 0x450   : > { %v1657_v3 = vpop.f32.mrf.mxu1  ;;  %v1770_v5 = vpop.f32.mrf.mxu3 }
 0x453   : > { %1704 = vmatmul.f32.gmra.mxu1 %v1474_v34  ;;  %v1478_v34 = vld [vmem:[%s5775_s4 + $0x180] sm:$0xff] }
 0x455   : > { %1820 = vmatmul.f32.gmra.mxu3 %v1477_v56  ;;  %v1481_v56 = vld [vmem:[%s5775_s4 + $0x198] sm:$0xff] }
 0x458   : > { %v1660_v7 = vpop.f32.mrf.mxu1  ;;  %v1773_v9 = vpop.f32.mrf.mxu3 }
 0x459   : > { %v4979_v54 = vadd.f32 %v1773_v9, %v1660_v7 }
 0x45b   : > { %1707 = vmatmul.f32.gmra.mxu1 %v1476_v11  ;;  %v1480_v11 = vld [vmem:[%s5775_s4 + $0x190] sm:$0xff] }
 0x45d   : > { %1823 = vmatmul.f32.gmra.mxu3 %v1479_v62  ;;  %v1483_v62 = vld [vmem:[%s5775_s4 + $0x1a8] sm:$0xff] }
 0x460   : > { %v4904_v37 = vpop.f32.mrf.mxu1  ;;  %v4906_v13 = vpop.f32.mrf.mxu3 }
 0x463   : > { %1710 = vmatmul.f32.gmra.mxu1 %v1478_v34  ;;  %v1482_v34 = vld [vmem:[%s5775_s4 + $0x1a0] sm:$0xff] }
 0x465   : > { %1826 = vmatmul.f32.gmra.mxu3 %v1481_v56  ;;  %v1485_v56 = vld [vmem:[%s5775_s4 + $0x1b8] sm:$0xff] }
 0x468   : > { %v4914_v15 = vpop.f32.mrf.mxu1  ;;  %v4916_v17 = vpop.f32.mrf.mxu3 }
 0x469   : > { %v1780_v50 = vadd.f32 %v4916_v17, %v4914_v15 }
 0x46b   : > { %1713 = vmatmul.f32.gmra.mxu1 %v1480_v11  ;;  %v1484_v11 = vld [vmem:[%s5775_s4 + $0x1b0] sm:$0xff]  ;;  %v1849_v1 = vmax.f32 %v1756_v12, %v1780_v50 }
 0x46d   : > { %1829 = vmatmul.f32.gmra.mxu3 %v1483_v62  ;;  %v1487_v62 = vld [vmem:[%s5775_s4 + $0x1c8] sm:$0xff] }
 0x470   : > { %v4924_v19 = vpop.f32.mrf.mxu1  ;;  %v4926_v21 = vpop.f32.mrf.mxu3 }
 0x473   : > { %1716 = vmatmul.f32.gmra.mxu1 %v1482_v34  ;;  %v1486_v34 = vld [vmem:[%s5775_s4 + $0x1c0] sm:$0xff] }
 0x475   : > { %1832 = vmatmul.f32.gmra.mxu3 %v1485_v56  ;;  %v1489_v56 = vld [vmem:[%s5775_s4 + $0x1d8] sm:$0xff] }
 0x478   : > { %v4934_v23 = vpop.f32.mrf.mxu1  ;;  %v4936_v25 = vpop.f32.mrf.mxu3 }
 0x47b   : > { %1719 = vmatmul.f32.gmra.mxu1 %v1484_v11  ;;  %v1488_v11 = vld [vmem:[%s5775_s4 + $0x1d0] sm:$0xff] }
 0x47d   : > { %1835 = vmatmul.f32.gmra.mxu3 %v1487_v62  ;;  %v1491_v62 = vld [vmem:[%s5775_s4 + $0x1e8] sm:$0xff] }
 0x480   : > { %v4944_v27 = vpop.f32.mrf.mxu1  ;;  %v4946_v20 = vpop.f32.mrf.mxu3 }
 0x481   : > { %v1789_v12 = vadd.f32 %v4946_v20, %v4944_v27  ;;  %v1768_v20 = vadd.f32 %v4884_v35, %v4882_v22 }
 0x483   : > { %1722 = vmatmul.f32.gmra.mxu1 %v1486_v34  ;;  %v1490_v34 = vld [vmem:[%s5775_s4 + $0x1e0] sm:$0xff] }
 0x485   : > { %1838 = vmatmul.f32.gmra.mxu3 %v1489_v56  ;;  %v4967_v56 = vadd.f32 %v1770_v5, %v1657_v3 }
 0x488   : > { %v4954_v43 = vpop.f32.mrf.mxu1  ;;  %v4956_v60 = vpop.f32.mrf.mxu3 }
 0x48b   : > { %1725 = vmatmul.f32.gmra.mxu1 %v1488_v11 }
 0x48d   : > { %1841 = vmatmul.f32.gmra.mxu3 %v1491_v62 }
 0x490   : > { %v1681_v18 = vpop.f32.mrf.mxu1  ;;  %v1794_v2 = vpop.f32.mrf.mxu3 }
 0x491   : > { %v4969_v30 = vadd.f32 %v1794_v2, %v1681_v18 }
 0x493   : > { %1728 = vmatmul.f32.gmra.mxu1 %v1490_v34 }
 0x495   : > { %1844 = vmatmul.f32.gmra.mxu3 %v1493_v42 }
 0x498   : > { %v1684_v11 = vpop.f32.mrf.mxu1  ;;  %v1797_v62 = vpop.f32.mrf.mxu3 }
 0x499   : > { %v4981_v5 = vadd.f32 %v1797_v62, %v1684_v11 }
 0x49b   : > { %1731 = vmatmul.f32.gmra.mxu1 %v1492_v33  ;;  %v1777_v33 = vadd.f32 %v4906_v13, %v4904_v37  ;;  %v5955_v35 = vmax.f32 %v4979_v54, %v4981_v5  ;;  %v5956_v54 = vld [vmem:[#allocation67_spill] sm:$0xff]  ;;  %v5959_v5 = vld [vmem:[#allocation65_spill] sm:$0xff] }
 0x49d   : > { %v1848_v31 = vmax.f32 %v1753_v57, %v1777_v33  ;;  %v1783_v57 = vadd.f32 %v4926_v21, %v4924_v19 }
 0x4a0   : > { %v1687_v18 = vpop.f32.mrf.mxu1  ;;  %v1800_v3 = vpop.f32.mrf.mxu3 }
 0x4a1   : > { %v1801_v4 = vadd.f32 %v1800_v3, %v1687_v18 }
 0x4a8   : > { %v1690_v51 = vpop.f32.mrf.mxu1  ;;  %v1803_v24 = vpop.f32.mrf.mxu3 }
 0x4a9   : > { %v1804_v13 = vadd.f32 %v1803_v24, %v1690_v51 }
 0x4b0   : > { %v1693_v34 = vpop.f32.mrf.mxu1  ;;  %v1806_v42 = vpop.f32.mrf.mxu3 }
 0x4b1   : > { %v1807_v17 = vadd.f32 %v1806_v42, %v1693_v34 }
 0x4b8   : > { %v1696_v46 = vpop.f32.mrf.mxu1  ;;  %v1809_v52 = vpop.f32.mrf.mxu3 }
 0x4b9   : > { %v1810_v21 = vadd.f32 %v1809_v52, %v1696_v46 }
 0x4c0   : > { %v1699_v6 = vpop.f32.mrf.mxu1  ;;  %v1812_v39 = vpop.f32.mrf.mxu3 }
 0x4c8   : > { %v1702_v53 = vpop.f32.mrf.mxu1  ;;  %v1815_v45 = vpop.f32.mrf.mxu3 }
 0x4c9   : > { %v1816_v27 = vadd.f32 %v1815_v45, %v1702_v53 }
 0x4d0   : > { %v1705_v9 = vpop.f32.mrf.mxu1  ;;  %v1818_v7 = vpop.f32.mrf.mxu3 }
 0x4d8   : > { %v4985_v11 = vpop.f32.mrf.mxu1  ;;  %v4987_v62 = vpop.f32.mrf.mxu3 }
 0x4d9   : > { %v1822_v53 = vadd.f32 %v4987_v62, %v4985_v11  ;;  %v5965_v11 = vld [vmem:[#allocation51_spill] sm:$0xff]  ;;  %v5966_v62 = vld [vmem:[#allocation46_spill] sm:$0xff] }
 0x4e0   : > { %v1711_v2 = vpop.f32.mrf.mxu1  ;;  %v1824_v47 = vpop.f32.mrf.mxu3 }
 0x4e1   : > { %v1825_v38 = vadd.f32 %v1824_v47, %v1711_v2 }
 0x4e3   : > { %v1856_v28 = vmax.f32 %v1801_v4, %v1825_v38 }
 0x4e5   : > { %v4993_v8 = vmax.f32 %v1848_v31, %v1856_v28  ;;  %v1759_v31 = vadd.f32 %v4854_v41, %v4852_v61 }
 0x4e7   : > { %v1850_v47 = vmax.f32 %v1759_v31, %v1783_v57  ;;  %v5968_v31 = vld [vmem:[#allocation52_spill] sm:$0xff] }
 0x4e8   : > { %v1714_v58 = vpop.f32.mrf.mxu1  ;;  %v1827_v40 = vpop.f32.mrf.mxu3 }
 0x4e9   : > { %v1828_v37 = vadd.f32 %v1827_v40, %v1714_v58  ;;  %v1786_v40 = vadd.f32 %v4936_v25, %v4934_v23  ;;  %v1762_v58 = vadd.f32 %v4864_v32, %v4862_v0  ;;  %v1765_v25 = vadd.f32 %v4874_v26, %v4872_v63 }
 0x4ea   : > { %v1813_v23 = vadd.f32 %v1812_v39, %v1699_v6  ;;  %v1792_v0 = vadd.f32 %v4956_v60, %v4954_v43  ;;  %v1819_v26 = vadd.f32 %v1818_v7, %v1705_v9  ;;  %v5954_v60 = vmax.f32 %v4967_v56, %v4969_v30  ;;  %v5957_v30 = vld [vmem:[#allocation50_spill] sm:$0xff]  ;;  %v5958_v56 = vld [vmem:[#allocation56_spill] sm:$0xff] }
 0x4eb   : > { %v1857_v55 = vmax.f32 %v1804_v13, %v1828_v37  ;;  %v1852_v41 = vmax.f32 %v1765_v25, %v1789_v12  ;;  %v5964_v7 = vld [vmem:[#allocation40_spill] sm:$0xff] }
 0x4ec   : > { %v1853_v3 = vmax.f32 %v1768_v20, %v1792_v0  ;;  %v5975_v25 = vld [vmem:[#allocation44_spill] sm:$0xff]  ;;  %v5978_v0 = vld [vmem:[#allocation42_spill] sm:$0xff]  ;;  %v5979_v20 = vld [vmem:[#allocation41_spill] sm:$0xff] }
 0x4ed   : > { %v4999_v59 = vmax.f32 %v1849_v1, %v1857_v55  ;;  %v1851_v1 = vmax.f32 %v1762_v58, %v1786_v40 }
 0x4f0   : > { %v1717_v38 = vpop.f32.mrf.mxu1  ;;  %v1830_v28 = vpop.f32.mrf.mxu3 }
 0x4f1   : > { %v1831_v15 = vadd.f32 %v1830_v28, %v1717_v38  ;;  %v5967_v28 = vld [vmem:[#allocation61_spill] sm:$0xff] }
 0x4f3   : > { %v1858_v4 = vmax.f32 %v1807_v17, %v1831_v15 }
 0x4f5   : > { %v5005_v44 = vmax.f32 %v1850_v47, %v1858_v4  ;;  %v5969_v47 = vld [vmem:[#allocation59_spill] sm:$0xff] }
 0x4f8   : > { %v1720_v24 = vpop.f32.mrf.mxu1  ;;  %v1833_v55 = vpop.f32.mrf.mxu3 }
 0x4f9   : > { %v1834_v19 = vadd.f32 %v1833_v55, %v1720_v24  ;;  %v5970_v24 = vld [vmem:[#allocation66_spill] sm:$0xff] }
 0x4fb   : > { %v1859_v51 = vmax.f32 %v1810_v21, %v1834_v19  ;;  %v5971_v21 = vld [vmem:[#allocation48_spill] sm:$0xff] }
 0x4fd   : > { %v5011_v50 = vmax.f32 %v1851_v1, %v1859_v51  ;;  %v5972_v1 = vld [vmem:[#allocation55_spill] sm:$0xff] }
 0x4ff   : > { %v3485_v29 = vpack.i.bf16 %v5005_v44, %v5011_v50 }
 0x500   : > { %v1723_v49 = vpop.f32.mrf.mxu1  ;;  %v1836_v14 = vpop.f32.mrf.mxu3 }
 0x501   : > { %v1837_v61 = vadd.f32 %v1836_v14, %v1723_v49  ;;  %v5974_v49 = vld [vmem:[#allocation64_spill] sm:$0xff] }
 0x503   : > { %v1860_v52 = vmax.f32 %v1813_v23, %v1837_v61 }
 0x505   : > { %v5019_v46 = vmax.f32 %v1852_v41, %v1860_v52  ;;  %v5976_v41 = vld [vmem:[#allocation53_spill] sm:$0xff]  ;;  %v5977_v52 = vld [vmem:[#allocation62_spill] sm:$0xff] }
 0x508   : > { %v1726_v32 = vpop.f32.mrf.mxu1  ;;  %v1839_v2 = vpop.f32.mrf.mxu3 }
 0x509   : > { %v1840_v18 = vadd.f32 %v1839_v2, %v1726_v32 }
 0x50b   : > { %v1861_v34 = vmax.f32 %v1816_v27, %v1840_v18 }
 0x50d   : > { %v1869_v42 = vmax.f32 %v1853_v3, %v1861_v34  ;;  %v5980_v34 = vld [vmem:[#allocation49_spill] sm:$0xff] }
 0x50f   : > { %v3480_v39 = vpack.i.bf16 %v5019_v46, %v1869_v42 }
 0x510   : > { %v1729_v6 = vpop.f32.mrf.mxu1  ;;  %v1842_v63 = vpop.f32.mrf.mxu3 }
 0x511   : > { %v1843_v33 = vadd.f32 %v1842_v63, %v1729_v6  ;;  %v5982_v6 = vld [vmem:[#allocation60_spill] sm:$0xff]  ;;  %v3490_v63 = vpack.i.bf16 %v4993_v8, %v4999_v59 }
 0x513   : > { %v1862_v13 = vmax.f32 %v1819_v26, %v1843_v33  ;;  %v5983_v26 = vld [vmem:[#allocation57_spill] sm:$0xff] }
 0x515   : > { %v1870_v43 = vmax.f32 %v5954_v60, %v1862_v13  ;;  %v5984_v13 = vld [vmem:[#allocation58_spill] sm:$0xff] }
 0x518   : > { %v1732_v37 = vpop.f32.mrf.mxu1  ;;  %v1845_v57 = vpop.f32.mrf.mxu3 }
 0x519   : > { %v1846_v45 = vadd.f32 %v1845_v57, %v1732_v37 }
 0x51b   : > { %v1863_v22 = vmax.f32 %v1822_v53, %v1846_v45 }
 0x51d   : > { %v1871_v38 = vmax.f32 %v5955_v35, %v1863_v22 }
 0x51f   : > { %3232 = vmatpush.xpose.msk.msra.mxu2 %vm629_vm0, %v1871_v38  ;;  %v3475_v9 = vpack.i.bf16 %v1870_v43, %v1871_v38 }
 0x523   : > { %3233 = vmatpush.xpose.msk.msra.mxu2 %vm629_vm0, %v1870_v43 }
 0x527   : > { %3234 = vmatpush.xpose.msk.msra.mxu2 %vm629_vm0, %v1869_v42 }
 0x52b   : > { %3235 = vmatpush.xpose.msk.msra.mxu2 %vm629_vm0, %v5019_v46 }
 0x52f   : > { %3236 = vmatpush.xpose.msk.msra.mxu2 %vm629_vm0, %v5011_v50 }
 0x533   : > { %3237 = vmatpush.xpose.msk.msra.mxu2 %vm629_vm0, %v5005_v44 }
 0x537   : > { %3238 = vmatpush.xpose.msk.msra.mxu2 %vm629_vm0, %v4999_v59 }
 0x53b   : > { %3239 = vmatpush.xpose.msk.msra.mxu2 %vm629_vm0, %v4993_v8 }
 0x53e   : > { %3240 = vmatmul.msk.f32.vlgmr.msra.gmra.mxu2 %vm629_vm0, %v4662_v10  ;;  %v5960_v10 = vld [vmem:[#allocation45_spill] sm:$0xff] }
 0x546   : > { %3241 = vmatmul.msk.f32.gmra.mxu2 %vm629_vm0, %v4656_v16  ;;  %v5961_v16 = vld [vmem:[#allocation54_spill] sm:$0xff] }
 0x54e   : > { %3242 = vmatmul.msk.f32.gmra.mxu2 %vm629_vm0, %v4536_v48  ;;  %v5962_v48 = vld [vmem:[#allocation63_spill] sm:$0xff] }
 0x556   : > { %3243 = vmatmul.msk.f32.gmra.mxu2 %vm629_vm0, %v4591_v36  ;;  %v5963_v36 = vld [vmem:[#allocation43_spill] sm:$0xff] }
 0x55e   : > { %3244 = vmatmul.msk.f32.gmra.mxu2 %vm629_vm0, %v5956_v54 }
 0x566   : > { %3245 = vmatmul.msk.f32.gmra.mxu2 %vm629_vm0, %v5957_v30 }
 0x56e   : > { %3246 = vmatmul.msk.f32.gmra.mxu2 %vm629_vm0, %v5958_v56 }
 0x576   : > { %3247 = vmatmul.msk.f32.gmra.mxu2 %vm629_vm0, %v5959_v5 }
 0x57e   : > { %3248 = vmatmul.msk.f32.gmra.mxu2 %vm629_vm0, %v5960_v10 }
 0x586   : > { %3249 = vmatmul.msk.f32.gmra.mxu2 %vm629_vm0, %v5961_v16 }
 0x58e   : > { %3250 = vmatmul.msk.f32.gmra.mxu2 %vm629_vm0, %v5962_v48 }
 0x596   : > { %3251 = vmatmul.msk.f32.gmra.mxu2 %vm629_vm0, %v5963_v36 }
 0x59e   : > { %3252 = vmatmul.msk.f32.gmra.mxu2 %vm629_vm0, %v5964_v7 }
 0x5a6   : > { %3253 = vmatmul.msk.f32.gmra.mxu2 %vm629_vm0, %v5965_v11 }
 0x5ae   : > { %3254 = vmatmul.msk.f32.gmra.mxu2 %vm629_vm0, %v5966_v62 }
 0x5b6   : > { %3255 = vmatmul.msk.f32.gmra.mxu2 %vm629_vm0, %v5967_v28 }
 0x5be   : > { %3256 = vmatmul.msk.f32.gmra.mxu2 %vm629_vm0, %v5968_v31 }
 0x5c1   : > { %v1977_v17 = vpop.f32.mrf.mxu2 }
 0x5c2   : > { %v2074_v15 = vsel %vm2073_vm4, %v1977_v17, -inf }
 0x5c3   : > { %2075 = vmax.xlane.f32.xlu1 %v2074_v15 }
 0x5c6   : > { %3257 = vmatmul.msk.f32.gmra.mxu2 %vm629_vm0, %v5969_v47 }
 0x5c9   : > { %v1980_v4 = vpop.f32.mrf.mxu2 }
 0x5ca   : > { %v2077_v40 = vsel %vm2073_vm4, %v1980_v4, -inf }
 0x5cb   : > { %2078 = vmax.xlane.f32.xlu2 %v2077_v40 }
 0x5ce   : > { %3258 = vmatmul.msk.f32.gmra.mxu2 %vm629_vm0, %v5970_v24 }
 0x5d1   : > { %v1983_v55 = vpop.f32.mrf.mxu2 }
 0x5d2   : > { %v2080_v58 = vsel %vm2073_vm4, %v1983_v55, -inf }
 0x5d3   : > { %2081 = vmax.xlane.f32.xlu0 %v2080_v58 }
 0x5d6   : > { %3259 = vmatmul.msk.f32.gmra.mxu2 %vm629_vm0, %v5971_v21 }
 0x5d9   : > { %v5090_v19 = vpop.f32.mrf.mxu2 }
 0x5da   : > { %v2083_v2 = vsel %vm2073_vm4, %v5090_v19, -inf }
 0x5de   : > { %3260 = vmatmul.msk.f32.gmra.mxu2 %vm629_vm0, %v5972_v1 }
 0x5e1   : > { %v5094_v51 = vpop.f32.mrf.mxu2 }
 0x5e2   : > { %v2086_v12 = vsel %vm2073_vm4, %v5094_v51, -inf }
 0x5e3   : > { %3481 = vrot.lane.b32.xlu2 %v3480_v39, %s5973_s20  ;;  %2087 = vmax.xlane.f32.xlu1 %v2086_v12  ;;  %v5981_v39 = vld [vmem:[#allocation47_spill] sm:$0xff] }
 0x5e6   : > { %3261 = vmatmul.msk.f32.gmra.mxu2 %vm629_vm0, %v5974_v49 }
 0x5e7   : > { %3476 = vrot.lane.b32.xlu0 %v3475_v9, %s5973_s20 }
 0x5e9   : > { %v5102_v14 = vpop.f32.mrf.mxu2 }
 0x5ea   : > { %v2089_v18 = vsel %vm2073_vm4, %v5102_v14, -inf }
 0x5ee   : > { %3262 = vmatmul.msk.f32.gmra.mxu2 %vm629_vm0, %v5975_v25 }
 0x5f1   : > { %v5106_v23 = vpop.f32.mrf.mxu2 }
 0x5f2   : > { %v2092_v61 = vsel %vm2073_vm4, %v5106_v23, -inf }
 0x5f3   : > { %2093 = vmax.xlane.f32.xlu1 %v2092_v61 }
 0x5f6   : > { %3263 = vmatmul.msk.f32.gmra.mxu2 %vm629_vm0, %v5976_v41 }
 0x5f9   : > { %v5114_v46 = vpop.f32.mrf.mxu2 }
 0x5fa   : > { %v2095_v27 = vsel %vm2073_vm4, %v5114_v46, -inf }
 0x5fe   : > { %3264 = vmatmul.msk.f32.gmra.mxu2 %vm629_vm0, %v5977_v52 }
 0x601   : > { %v5118_v32 = vpop.f32.mrf.mxu2 }
 0x602   : > { %v2098_v47 = vsel %vm2073_vm4, %v5118_v32, -inf }
 0x606   : > { %3265 = vmatmul.msk.f32.gmra.mxu2 %vm629_vm0, %v5978_v0 }
 0x609   : > { %v5128_v3 = vpop.f32.mrf.mxu2 }
 0x60a   : > { %v2101_v42 = vsel %vm2073_vm4, %v5128_v3, -inf }
 0x60c   : > { %2084 = vmax.xlane.f32.xlu2 %v2083_v2 }
 0x60e   : > { %3266 = vmatmul.msk.f32.gmra.mxu2 %vm629_vm0, %v5979_v20 }
 0x611   : > { %2096 = vmax.xlane.f32.xlu0 %v2095_v27  ;;  %v5157_v56 = vpop.f32.mrf.mxu2 }
 0x612   : > { %v2104_v36 = vsel %vm2073_vm4, %v5157_v56, -inf }
 0x614   : > { %2090 = vmax.xlane.f32.xlu2 %v2089_v18 }
 0x616   : > { %3267 = vmatmul.msk.f32.gmra.mxu2 %vm629_vm0, %v5980_v34 }
 0x619   : > { %2102 = vmax.xlane.f32.xlu0 %v2101_v42  ;;  %v5165_v62 = vpop.f32.mrf.mxu2 }
 0x61a   : > { %v2107_v0 = vsel %vm2073_vm4, %v5165_v62, -inf }
 0x61e   : > { %3268 = vmatmul.msk.f32.gmra.mxu2 %vm629_vm0, %v5981_v39 }
 0x626   : > { %3269 = vmatmul.msk.f32.gmra.mxu2 %vm629_vm0, %v5982_v6 }
 0x62c   : > { %3491 = vrot.lane.b32.xlu2 %v3490_v63, %s5973_s20 }
 0x62e   : > { %3270 = vmatmul.msk.f32.gmra.mxu2 %vm629_vm0, %v5983_v26 }
 0x636   : > { %v2076_v33 = vpop.xlane.xlu1 %2075  ;;  %3271 = vmatmul.msk.f32.gmra.mxu2 %vm629_vm0, %v5984_v13 }
 0x637   : > { %v2170_v60 = vsub.f32 %v1977_v17, %v2076_v33  ;;  %v5168_v17 = vpop.f32.mrf.mxu2 }
 0x639   : > { %v2202_v43 = vmul.f32 1.442695, %v2170_v60 }
 0x63b   : > { %3501 = vpow2.f32 %v2202_v43 }
 0x63e   : > { %v2079_v37 = vpop.xlane.xlu2 %2078 }
 0x63f   : > { %v2171_v53 = vsub.f32 %v1980_v4, %v2079_v37  ;;  %v5173_v24 = vpop.f32.mrf.mxu2 }
 0x640   : > { %v2113_v42 = vsel %vm2073_vm4, %v5173_v24, -inf }
 0x641   : > { %v5145_v57 = vpop.eup %3501  ;;  %v2204_v8 = vmul.f32 1.442695, %v2171_v53 }
 0x642   : > { %v2266_v45 = vsel %vm2073_vm4, %v5145_v57, 0.0 }
 0x643   : > { %2267 = vadd.xlane.f32.xlu1 %v2266_v45  ;;  %3503 = vpow2.f32 %v2204_v8 }
 0x646   : > { %v2082_v59 = vpop.xlane.xlu0 %2081  ;;  %v3482_v16 = vpop.permute.xlu2 %3481 }
 0x647   : > { %v2172_v22 = vsub.f32 %v1983_v55, %v2082_v59  ;;  %v3483_v7 = vunpack.i.l.bf16 %v3482_v16  ;;  %v3484_v11 = vunpack.i.h.bf16 %v3482_v16 }
 0x649   : > { %v2206_v35 = vmul.f32 1.442695, %v2172_v22  ;;  %v5149_v38 = vpop.eup %3503 }
 0x64a   : > { %v2269_v30 = vsel %vm2073_vm4, %v5149_v38, 0.0 }
 0x64b   : > { %3505 = vpow2.f32 %v2206_v35 }
 0x651   : > { %v5151_v9 = vpop.eup %3505 }
 0x652   : > { %v2272_v54 = vsel %vm2073_vm4, %v5151_v9, 0.0 }
 0x653   : > { %2273 = vadd.xlane.f32.xlu0 %v2272_v54 }
 0x655   : > { %2270 = vadd.xlane.f32.xlu2 %v2269_v30 }
 0x656   : > { %v2088_v28 = vpop.xlane.xlu1 %2087 }
 0x657   : > { %v2174_v31 = vsub.f32 %v5094_v51, %v2088_v28 }
 0x659   : > { %v3477_v5 = vpop.permute.xlu0 %3476  ;;  %v2210_v50 = vmul.f32 1.442695, %v2174_v31 }
 0x65a   : > { %v3478_v10 = vunpack.i.l.bf16 %v3477_v5  ;;  %v3479_v48 = vunpack.i.h.bf16 %v3477_v5 }
 0x65c   : > { %2554 = vmatpush.msra.mxu0 %v3478_v10  ;;  %3343 = vmatpush.msra.mxu3 %v3478_v10 }
 0x65d   : > { %3486 = vrot.lane.b32.xlu1 %v3485_v29, %s5973_s20  ;;  %2105 = vmax.xlane.f32.xlu2 %v2104_v36 }
 0x65e   : > { %2555 = vmatpush.msra.mxu0 %v3479_v48  ;;  %3344 = vmatpush.msra.mxu3 %v3479_v48 }
 0x660   : > { %2556 = vmatpush.msra.mxu0 %v3483_v7  ;;  %3345 = vmatpush.msra.mxu3 %v3483_v7 }
 0x662   : > { %2557 = vmatpush.msra.mxu0 %v3484_v11  ;;  %3346 = vmatpush.msra.mxu3 %v3484_v11 }
 0x666   : > { %v2094_v4 = vpop.xlane.xlu1 %2093 }
 0x667   : > { %v2176_v21 = vsub.f32 %v5106_v23, %v2094_v4  ;;  %v5188_v23 = vpop.f32.mrf.mxu2 }
 0x669   : > { %v2214_v25 = vmul.f32 1.442695, %v2176_v21 }
 0x66f   : > { %v5205_v39 = vpop.f32.mrf.mxu2 }
 0x670   : > { %v2119_v33 = vsel %vm2073_vm4, %v5205_v39, -inf }
 0x677   : > { %v5211_v26 = vpop.f32.mrf.mxu2 }
 0x67f   : > { %v2085_v15 = vpop.xlane.xlu2 %2084  ;;  %v5219_v43 = vpop.f32.mrf.mxu2 }
 0x680   : > { %v2173_v44 = vsub.f32 %v5090_v19, %v2085_v15  ;;  %v2125_v37 = vsel %vm2073_vm4, %v5219_v43, -inf }
 0x682   : > { %v2208_v29 = vmul.f32 1.442695, %v2173_v44 }
 0x684   : > { %3507 = vpow2.f32 %v2208_v29  ;;  %v2097_v1 = vpop.xlane.xlu0 %2096 }
 0x685   : > { %3509 = vpow2.f32 %v2210_v50  ;;  %v2177_v49 = vsub.f32 %v5114_v46, %v2097_v1  ;;  %v2110_v46 = vsel %vm2073_vm4, %v5168_v17, -inf }
 0x687   : > { %2099 = vmax.xlane.f32.xlu1 %v2098_v47  ;;  %v2091_v40 = vpop.xlane.xlu2 %2090  ;;  %v5223_v53 = vpop.f32.mrf.mxu2 }
 0x688   : > { %v2175_v55 = vsub.f32 %v5102_v14, %v2091_v40  ;;  %v2216_v14 = vmul.f32 1.442695, %v2177_v49  ;;  %v2128_v47 = vsel %vm2073_vm4, %v5223_v53, -inf }
 0x68a   : > { %v5176_v58 = vpop.eup %3507  ;;  %v2212_v19 = vmul.f32 1.442695, %v2175_v55 }
 0x68b   : > { %v5179_v51 = vpop.eup %3509  ;;  %v2275_v12 = vsel %vm2073_vm4, %v5176_v58, 0.0 }
 0x68c   : > { %3511 = vpow2.f32 %v2212_v19  ;;  %2276 = vadd.xlane.f32.xlu0 %v2275_v12  ;;  %v2278_v61 = vsel %vm2073_vm4, %v5179_v51, 0.0  ;;  %v2103_v2 = vpop.xlane.xlu0 %2102 }
 0x68d   : > { %3513 = vpow2.f32 %v2214_v25  ;;  %v2179_v27 = vsub.f32 %v5128_v3, %v2103_v2  ;;  %v2116_v3 = vsel %vm2073_vm4, %v5188_v23, -inf }
 0x68e   : > { %3515 = vpow2.f32 %v2216_v14 }
 0x68f   : > { %2279 = vadd.xlane.f32.xlu1 %v2278_v61  ;;  %v2220_v6 = vmul.f32 1.442695, %v2179_v27  ;;  %v3492_v45 = vpop.permute.xlu2 %3491  ;;  %v5225_v22 = vpop.f32.mrf.mxu2 }
 0x690   : > { %v3493_v7 = vunpack.i.l.bf16 %v3492_v45  ;;  %v3494_v11 = vunpack.i.h.bf16 %v3492_v45 }
 0x691   : > { %3517 = vpow2.f32 %v2220_v6 }
 0x692   : > { %v5186_v41 = vpop.eup %3511 }
 0x693   : > { %v2281_v52 = vsel %vm2073_vm4, %v5186_v41, 0.0  ;;  %v5196_v20 = vpop.eup %3513 }
 0x694   : > { %2282 = vadd.xlane.f32.xlu2 %v2281_v52  ;;  %2108 = vmax.xlane.f32.xlu0 %v2107_v0  ;;  %v5199_v18 = vpop.eup %3515  ;;  %v2284_v34 = vsel %vm2073_vm4, %v5196_v20, 0.0 }
 0x695   : > { %v2287_v63 = vsel %vm2073_vm4, %v5199_v18, 0.0 }
 0x697   : > { %2111 = vmax.xlane.f32.xlu1 %v2110_v46  ;;  %v5215_v13 = vpop.eup %3517  ;;  %v5228_v36 = vpop.f32.mrf.mxu2 }
 0x698   : > { %v2293_v60 = vsel %vm2073_vm4, %v5215_v13, 0.0 }
 0x69c   : > { %2285 = vadd.xlane.f32.xlu0 %v2284_v34  ;;  %2114 = vmax.xlane.f32.xlu2 %v2113_v42 }
 0x69f   : > { %2288 = vadd.xlane.f32.xlu1 %v2287_v63  ;;  %v5236_v50 = vpop.f32.mrf.mxu2  ;;  %v2122_v63 = vsel %vm2073_vm4, %v5211_v26, -inf }
 0x6a4   : > { %2117 = vmax.xlane.f32.xlu0 %v2116_v3 }
 0x6a7   : > { %2120 = vmax.xlane.f32.xlu1 %v2119_v33  ;;  %v5243_v40 = vpop.f32.mrf.mxu2 }
 0x6ac   : > { %2294 = vadd.xlane.f32.xlu0 %v2293_v60 }
 0x6af   : > { %v5246_v55 = vpop.f32.mrf.mxu2 }
 0x6b4   : > { %2126 = vmax.xlane.f32.xlu0 %v2125_v37 }
 0x6b6   : > { %v2268_v8 = vpop.xlane.xlu1 %2267 }
 0x6b7   : > { %3519 = vrcp.f32 %v2268_v8  ;;  %v5249_v19 = vpop.f32.mrf.mxu2 }
 0x6bd   : > { %v3520_v48 = vpop.eup %3519 }
 0x6be   : > { %v2394_v28 = vmul.f32 %v3520_v48, %v5145_v57 }
 0x6c6   : > { %v2274_v31 = vpop.xlane.xlu0 %2273 }
 0x6c8   : > { %v2271_v59 = vpop.xlane.xlu2 %2270 }
 0x6cf   : > { %v3487_v35 = vpop.permute.xlu1 %3486 }
 0x6d0   : > { %v3488_v54 = vunpack.i.l.bf16 %v3487_v35  ;;  %v2106_v30 = vpop.xlane.xlu2 %2105  ;;  %v3489_v10 = vunpack.i.h.bf16 %v3487_v35 }
 0x6d1   : > { %v2180_v5 = vsub.f32 %v5157_v56, %v2106_v30 }
 0x6d2   : > { %2558 = vmatpush.msra.mxu0 %v3488_v54  ;;  %3347 = vmatpush.msra.mxu3 %v3488_v54 }
 0x6d3   : > { %v2222_v16 = vmul.f32 1.442695, %v2180_v5 }
 0x6d4   : > { %2559 = vmatpush.msra.mxu0 %v3489_v10  ;;  %3348 = vmatpush.msra.mxu3 %v3489_v10 }
 0x6d5   : > { %3521 = vpow2.f32 %v2222_v16 }
 0x6d6   : > { %3523 = vrcp.f32 %v2271_v59  ;;  %2560 = vmatpush.msra.mxu0 %v3493_v7  ;;  %3349 = vmatpush.msra.mxu3 %v3493_v7 }
 0x6d7   : > { %3525 = vrcp.f32 %v2274_v31 }
 0x6d8   : > { %2561 = vmatpush.msra.mxu0 %v3494_v11  ;;  %3350 = vmatpush.msra.mxu3 %v3494_v11 }
 0x6d9   : > { %3272 = vmatmul.msk.f32.vlgmr.msra.gmra.mxu0 %vm2073_vm4, %v2394_v28 }
 0x6db   : > { %v5232_v56 = vpop.eup %3521 }
 0x6dc   : > { %v3524_v15 = vpop.eup %3523  ;;  %v2296_v44 = vsel %vm2073_vm4, %v5232_v56, 0.0 }
 0x6dd   : > { %2297 = vadd.xlane.f32.xlu1 %v2296_v44  ;;  %v2395_v29 = vmul.f32 %v3524_v15, %v5149_v38  ;;  %v3526_v57 = vpop.eup %3525 }
 0x6de   : > { %v2396_v4 = vmul.f32 %v3526_v57, %v5151_v9  ;;  %v5253_v9 = vpop.f32.mrf.mxu2 }
 0x6e1   : > { %3273 = vmatmul.msk.f32.gmra.mxu0 %vm2073_vm4, %v2395_v29  ;;  %v2137_v29 = vsel %vm2073_vm4, %v5236_v50, -inf }
 0x6e5   : > { %2129 = vmax.xlane.f32.xlu1 %v2128_v47 }
 0x6e6   : > { %v5265_v60 = vpop.f32.mrf.mxu2 }
 0x6e9   : > { %3274 = vmatmul.msk.f32.gmra.mxu0 %vm2073_vm4, %v2396_v4 }
 0x6ee   : > { %v5281_v48 = vpop.f32.mrf.mxu2 }
 0x6f6   : > { %v5298_v4 = vpop.f32.mrf.mxu2 }
 0x6fa   : > { %v2100_v21 = vpop.xlane.xlu1 %2099 }
 0x6fb   : > { %v2178_v1 = vsub.f32 %v5118_v32, %v2100_v21 }
 0x6fd   : > { %v2218_v38 = vmul.f32 1.442695, %v2178_v1 }
 0x6ff   : > { %3527 = vpow2.f32 %v2218_v38  ;;  %v2277_v12 = vpop.xlane.xlu0 %2276 }
 0x700   : > { %3529 = vrcp.f32 %v2277_v12 }
 0x702   : > { %v2280_v49 = vpop.xlane.xlu1 %2279 }
 0x703   : > { %3531 = vrcp.f32 %v2280_v49 }
 0x705   : > { %v5251_v25 = vpop.eup %3527 }
 0x706   : > { %v3530_v61 = vpop.eup %3529  ;;  %v2290_v14 = vsel %vm2073_vm4, %v5251_v25, 0.0 }
 0x707   : > { %2291 = vadd.xlane.f32.xlu2 %v2290_v14  ;;  %v2283_v52 = vpop.xlane.xlu2 %2282  ;;  %v2109_v0 = vpop.xlane.xlu0 %2108  ;;  %v2397_v32 = vmul.f32 %v3530_v61, %v5176_v58  ;;  %v2140_v61 = vsel %vm2073_vm4, %v5243_v40, -inf  ;;  %v2143_v14 = vsel %vm2073_vm4, %v5246_v55, -inf }
 0x708   : > { %v2181_v46 = vsub.f32 %v5165_v62, %v2109_v0  ;;  %v2659_v0 = vld [vmem:[%s5782_s11] sm:$0xff] }
 0x709   : > { %3275 = vmatmul.msk.f32.gmra.mxu0 %vm2073_vm4, %v2397_v32  ;;  %v3532_v42 = vpop.eup %3531 }
 0x70a   : > { %v2224_v2 = vmul.f32 1.442695, %v2181_v46  ;;  %v2112_v27 = vpop.xlane.xlu1 %2111  ;;  %v2398_v58 = vmul.f32 %v3532_v42, %v5179_v51 }
 0x70b   : > { %v2182_v34 = vsub.f32 %v5168_v17, %v2112_v27 }
 0x70c   : > { %3533 = vpow2.f32 %v2224_v2 }
 0x70d   : > { %v2226_v6 = vmul.f32 1.442695, %v2182_v34  ;;  %3535 = vrcp.f32 %v2283_v52  ;;  %v5311_v52 = vpop.f32.mrf.mxu2 }
 0x70e   : > { %v2161_v46 = vsel %vm2073_vm4, %v5311_v52, -inf }
 0x70f   : > { %3537 = vpow2.f32 %v2226_v6  ;;  %2123 = vmax.xlane.f32.xlu2 %v2122_v63  ;;  %v2286_v3 = vpop.xlane.xlu0 %2285  ;;  %v2115_v33 = vpop.xlane.xlu2 %2114 }
 0x710   : > { %v2183_v62 = vsub.f32 %v5173_v24, %v2115_v33 }
 0x711   : > { %3276 = vmatmul.msk.f32.gmra.mxu0 %vm2073_vm4, %v2398_v58 }
 0x712   : > { %v2228_v17 = vmul.f32 1.442695, %v2183_v62  ;;  %v2289_v37 = vpop.xlane.xlu1 %2288  ;;  %v5268_v45 = vpop.eup %3533 }
 0x713   : > { %v3536_v8 = vpop.eup %3535  ;;  %v2299_v35 = vsel %vm2073_vm4, %v5268_v45, 0.0 }
 0x714   : > { %3539 = vpow2.f32 %v2228_v17  ;;  %v2399_v54 = vmul.f32 %v3536_v8, %v5186_v41  ;;  %v2131_v41 = vsel %vm2073_vm4, %v5225_v22, -inf }
 0x715   : > { %v5270_v59 = vpop.eup %3537  ;;  %3541 = vrcp.f32 %v2286_v3  ;;  %v5325_v2 = vpop.f32.mrf.mxu2 }
 0x716   : > { %v2302_v51 = vsel %vm2073_vm4, %v5270_v59, 0.0  ;;  %v2164_v27 = vsel %vm2073_vm4, %v5325_v2, -inf }
 0x717   : > { %2300 = vadd.xlane.f32.xlu2 %v2299_v35  ;;  %2303 = vadd.xlane.f32.xlu0 %v2302_v51  ;;  %v2118_v24 = vpop.xlane.xlu0 %2117 }
 0x718   : > { %v2184_v30 = vsub.f32 %v5188_v23, %v2118_v24  ;;  %v2134_v23 = vsel %vm2073_vm4, %v5228_v36, -inf }
 0x719   : > { %3277 = vmatmul.msk.f32.gmra.mxu0 %vm2073_vm4, %v2399_v54 }
 0x71a   : > { %v5279_v5 = vpop.eup %3539  ;;  %v2230_v10 = vmul.f32 1.442695, %v2184_v30  ;;  %v2121_v16 = vpop.xlane.xlu1 %2120 }
 0x71b   : > { %v2185_v7 = vsub.f32 %v5205_v39, %v2121_v16  ;;  %v2305_v11 = vsel %vm2073_vm4, %v5279_v5, 0.0  ;;  %v3542_v28 = vpop.eup %3541 }
 0x71c   : > { %2306 = vadd.xlane.f32.xlu1 %v2305_v11  ;;  %3543 = vpow2.f32 %v2230_v10  ;;  %v2400_v39 = vmul.f32 %v3542_v28, %v5196_v20 }
 0x71d   : > { %v2232_v31 = vmul.f32 1.442695, %v2185_v7  ;;  %3545 = vrcp.f32 %v2289_v37  ;;  %v5329_v34 = vpop.f32.mrf.mxu2 }
 0x71e   : > { %v2167_v42 = vsel %vm2073_vm4, %v5329_v34, -inf }
 0x71f   : > { %3547 = vpow2.f32 %v2232_v31  ;;  %2132 = vmax.xlane.f32.xlu2 %v2131_v41  ;;  %2135 = vmax.xlane.f32.xlu0 %v2134_v23  ;;  %v2295_v15 = vpop.xlane.xlu0 %2294 }
 0x721   : > { %3278 = vmatmul.msk.f32.gmra.mxu0 %vm2073_vm4, %v2400_v39 }
 0x722   : > { %v5292_v44 = vpop.eup %3543 }
 0x723   : > { %v3546_v57 = vpop.eup %3545  ;;  %v2308_v21 = vsel %vm2073_vm4, %v5292_v44, 0.0 }
 0x724   : > { %2138 = vmax.xlane.f32.xlu1 %v2137_v29  ;;  %v2401_v38 = vmul.f32 %v3546_v57, %v5199_v18  ;;  %v2660_v18 = vld [vmem:[%s5782_s11 + $0x8] sm:$0xff] }
 0x725   : > { %v5296_v47 = vpop.eup %3547  ;;  %2775 = vmatpush.msra.mxu1 %v2660_v18  ;;  %3351 = vmatpush.msrb.mxu3 %v2660_v18 }
 0x726   : > { %v2311_v1 = vsel %vm2073_vm4, %v5296_v47, 0.0 }
 0x727   : > { %2309 = vadd.xlane.f32.xlu2 %v2308_v21  ;;  %2312 = vadd.xlane.f32.xlu0 %v2311_v1  ;;  %v2127_v20 = vpop.xlane.xlu0 %2126 }
 0x728   : > { %v2187_v12 = vsub.f32 %v5219_v43, %v2127_v20  ;;  %2776 = vmatpush.msra.mxu1 %v2659_v0  ;;  %3352 = vmatpush.msrb.mxu3 %v2659_v0  ;;  %v2146_v20 = vsel %vm2073_vm4, %v5249_v19, -inf }
 0x729   : > { %3279 = vmatmul.msk.f32.gmra.mxu0 %vm2073_vm4, %v2401_v38 }
 0x72a   : > { %v2236_v49 = vmul.f32 1.442695, %v2187_v12 }
 0x72c   : > { %3549 = vpow2.f32 %v2236_v49 }
 0x72f   : > { %2141 = vmax.xlane.f32.xlu2 %v2140_v61  ;;  %2144 = vmax.xlane.f32.xlu0 %v2143_v14 }
 0x732   : > { %v5316_v43 = vpop.eup %3549 }
 0x733   : > { %v2317_v32 = vsel %vm2073_vm4, %v5316_v43, 0.0 }
 0x737   : > { %2318 = vadd.xlane.f32.xlu2 %v2317_v32  ;;  %2162 = vmax.xlane.f32.xlu0 %v2161_v46 }
 0x73f   : > { %2165 = vmax.xlane.f32.xlu0 %v2164_v27 }
 0x747   : > { %2168 = vmax.xlane.f32.xlu0 %v2167_v42 }
 0x750   : > { %v2298_v6 = vpop.xlane.xlu1 %2297 }
 0x756   : > { %v2563_v63 = vpop.f32.mrf.mxu0 }
 0x757   : > { %3304 = vmatmul.msk.f32.vlgmr.msra.gmra.mxu1 %vm629_vm0, %v2563_v63 }
 0x758   : > { %v2130_v3 = vpop.xlane.xlu1 %2129 }
 0x759   : > { %v2188_v33 = vsub.f32 %v5223_v53, %v2130_v3 }
 0x75b   : > { %v2238_v58 = vmul.f32 1.442695, %v2188_v33 }
 0x75d   : > { %3551 = vpow2.f32 %v2238_v58 }
 0x75e   : > { %v2566_v62 = vpop.f32.mrf.mxu0 }
 0x75f   : > { %3305 = vmatmul.msk.f32.gmra.mxu1 %vm629_vm0, %v2566_v62 }
 0x763   : > { %v5336_v17 = vpop.eup %3551 }
 0x764   : > { %v2320_v37 = vsel %vm2073_vm4, %v5336_v17, 0.0 }
 0x765   : > { %2321 = vadd.xlane.f32.xlu2 %v2320_v37 }
 0x766   : > { %v2569_v8 = vpop.f32.mrf.mxu0 }
 0x767   : > { %3306 = vmatmul.msk.f32.gmra.mxu1 %vm629_vm0, %v2569_v8 }
 0x77a   : > { %v2292_v35 = vpop.xlane.xlu2 %2291 }
 0x77b   : > { %3553 = vrcp.f32 %v2292_v35 }
 0x77c   : > { %3555 = vrcp.f32 %v2295_v15 }
 0x781   : > { %v3554_v51 = vpop.eup %3553 }
 0x782   : > { %v2124_v24 = vpop.xlane.xlu2 %2123  ;;  %v2402_v53 = vmul.f32 %v3554_v51, %v5251_v25  ;;  %v3556_v16 = vpop.eup %3555 }
 0x783   : > { %v2186_v54 = vsub.f32 %v5211_v26, %v2124_v24  ;;  %v2403_v28 = vmul.f32 %v3556_v16, %v5215_v13 }
 0x784   : > { %3280 = vmatmul.msk.f32.gmra.mxu0 %vm2073_vm4, %v2402_v53 }
 0x785   : > { %v2234_v30 = vmul.f32 1.442695, %v2186_v54  ;;  %v2155_v54 = vsel %vm2073_vm4, %v5281_v48, -inf }
 0x786   : > { %v2572_v10 = vpop.f32.mrf.mxu0 }
 0x787   : > { %3557 = vpow2.f32 %v2234_v30  ;;  %3307 = vmatmul.msk.f32.gmra.mxu1 %vm629_vm0, %v2572_v10  ;;  %v2158_v30 = vsel %vm2073_vm4, %v5298_v4, -inf }
 0x788   : > { %3559 = vrcp.f32 %v2298_v6 }
 0x78a   : > { %v2301_v7 = vpop.xlane.xlu2 %2300  ;;  %v2304_v11 = vpop.xlane.xlu0 %2303 }
 0x78b   : > { %3561 = vrcp.f32 %v2301_v7 }
 0x78c   : > { %3281 = vmatmul.msk.f32.gmra.mxu0 %vm2073_vm4, %v2403_v28 }
 0x78d   : > { %v5347_v31 = vpop.eup %3557 }
 0x78e   : > { %v2575_v25 = vpop.f32.mrf.mxu0  ;;  %v2314_v26 = vsel %vm2073_vm4, %v5347_v31, 0.0  ;;  %v3560_v41 = vpop.eup %3559 }
 0x78f   : > { %2315 = vadd.xlane.f32.xlu1 %v2314_v26  ;;  %3308 = vmatmul.msk.f32.gmra.mxu1 %vm629_vm0, %v2575_v25  ;;  %v2307_v23 = vpop.xlane.xlu1 %2306  ;;  %v2404_v29 = vmul.f32 %v3560_v41, %v5232_v56  ;;  %v5410_v41 = vld [vmem:[%s5783_s12] ss:$0 sm:$0xff] }
 0x791   : > { %v3562_v38 = vpop.eup %3561 }
 0x792   : > { %v2133_v15 = vpop.xlane.xlu2 %2132  ;;  %v2136_v39 = vpop.xlane.xlu0 %2135  ;;  %v2405_v18 = vmul.f32 %v3562_v38, %v5268_v45 }
 0x793   : > { %v2189_v13 = vsub.f32 %v5225_v22, %v2133_v15  ;;  %v2190_v21 = vsub.f32 %v5228_v36, %v2136_v39  ;;  %v5421_v39 = vld [vmem:[%s5785_s14] ss:$0 sm:$0xff] }
 0x794   : > { %3282 = vmatmul.msk.f32.gmra.mxu0 %vm2073_vm4, %v2404_v29 }
 0x795   : > { %v2240_v57 = vmul.f32 1.442695, %v2189_v13  ;;  %v2242_v56 = vmul.f32 1.442695, %v2190_v21 }
 0x796   : > { %v2578_v1 = vpop.f32.mrf.mxu0 }
 0x797   : > { %3563 = vpow2.f32 %v2240_v57  ;;  %2147 = vmax.xlane.f32.xlu1 %v2146_v20  ;;  %3309 = vmatmul.msk.f32.gmra.mxu1 %vm629_vm0, %v2578_v1  ;;  %v2139_v12 = vpop.xlane.xlu1 %2138  ;;  %v5985_v57 = vld [vmem:[#allocation8_spill] sm:$0xff] }
 0x798   : > { %v2191_v49 = vsub.f32 %v5236_v50, %v2139_v12  ;;  %3565 = vrcp.f32 %v2304_v11  ;;  %v2149_v50 = vsel %vm2073_vm4, %v5253_v9, -inf  ;;  %v5986_v21 = vmax.f32 %v5985_v57, 0.0 }
 0x79a   : > { %v2244_v22 = vmul.f32 1.442695, %v2191_v49  ;;  %v2310_v61 = vpop.xlane.xlu2 %2309  ;;  %v2313_v14 = vpop.xlane.xlu0 %2312 }
 0x79c   : > { %3567 = vpow2.f32 %v2244_v22  ;;  %3283 = vmatmul.msk.f32.gmra.mxu0 %vm2073_vm4, %v2405_v18 }
 0x79d   : > { %v5362_v36 = vpop.eup %3563  ;;  %3569 = vpow2.f32 %v2242_v56  ;;  %v5987_v56 = vld [vmem:[#allocation9_spill] sm:$0xff] }
 0x79e   : > { %v2581_v0 = vpop.f32.mrf.mxu0  ;;  %v2323_v32 = vsel %vm2073_vm4, %v5362_v36, 0.0  ;;  %v3566_v46 = vpop.eup %3565  ;;  %3571 = vrcp.f32 %v2307_v23  ;;  %v5415_v23 = vld [vmem:[%s5784_s13] ss:$0 sm:$0xff]  ;;  %v5988_v22 = vmax.f32 %v5987_v56, 0.0 }
 0x79f   : > { %2324 = vadd.xlane.f32.xlu2 %v2323_v32  ;;  %2150 = vmax.xlane.f32.xlu1 %v2149_v50  ;;  %v2406_v6 = vmul.f32 %v3566_v46, %v5270_v59  ;;  %v2152_v59 = vsel %vm2073_vm4, %v5265_v60, -inf  ;;  %v5989_v50 = vld [vmem:[#allocation10_spill] sm:$0xff] }
 0x7a0   : > { %3310 = vmatmul.msk.f32.gmra.mxu1 %vm629_vm0, %v2581_v0  ;;  %v5990_v46 = vmax.f32 %v5989_v50, 0.0 }
 0x7a2   : > { %v5369_v45 = vpop.eup %3567  ;;  %v2142_v27 = vpop.xlane.xlu2 %2141 }
 0x7a3   : > { %v2145_v42 = vpop.xlane.xlu0 %2144  ;;  %v5372_v63 = vpop.eup %3569  ;;  %v2329_v33 = vsel %vm2073_vm4, %v5369_v45, 0.0  ;;  %v2192_v58 = vsub.f32 %v5243_v40, %v2142_v27 }
 0x7a4   : > { %v2193_v3 = vsub.f32 %v5246_v55, %v2145_v42  ;;  %3284 = vmatmul.msk.f32.gmra.mxu0 %vm2073_vm4, %v2406_v6  ;;  %2330 = vadd.xlane.f32.xlu0 %v2329_v33  ;;  %v2326_v8 = vsel %vm2073_vm4, %v5372_v63, 0.0  ;;  %v3572_v35 = vpop.eup %3571 }
 0x7a5   : > { %v2246_v55 = vmul.f32 1.442695, %v2192_v58  ;;  %v2407_v24 = vmul.f32 %v3572_v35, %v5279_v5 }
 0x7a6   : > { %v2248_v62 = vmul.f32 1.442695, %v2193_v3  ;;  %v2584_v37 = vpop.f32.mrf.mxu0 }
 0x7a7   : > { %2327 = vadd.xlane.f32.xlu2 %v2326_v8  ;;  %2153 = vmax.xlane.f32.xlu1 %v2152_v59 }
 0x7a8   : > { %3573 = vpow2.f32 %v2248_v62  ;;  %3311 = vmatmul.msk.f32.gmra.mxu1 %vm629_vm0, %v2584_v37 }
 0x7a9   : > { %3575 = vrcp.f32 %v2310_v61 }
 0x7aa   : > { %3577 = vpow2.f32 %v2246_v55  ;;  %v2319_v6 = vpop.xlane.xlu2 %2318 }
 0x7ab   : > { %v2163_v51 = vpop.xlane.xlu0 %2162  ;;  %3579 = vrcp.f32 %v2313_v14 }
 0x7ac   : > { %3285 = vmatmul.msk.f32.gmra.mxu0 %vm2073_vm4, %v2407_v24  ;;  %v2199_v40 = vsub.f32 %v5311_v52, %v2163_v51 }
 0x7ae   : > { %v5387_v53 = vpop.eup %3573  ;;  %v2260_v5 = vmul.f32 1.442695, %v2199_v40  ;;  %v5991_v40 = vld [vmem:[#allocation11_spill] sm:$0xff] }
 0x7af   : > { %v3576_v10 = vpop.eup %3575  ;;  %2156 = vmax.xlane.f32.xlu1 %v2155_v54  ;;  %2159 = vmax.xlane.f32.xlu2 %v2158_v30  ;;  %v2335_v16 = vsel %vm2073_vm4, %v5387_v53, 0.0  ;;  %v5992_v54 = vmax.f32 %v5991_v40, 0.0 }
 0x7b0   : > { %2336 = vadd.xlane.f32.xlu0 %v2335_v16  ;;  %v2408_v7 = vmul.f32 %v3576_v10, %v5292_v44  ;;  %v5396_v52 = vpop.eup %3577  ;;  %3581 = vpow2.f32 %v2260_v5 }
 0x7b1   : > { %v2332_v11 = vsel %vm2073_vm4, %v5396_v52, 0.0  ;;  %v3580_v28 = vpop.eup %3579 }
 0x7b2   : > { %v2409_v25 = vmul.f32 %v3580_v28, %v5296_v47 }
 0x7b3   : > { %v2166_v62 = vpop.xlane.xlu0 %2165 }
 0x7b4   : > { %3286 = vmatmul.msk.f32.gmra.mxu0 %vm2073_vm4, %v2408_v7  ;;  %v2200_v5 = vsub.f32 %v5325_v2, %v2166_v62 }
 0x7b6   : > { %v5402_v26 = vpop.eup %3581 }
 0x7b7   : > { %2333 = vadd.xlane.f32.xlu1 %v2332_v11  ;;  %v2353_v44 = vsel %vm2073_vm4, %v5402_v26, 0.0 }
 0x7bc   : > { %3287 = vmatmul.msk.f32.gmra.mxu0 %vm2073_vm4, %v2409_v25 }
 0x7bf   : > { %2354 = vadd.xlane.f32.xlu1 %v2353_v44  ;;  %v2169_v44 = vpop.xlane.xlu0 %2168 }
 0x7d4   : > { %v2778_v47 = vpop.f32.mrf.mxu1 }
 0x7d5   : > { %v2779_v15 = vadd.f32 %v5410_v41, %v2778_v47 }
 0x7d7   : > { %v2878_v29 = vmul.f32 %v5415_v23, %v2779_v15 }
 0x7d8   : > { %v2322_v55 = vpop.xlane.xlu2 %2321 }
 0x7d9   : > { %v2914_v13 = vadd.f32 %v5421_v39, %v2878_v29 }
 0x7db   : > { %v2946_v1 = vadd.f32 %v2914_v13, %v5986_v21  ;;  %v5993_v13 = vld [vmem:[#allocation12_spill] sm:$0xff] }
 0x7dc   : > { %v2781_v20 = vpop.f32.mrf.mxu1  ;;  %v5994_v57 = vmax.f32 %v5993_v13, 0.0  ;;  %v5999_v13 = vld [vmem:[#allocation15_spill] sm:$0xff] }
 0x7dd   : > { %2979 = vst.msk [vmem:[%s4558_s26 + $0x8] sm:$0xff] %vm1220_vm2, %v2946_v1  ;;  %v2782_v38 = vadd.f32 %v5410_v41, %v2781_v20 }
 0x7df   : > { %v2879_v12 = vmul.f32 %v5415_v23, %v2782_v38 }
 0x7e1   : > { %v2915_v49 = vadd.f32 %v5421_v39, %v2879_v12  ;;  %v2201_v12 = vsub.f32 %v5329_v34, %v2169_v44 }
 0x7e3   : > { %v2947_v61 = vadd.f32 %v2915_v49, %v5988_v22 }
 0x7e4   : > { %v2784_v14 = vpop.f32.mrf.mxu1 }
 0x7e5   : > { %2981 = vst.msk [vmem:[%s4558_s26 + $0x18] sm:$0xff] %vm1220_vm2, %v2947_v61  ;;  %v2785_v18 = vadd.f32 %v5410_v41, %v2784_v14  ;;  %v2264_v61 = vmul.f32 1.442695, %v2201_v12 }
 0x7e7   : > { %v2880_v0 = vmul.f32 %v5415_v23, %v2785_v18 }
 0x7e9   : > { %v2916_v32 = vadd.f32 %v5421_v39, %v2880_v0 }
 0x7eb   : > { %v2948_v27 = vadd.f32 %v2916_v32, %v5990_v46  ;;  %v5995_v46 = vld [vmem:[#allocation13_spill] sm:$0xff] }
 0x7ed   : > { %2983 = vst.msk [vmem:[%s4558_s26 + $0x28] sm:$0xff] %vm1220_vm2, %v2948_v27  ;;  %v5996_v27 = vmax.f32 %v5995_v46, 0.0 }
 0x801   : > { %v2587_v42 = vpop.f32.mrf.mxu0 }
 0x802   : > { %3312 = vmatmul.msk.f32.gmra.mxu1 %vm629_vm0, %v2587_v42  ;;  %v2316_v3 = vpop.xlane.xlu1 %2315 }
 0x803   : > { %3583 = vrcp.f32 %v2316_v3 }
 0x804   : > { %v2787_v33 = vpop.f32.mrf.mxu1  ;;  %3585 = vrcp.f32 %v2319_v6 }
 0x805   : > { %v2788_v58 = vadd.f32 %v5410_v41, %v2787_v33 }
 0x807   : > { %v2881_v37 = vmul.f32 %v5415_v23, %v2788_v58 }
 0x809   : > { %v3584_v8 = vpop.eup %3583  ;;  %v2917_v59 = vadd.f32 %v5421_v39, %v2881_v37  ;;  %v2590_v35 = vpop.f32.mrf.mxu0 }
 0x80a   : > { %3313 = vmatmul.msk.f32.gmra.mxu1 %vm629_vm0, %v2590_v35  ;;  %v2148_v51 = vpop.xlane.xlu1 %2147  ;;  %v2410_v24 = vmul.f32 %v3584_v8, %v5347_v31  ;;  %v3586_v28 = vpop.eup %3585  ;;  %v2262_v31 = vmul.f32 1.442695, %v2200_v5 }
 0x80b   : > { %v2949_v30 = vadd.f32 %v2917_v59, %v5992_v54  ;;  %v2194_v10 = vsub.f32 %v5249_v19, %v2148_v51  ;;  %v2411_v29 = vmul.f32 %v3586_v28, %v5316_v43 }
 0x80c   : > { %3288 = vmatmul.msk.f32.gmra.mxu0 %vm2073_vm4, %v2410_v24  ;;  %v2790_v16 = vpop.f32.mrf.mxu1 }
 0x80d   : > { %2985 = vst.msk [vmem:[%s4558_s26 + $0x38] sm:$0xff] %vm1220_vm2, %v2949_v30  ;;  %v2250_v7 = vmul.f32 1.442695, %v2194_v10  ;;  %v2791_v11 = vadd.f32 %v5410_v41, %v2790_v16  ;;  %v5997_v10 = vld [vmem:[#allocation14_spill] sm:$0xff] }
 0x80e   : > { %v5998_v16 = vmax.f32 %v5997_v10, 0.0 }
 0x80f   : > { %3587 = vpow2.f32 %v2250_v7  ;;  %v2882_v25 = vmul.f32 %v5415_v23, %v2791_v11 }
 0x810   : > { %3589 = vrcp.f32 %v2322_v55 }
 0x811   : > { %v2918_v19 = vadd.f32 %v5421_v39, %v2882_v25  ;;  %v2593_v47 = vpop.f32.mrf.mxu0  ;;  %3591 = vpow2.f32 %v2262_v31 }
 0x812   : > { %3314 = vmatmul.msk.f32.gmra.mxu1 %vm629_vm0, %v2593_v47  ;;  %v2325_v15 = vpop.xlane.xlu2 %2324  ;;  %v2151_v2 = vpop.xlane.xlu1 %2150 }
 0x813   : > { %v2950_v21 = vadd.f32 %v2918_v19, %v5994_v57  ;;  %v2195_v1 = vsub.f32 %v5253_v9, %v2151_v2  ;;  %v6000_v57 = vmax.f32 %v5999_v13, 0.0 }
 0x814   : > { %3289 = vmatmul.msk.f32.gmra.mxu0 %vm2073_vm4, %v2411_v29  ;;  %v2793_v20 = vpop.f32.mrf.mxu1 }
 0x815   : > { %v5465_v38 = vpop.eup %3587  ;;  %2987 = vst.msk [vmem:[%s4558_s26 + $0x48] sm:$0xff] %vm1220_vm2, %v2950_v21  ;;  %v2252_v49 = vmul.f32 1.442695, %v2195_v1  ;;  %v2794_v56 = vadd.f32 %v5410_v41, %v2793_v20 }
 0x816   : > { %v2338_v43 = vsel %vm2073_vm4, %v5465_v38, 0.0  ;;  %v3590_v22 = vpop.eup %3589 }
 0x817   : > { %3593 = vpow2.f32 %v2252_v49  ;;  %v2883_v9 = vmul.f32 %v5415_v23, %v2794_v56  ;;  %2339 = vadd.xlane.f32.xlu2 %v2338_v43  ;;  %v2412_v32 = vmul.f32 %v3590_v22, %v5336_v17  ;;  %v5477_v50 = vpop.eup %3591  ;;  %v2331_v31 = vpop.xlane.xlu0 %2330 }
 0x818   : > { %3595 = vrcp.f32 %v2325_v15  ;;  %v2356_v17 = vsel %vm2073_vm4, %v5477_v50, 0.0 }
 0x819   : > { %v2919_v14 = vadd.f32 %v5421_v39, %v2883_v9  ;;  %v2596_v18 = vpop.f32.mrf.mxu0  ;;  %3597 = vpow2.f32 %v2264_v61 }
 0x81a   : > { %3315 = vmatmul.msk.f32.gmra.mxu1 %vm629_vm0, %v2596_v18  ;;  %v2328_v34 = vpop.xlane.xlu2 %2327  ;;  %v2154_v0 = vpop.xlane.xlu1 %2153 }
 0x81b   : > { %v2951_v42 = vadd.f32 %v2919_v14, %v5996_v27  ;;  %v2196_v6 = vsub.f32 %v5265_v60, %v2154_v0 }
 0x81c   : > { %3290 = vmatmul.msk.f32.gmra.mxu0 %vm2073_vm4, %v2412_v32 }
 0x81d   : > { %v5483_v3 = vpop.eup %3593  ;;  %2989 = vst.msk [vmem:[%s4558_s26 + $0x58] sm:$0xff] %vm1220_vm2, %v2951_v42  ;;  %v2254_v33 = vmul.f32 1.442695, %v2196_v6  ;;  %v2796_v58 = vpop.f32.mrf.mxu1  ;;  %v6001_v6 = vld [vmem:[#allocation16_spill] sm:$0xff] }
 0x81e   : > { %v2797_v62 = vadd.f32 %v5410_v41, %v2796_v58  ;;  %v2341_v37 = vsel %vm2073_vm4, %v5483_v3, 0.0  ;;  %v3596_v8 = vpop.eup %3595 }
 0x81f   : > { %3599 = vpow2.f32 %v2254_v33  ;;  %2357 = vadd.xlane.f32.xlu2 %v2356_v17  ;;  %2342 = vadd.xlane.f32.xlu0 %v2341_v37  ;;  %v2413_v24 = vmul.f32 %v3596_v8, %v5362_v36  ;;  %v5496_v40 = vpop.eup %3597  ;;  %v6002_v33 = vmax.f32 %v6001_v6, 0.0  ;;  %v6011_v6 = vld [vmem:[#allocation21_spill] sm:$0xff] }
 0x820   : > { %v2884_v60 = vmul.f32 %v5415_v23, %v2797_v62  ;;  %3601 = vrcp.f32 %v2328_v34 }
 0x821   : > { %v2599_v59 = vpop.f32.mrf.mxu0 }
 0x822   : > { %v2920_v35 = vadd.f32 %v5421_v39, %v2884_v60  ;;  %3316 = vmatmul.msk.f32.gmra.mxu1 %vm629_vm0, %v2599_v59  ;;  %v2157_v55 = vpop.xlane.xlu1 %2156  ;;  %v2160_v51 = vpop.xlane.xlu2 %2159  ;;  %v6003_v60 = vld [vmem:[#allocation17_spill] sm:$0xff] }
 0x823   : > { %v2197_v54 = vsub.f32 %v5281_v48, %v2157_v55  ;;  %v2198_v30 = vsub.f32 %v5298_v4, %v2160_v51  ;;  %v2359_v4 = vsel %vm2073_vm4, %v5496_v40, 0.0  ;;  %v2337_v9 = vpop.xlane.xlu0 %2336  ;;  %v6004_v59 = vmax.f32 %v6003_v60, 0.0  ;;  %v6013_v60 = vld [vmem:[#allocation22_spill] sm:$0xff] }
 0x824   : > { %v2952_v5 = vadd.f32 %v2920_v35, %v5998_v16  ;;  %3291 = vmatmul.msk.f32.gmra.mxu0 %vm2073_vm4, %v2413_v24 }
 0x825   : > { %v5503_v7 = vpop.eup %3599  ;;  %v2256_v11 = vmul.f32 1.442695, %v2197_v54  ;;  %v2258_v28 = vmul.f32 1.442695, %v2198_v30  ;;  %v2799_v25 = vpop.f32.mrf.mxu1 }
 0x826   : > { %2991 = vst.msk [vmem:[%s4558_s26 + $0x68] sm:$0xff] %vm1220_vm2, %v2952_v5  ;;  %v2800_v36 = vadd.f32 %v5410_v41, %v2799_v25  ;;  %v2344_v48 = vsel %vm2073_vm4, %v5503_v7, 0.0  ;;  %v3602_v44 = vpop.eup %3601 }
 0x827   : > { %3603 = vpow2.f32 %v2256_v11  ;;  %2345 = vadd.xlane.f32.xlu1 %v2344_v48  ;;  %2360 = vadd.xlane.f32.xlu0 %v2359_v4  ;;  %v2414_v29 = vmul.f32 %v3602_v44, %v5372_v63 }
 0x828   : > { %3605 = vpow2.f32 %v2258_v28  ;;  %v2885_v19 = vmul.f32 %v5415_v23, %v2800_v36  ;;  %v6005_v28 = vld [vmem:[#allocation18_spill] sm:$0xff] }
 0x829   : > { %3607 = vrcp.f32 %v2331_v31  ;;  %v2602_v47 = vpop.f32.mrf.mxu0  ;;  %v6006_v25 = vmax.f32 %v6005_v28, 0.0 }
 0x82a   : > { %v2921_v15 = vadd.f32 %v5421_v39, %v2885_v19  ;;  %3317 = vmatmul.msk.f32.gmra.mxu1 %vm629_vm0, %v2602_v47  ;;  %v2334_v2 = vpop.xlane.xlu1 %2333 }
 0x82b   : > { %3609 = vrcp.f32 %v2334_v2 }
 0x82c   : > { %v2953_v21 = vadd.f32 %v2921_v15, %v6000_v57  ;;  %3292 = vmatmul.msk.f32.gmra.mxu0 %vm2073_vm4, %v2414_v29  ;;  %v6007_v57 = vld [vmem:[#allocation19_spill] sm:$0xff] }
 0x82d   : > { %v5519_v1 = vpop.eup %3603 }
 0x82e   : > { %v5521_v20 = vpop.eup %3605  ;;  %2993 = vst.msk [vmem:[%s4558_s26 + $0x78] sm:$0xff] %vm1220_vm2, %v2953_v21  ;;  %v2347_v12 = vsel %vm2073_vm4, %v5519_v1, 0.0  ;;  %v6008_v21 = vmax.f32 %v6007_v57, 0.0 }
 0x82f   : > { %v3608_v49 = vpop.eup %3607  ;;  %v2350_v56 = vsel %vm2073_vm4, %v5521_v20, 0.0  ;;  %2348 = vadd.xlane.f32.xlu2 %v2347_v12 }
 0x830   : > { %2351 = vadd.xlane.f32.xlu1 %v2350_v56  ;;  %v2415_v22 = vmul.f32 %v3608_v49, %v5369_v45 }
 0x831   : > { %v2605_v63 = vpop.f32.mrf.mxu0  ;;  %v3610_v61 = vpop.eup %3609 }
 0x832   : > { %3318 = vmatmul.msk.f32.gmra.mxu1 %vm629_vm0, %v2605_v63  ;;  %v2355_v43 = vpop.xlane.xlu1 %2354  ;;  %v2416_v0 = vmul.f32 %v3610_v61, %v5396_v52 }
 0x833   : > { %3611 = vrcp.f32 %v2355_v43 }
 0x834   : > { %3293 = vmatmul.msk.f32.gmra.mxu0 %vm2073_vm4, %v2415_v22  ;;  %3613 = vrcp.f32 %v2337_v9 }
 0x839   : > { %v3612_v14 = vpop.eup %3611  ;;  %v2608_v18 = vpop.f32.mrf.mxu0 }
 0x83a   : > { %v2423_v34 = vmul.f32 %v3612_v14, %v5402_v26  ;;  %3319 = vmatmul.msk.f32.gmra.mxu1 %vm629_vm0, %v2608_v18  ;;  %v3614_v45 = vpop.eup %3613  ;;  %v6009_v18 = vld [vmem:[#allocation20_spill] sm:$0xff] }
 0x83b   : > { %v2417_v32 = vmul.f32 %v3614_v45, %v5387_v53 }
 0x83c   : > { %3294 = vmatmul.msk.f32.gmra.mxu0 %vm2073_vm4, %v2416_v0  ;;  %3301 = vmatmul.msk.f32.vlgmr.msra.gmra.mxu3 %vm2073_vm4, %v2423_v34  ;;  %v6010_v34 = vmax.f32 %v6009_v18, 0.0 }
 0x844   : > { %3295 = vmatmul.msk.f32.gmra.mxu0 %vm2073_vm4, %v2417_v32 }
 0x87f   : > { %v2802_v46 = vpop.f32.mrf.mxu1 }
 0x880   : > { %v2803_v27 = vadd.f32 %v5410_v41, %v2802_v46 }
 0x882   : > { %v2886_v42 = vmul.f32 %v5415_v23, %v2803_v27 }
 0x884   : > { %v2922_v26 = vadd.f32 %v5421_v39, %v2886_v42 }
 0x886   : > { %v2954_v52 = vadd.f32 %v2922_v26, %v6002_v33  ;;  %v6012_v33 = vmax.f32 %v6011_v6, 0.0  ;;  %v6025_v6 = vld [vmem:[#allocation28_spill] sm:$0xff] }
 0x887   : > { %v2805_v58 = vpop.f32.mrf.mxu1 }
 0x888   : > { %2995 = vst.msk [vmem:[%s4558_s26 + $0x88] sm:$0xff] %vm1220_vm2, %v2954_v52  ;;  %v2806_v62 = vadd.f32 %v5410_v41, %v2805_v58 }
 0x889   : > { %v2611_v17 = vpop.f32.mrf.mxu0 }
 0x88a   : > { %v2887_v53 = vmul.f32 %v5415_v23, %v2806_v62  ;;  %3320 = vmatmul.msk.f32.gmra.mxu1 %vm629_vm0, %v2611_v17  ;;  %v2340_v37 = vpop.xlane.xlu2 %2339 }
 0x88b   : > { %3615 = vrcp.f32 %v2340_v37 }
 0x88c   : > { %v2923_v8 = vadd.f32 %v5421_v39, %v2887_v53 }
 0x88e   : > { %v2955_v35 = vadd.f32 %v2923_v8, %v6004_v59  ;;  %v6014_v59 = vmax.f32 %v6013_v60, 0.0 }
 0x88f   : > { %v2808_v55 = vpop.f32.mrf.mxu1 }
 0x890   : > { %2997 = vst.msk [vmem:[%s4558_s26 + $0x98] sm:$0xff] %vm1220_vm2, %v2955_v35  ;;  %v2809_v51 = vadd.f32 %v5410_v41, %v2808_v55 }
 0x891   : > { %v3616_v24 = vpop.eup %3615  ;;  %v2614_v54 = vpop.f32.mrf.mxu0 }
 0x892   : > { %v2888_v30 = vmul.f32 %v5415_v23, %v2809_v51  ;;  %3321 = vmatmul.msk.f32.gmra.mxu1 %vm629_vm0, %v2614_v54  ;;  %v2358_v10 = vpop.xlane.xlu2 %2357  ;;  %v2343_v16 = vpop.xlane.xlu0 %2342  ;;  %v2418_v5 = vmul.f32 %v3616_v24, %v5465_v38 }
 0x893   : > { %3617 = vrcp.f32 %v2358_v10 }
 0x894   : > { %v2924_v11 = vadd.f32 %v5421_v39, %v2888_v30  ;;  %3619 = vrcp.f32 %v2343_v16  ;;  %3296 = vmatmul.msk.f32.gmra.mxu0 %vm2073_vm4, %v2418_v5  ;;  %v6015_v30 = vld [vmem:[#allocation23_spill] sm:$0xff] }
 0x895   : > { %v6016_v10 = vmax.f32 %v6015_v30, 0.0 }
 0x896   : > { %v2956_v31 = vadd.f32 %v2924_v11, %v6006_v25 }
 0x897   : > { %v2811_v36 = vpop.f32.mrf.mxu1 }
 0x898   : > { %2999 = vst.msk [vmem:[%s4558_s26 + $0xa8] sm:$0xff] %vm1220_vm2, %v2956_v31  ;;  %v2812_v48 = vadd.f32 %v5410_v41, %v2811_v36 }
 0x899   : > { %v3618_v4 = vpop.eup %3617  ;;  %v2617_v44 = vpop.f32.mrf.mxu0 }
 0x89a   : > { %v3620_v19 = vpop.eup %3619  ;;  %v2889_v38 = vmul.f32 %v5415_v23, %v2812_v48  ;;  %3322 = vmatmul.msk.f32.gmra.mxu1 %vm629_vm0, %v2617_v44  ;;  %v2346_v47 = vpop.xlane.xlu1 %2345  ;;  %v2424_v2 = vmul.f32 %v3618_v4, %v5477_v50  ;;  %v6017_v48 = vld [vmem:[#allocation24_spill] sm:$0xff] }
 0x89b   : > { %v2361_v15 = vpop.xlane.xlu0 %2360  ;;  %3621 = vrcp.f32 %v2346_v47  ;;  %v2419_v29 = vmul.f32 %v3620_v19, %v5483_v3  ;;  %v6018_v4 = vmax.f32 %v6017_v48, 0.0 }
 0x89c   : > { %v2925_v13 = vadd.f32 %v5421_v39, %v2889_v38  ;;  %3623 = vrcp.f32 %v2361_v15  ;;  %3302 = vmatmul.msk.f32.gmra.mxu3 %vm2073_vm4, %v2424_v2 }
 0x89d   : > { %3297 = vmatmul.msk.f32.gmra.mxu0 %vm2073_vm4, %v2419_v29  ;;  %v6019_v29 = vld [vmem:[#allocation25_spill] sm:$0xff] }
 0x89e   : > { %v2957_v12 = vadd.f32 %v2925_v13, %v6008_v21  ;;  %v6020_v13 = vmax.f32 %v6019_v29, 0.0 }
 0x89f   : > { %v2814_v49 = vpop.f32.mrf.mxu1 }
 0x8a0   : > { %3001 = vst.msk [vmem:[%s4558_s26 + $0xb8] sm:$0xff] %vm1220_vm2, %v2957_v12  ;;  %v2815_v56 = vadd.f32 %v5410_v41, %v2814_v49 }
 0x8a1   : > { %v3622_v50 = vpop.eup %3621  ;;  %v2620_v63 = vpop.f32.mrf.mxu0 }
 0x8a2   : > { %v3624_v43 = vpop.eup %3623  ;;  %v2890_v3 = vmul.f32 %v5415_v23, %v2815_v56  ;;  %3323 = vmatmul.msk.f32.gmra.mxu1 %vm629_vm0, %v2620_v63  ;;  %v2349_v22 = vpop.xlane.xlu2 %2348  ;;  %v2420_v9 = vmul.f32 %v3622_v50, %v5503_v7  ;;  %v6021_v63 = vld [vmem:[#allocation26_spill] sm:$0xff] }
 0x8a3   : > { %v2425_v61 = vmul.f32 %v3624_v43, %v5496_v40  ;;  %3625 = vrcp.f32 %v2349_v22  ;;  %v2352_v45 = vpop.xlane.xlu1 %2351  ;;  %v6022_v43 = vmax.f32 %v6021_v63, 0.0  ;;  %v6037_v63 = vld [vmem:[#allocation33_spill] sm:$0xff] }
 0x8a4   : > { %v2926_v14 = vadd.f32 %v5421_v39, %v2890_v3  ;;  %3627 = vrcp.f32 %v2352_v45 }
 0x8a5   : > { %3298 = vmatmul.msk.f32.gmra.mxu0 %vm2073_vm4, %v2420_v9  ;;  %3303 = vmatmul.msk.f32.gmra.mxu3 %vm2073_vm4, %v2425_v61 }
 0x8a6   : > { %v2958_v0 = vadd.f32 %v2926_v14, %v6010_v34 }
 0x8a7   : > { %v2817_v32 = vpop.f32.mrf.mxu1 }
 0x8a8   : > { %3003 = vst.msk [vmem:[%s4558_s26 + $0xc8] sm:$0xff] %vm1220_vm2, %v2958_v0  ;;  %v2818_v46 = vadd.f32 %v5410_v41, %v2817_v32  ;;  %v6023_v0 = vld [vmem:[#allocation27_spill] sm:$0xff] }
 0x8a9   : > { %v3626_v7 = vpop.eup %3625  ;;  %v2623_v27 = vpop.f32.mrf.mxu0  ;;  %v6024_v45 = vmax.f32 %v6023_v0, 0.0 }
 0x8aa   : > { %v2421_v40 = vmul.f32 %v3626_v7, %v5519_v1  ;;  %v2891_v42 = vmul.f32 %v5415_v23, %v2818_v46  ;;  %3324 = vmatmul.msk.f32.gmra.mxu1 %vm629_vm0, %v2623_v27  ;;  %v3628_v62 = vpop.eup %3627 }
 0x8ab   : > { %v2422_v37 = vmul.f32 %v3628_v62, %v5521_v20 }
 0x8ac   : > { %v2927_v26 = vadd.f32 %v5421_v39, %v2891_v42 }
 0x8ad   : > { %3299 = vmatmul.msk.f32.gmra.mxu0 %vm2073_vm4, %v2421_v40 }
 0x8ae   : > { %v2959_v52 = vadd.f32 %v2927_v26, %v6012_v33  ;;  %v6026_v33 = vmax.f32 %v6025_v6, 0.0 }
 0x8af   : > { %v2820_v58 = vpop.f32.mrf.mxu1 }
 0x8b0   : > { %3005 = vst.msk [vmem:[%s4558_s26 + $0xd8] sm:$0xff] %vm1220_vm2, %v2959_v52  ;;  %v2821_v17 = vadd.f32 %v5410_v41, %v2820_v58 }
 0x8b1   : > { %v2626_v53 = vpop.f32.mrf.mxu0 }
 0x8b2   : > { %v2892_v1 = vmul.f32 %v5415_v23, %v2821_v17  ;;  %3325 = vmatmul.msk.f32.gmra.mxu1 %vm629_vm0, %v2626_v53 }
 0x8b4   : > { %v2928_v8 = vadd.f32 %v5421_v39, %v2892_v1 }
 0x8b5   : > { %3300 = vmatmul.msk.f32.gmra.mxu0 %vm2073_vm4, %v2422_v37  ;;  %v6027_v37 = vld [vmem:[#allocation29_spill] sm:$0xff] }
 0x8b6   : > { %v2960_v35 = vadd.f32 %v2928_v8, %v6014_v59  ;;  %v6028_v8 = vmax.f32 %v6027_v37, 0.0 }
 0x8b7   : > { %v2823_v55 = vpop.f32.mrf.mxu1 }
 0x8b8   : > { %3007 = vst.msk [vmem:[%s4558_s26 + $0xe8] sm:$0xff] %vm1220_vm2, %v2960_v35  ;;  %v2824_v51 = vadd.f32 %v5410_v41, %v2823_v55 }
 0x8b9   : > { %v2629_v24 = vpop.f32.mrf.mxu0 }
 0x8ba   : > { %v2893_v54 = vmul.f32 %v5415_v23, %v2824_v51  ;;  %3326 = vmatmul.msk.f32.gmra.mxu1 %vm629_vm0, %v2629_v24  ;;  %v6029_v24 = vld [vmem:[#allocation30_spill] sm:$0xff] }
 0x8bc   : > { %v2929_v20 = vadd.f32 %v5421_v39, %v2893_v54  ;;  %v6030_v54 = vmax.f32 %v6029_v24, 0.0 }
 0x8be   : > { %v2961_v16 = vadd.f32 %v2929_v20, %v6016_v10 }
 0x8bf   : > { %v2650_v5 = vpop.f32.mrf.mxu3 }
 0x8c0   : > { %3009 = vst.msk [vmem:[%s4558_s26 + $0xf8] sm:$0xff] %vm1220_vm2, %v2961_v16  ;;  %3333 = vmatmul.msk.f32.vlgmr.msrb.gmra.mxu3 %vm629_vm0, %v2650_v5 }
 0x8c1   : > { %v2632_v11 = vpop.f32.mrf.mxu0 }
 0x8c2   : > { %3327 = vmatmul.msk.f32.gmra.mxu1 %vm629_vm0, %v2632_v11 }
 0x907   : > { %v2826_v28 = vpop.f32.mrf.mxu1 }
 0x908   : > { %v2827_v25 = vadd.f32 %v5410_v41, %v2826_v28 }
 0x90a   : > { %v2894_v31 = vmul.f32 %v5415_v23, %v2827_v25  ;;  %v6031_v25 = vld [vmem:[#allocation31_spill] sm:$0xff] }
 0x90c   : > { %v2930_v36 = vadd.f32 %v5421_v39, %v2894_v31  ;;  %v6032_v31 = vmax.f32 %v6031_v25, 0.0 }
 0x90e   : > { %v2962_v44 = vadd.f32 %v2930_v36, %v6018_v4 }
 0x90f   : > { %v2829_v19 = vpop.f32.mrf.mxu1 }
 0x910   : > { %3011 = vst.msk [vmem:[%s4558_s26 + $0x108] sm:$0xff] %vm1220_vm2, %v2962_v44  ;;  %v2830_v38 = vadd.f32 %v5410_v41, %v2829_v19  ;;  %v6033_v44 = vld [vmem:[#allocation37_spill] sm:$0xff] }
 0x911   : > { %v2635_v47 = vpop.f32.mrf.mxu0  ;;  %v6034_v19 = vmax.f32 %v6033_v44, 0.0 }
 0x912   : > { %v2895_v15 = vmul.f32 %v5415_v23, %v2830_v38  ;;  %3328 = vmatmul.msk.f32.gmra.mxu1 %vm629_vm0, %v2635_v47 }
 0x914   : > { %v2931_v2 = vadd.f32 %v5421_v39, %v2895_v15 }
 0x916   : > { %v2963_v57 = vadd.f32 %v2931_v2, %v6020_v13  ;;  %v6035_v13 = vld [vmem:[#allocation32_spill] sm:$0xff] }
 0x917   : > { %v2832_v21 = vpop.f32.mrf.mxu1 }
 0x918   : > { %3013 = vst.msk [vmem:[%s4558_s26 + $0x118] sm:$0xff] %vm1220_vm2, %v2963_v57  ;;  %v2833_v12 = vadd.f32 %v5410_v41, %v2832_v21  ;;  %v6036_v57 = vmax.f32 %v6035_v13, 0.0 }
 0x91a   : > { %v2896_v49 = vmul.f32 %v5415_v23, %v2833_v12  ;;  %v2638_v56 = vpop.f32.mrf.mxu0 }
 0x91b   : > { %3329 = vmatmul.msk.f32.gmra.mxu1 %vm629_vm0, %v2638_v56 }
 0x91c   : > { %v2932_v50 = vadd.f32 %v5421_v39, %v2896_v49 }
 0x91e   : > { %v2964_v3 = vadd.f32 %v2932_v50, %v6022_v43  ;;  %v6038_v43 = vmax.f32 %v6037_v63, 0.0 }
 0x91f   : > { %v2653_v22 = vpop.f32.mrf.mxu3  ;;  %v2835_v9 = vpop.f32.mrf.mxu1 }
 0x920   : > { %3015 = vst.msk [vmem:[%s4558_s26 + $0x128] sm:$0xff] %vm1220_vm2, %v2964_v3  ;;  %v2836_v61 = vadd.f32 %v5410_v41, %v2835_v9  ;;  %3334 = vmatmul.msk.f32.gmra.mxu3 %vm629_vm0, %v2653_v22 }
 0x922   : > { %v2897_v14 = vmul.f32 %v5415_v23, %v2836_v61  ;;  %v2641_v18 = vpop.f32.mrf.mxu0 }
 0x923   : > { %3330 = vmatmul.msk.f32.gmra.mxu1 %vm629_vm0, %v2641_v18 }
 0x924   : > { %v2933_v34 = vadd.f32 %v5421_v39, %v2897_v14 }
 0x926   : > { %v2965_v32 = vadd.f32 %v2933_v34, %v6024_v45  ;;  %v6039_v45 = vld [vmem:[#allocation34_spill] sm:$0xff] }
 0x927   : > { %v2838_v46 = vpop.f32.mrf.mxu1 }
 0x928   : > { %3017 = vst.msk [vmem:[%s4558_s26 + $0x138] sm:$0xff] %vm1220_vm2, %v2965_v32  ;;  %v2656_v7 = vpop.f32.mrf.mxu3  ;;  %v2839_v27 = vadd.f32 %v5410_v41, %v2838_v46  ;;  %v6040_v32 = vmax.f32 %v6039_v45, 0.0 }
 0x929   : > { %3335 = vmatmul.msk.f32.gmra.mxu3 %vm629_vm0, %v2656_v7 }
 0x92a   : > { %v2898_v40 = vmul.f32 %v5415_v23, %v2839_v27  ;;  %v2644_v42 = vpop.f32.mrf.mxu0 }
 0x92b   : > { %3331 = vmatmul.msk.f32.gmra.mxu1 %vm629_vm0, %v2644_v42  ;;  %v6041_v42 = vld [vmem:[#allocation38_spill] sm:$0xff] }
 0x92c   : > { %v2934_v26 = vadd.f32 %v5421_v39, %v2898_v40 }
 0x92e   : > { %v2966_v52 = vadd.f32 %v2934_v26, %v6026_v33  ;;  %v6042_v26 = vmax.f32 %v6041_v42, 0.0 }
 0x92f   : > { %v2841_v58 = vpop.f32.mrf.mxu1 }
 0x930   : > { %3019 = vst.msk [vmem:[%s4558_s26 + $0x148] sm:$0xff] %vm1220_vm2, %v2966_v52  ;;  %v2842_v62 = vadd.f32 %v5410_v41, %v2841_v58 }
 0x932   : > { %v2899_v17 = vmul.f32 %v5415_v23, %v2842_v62  ;;  %v2647_v53 = vpop.f32.mrf.mxu0 }
 0x933   : > { %3332 = vmatmul.msk.f32.gmra.mxu1 %vm629_vm0, %v2647_v53 }
 0x934   : > { %v2935_v1 = vadd.f32 %v5421_v39, %v2899_v17  ;;  %v6043_v17 = vld [vmem:[#allocation35_spill] sm:$0xff] }
 0x935   : > { %v6044_v53 = vmax.f32 %v6043_v17, 0.0 }
 0x936   : > { %v2967_v60 = vadd.f32 %v2935_v1, %v6028_v8 }
 0x937   : > { %v2844_v59 = vpop.f32.mrf.mxu1 }
 0x938   : > { %3021 = vst.msk [vmem:[%s4558_s26 + $0x158] sm:$0xff] %vm1220_vm2, %v2967_v60  ;;  %v2845_v35 = vadd.f32 %v5410_v41, %v2844_v59 }
 0x93a   : > { %v2900_v55 = vmul.f32 %v5415_v23, %v2845_v35  ;;  %v6045_v35 = vld [vmem:[#allocation39_spill] sm:$0xff] }
 0x93c   : > { %v2936_v51 = vadd.f32 %v5421_v39, %v2900_v55  ;;  %v6046_v55 = vmax.f32 %v6045_v35, 0.0 }
 0x93e   : > { %v2968_v20 = vadd.f32 %v2936_v51, %v6030_v54 }
 0x93f   : > { %v2847_v30 = vpop.f32.mrf.mxu1 }
 0x940   : > { %3023 = vst.msk [vmem:[%s4558_s26 + $0x168] sm:$0xff] %vm1220_vm2, %v2968_v20  ;;  %v2848_v10 = vadd.f32 %v5410_v41, %v2847_v30  ;;  %v6047_v20 = vld [vmem:[#allocation36_spill] sm:$0xff] }
 0x941   : > { %v6048_v30 = vmax.f32 %v6047_v20, 0.0 }
 0x942   : > { %v2901_v16 = vmul.f32 %v5415_v23, %v2848_v10 }
 0x943   : > { %v2865_v5 = vpop.f32.mrf.mxu3 }
 0x944   : > { %v2937_v11 = vadd.f32 %v5421_v39, %v2901_v16  ;;  %v2866_v28 = vadd.f32 %v5410_v41, %v2865_v5 }
 0x946   : > { %v2969_v36 = vadd.f32 %v2937_v11, %v6032_v31  ;;  %v2907_v48 = vmul.f32 %v5415_v23, %v2866_v28 }
 0x948   : > { %3025 = vst.msk [vmem:[%s4558_s26 + $0x178] sm:$0xff] %vm1220_vm2, %v2969_v36  ;;  %v2943_v4 = vadd.f32 %v5421_v39, %v2907_v48 }
 0x94a   : > { %v2975_v38 = vadd.f32 %v2943_v4, %v6034_v19 }
 0x94c   : > { %3037 = vst.msk [vmem:[%s4558_s26 + $0x1d8] sm:$0xff] %vm1220_vm2, %v2975_v38 }
 0x98f   : > { %v2850_v47 = vpop.f32.mrf.mxu1 }
 0x990   : > { %v2851_v15 = vadd.f32 %v5410_v41, %v2850_v47 }
 0x992   : > { %v2902_v2 = vmul.f32 %v5415_v23, %v2851_v15 }
 0x994   : > { %v2938_v29 = vadd.f32 %v5421_v39, %v2902_v2 }
 0x996   : > { %v2970_v21 = vadd.f32 %v2938_v29, %v6036_v57 }
 0x998   : > { %3027 = vst.msk [vmem:[%s4558_s26 + $0x188] sm:$0xff] %vm1220_vm2, %v2970_v21  ;;  %v2853_v12 = vpop.f32.mrf.mxu1 }
 0x999   : > { %v2854_v49 = vadd.f32 %v5410_v41, %v2853_v12 }
 0x99b   : > { %v2903_v56 = vmul.f32 %v5415_v23, %v2854_v49 }
 0x99d   : > { %v2939_v50 = vadd.f32 %v5421_v39, %v2903_v56 }
 0x99f   : > { %v2971_v3 = vadd.f32 %v2939_v50, %v6038_v43 }
 0x9a0   : > { %v2856_v22 = vpop.f32.mrf.mxu1 }
 0x9a1   : > { %3029 = vst.msk [vmem:[%s4558_s26 + $0x198] sm:$0xff] %vm1220_vm2, %v2971_v3  ;;  %v2857_v9 = vadd.f32 %v5410_v41, %v2856_v22 }
 0x9a3   : > { %v2904_v61 = vmul.f32 %v5415_v23, %v2857_v9  ;;  %v2868_v14 = vpop.f32.mrf.mxu3 }
 0x9a4   : > { %v2869_v18 = vadd.f32 %v5410_v41, %v2868_v14 }
 0x9a5   : > { %v2940_v34 = vadd.f32 %v5421_v39, %v2904_v61 }
 0x9a6   : > { %v2908_v0 = vmul.f32 %v5415_v23, %v2869_v18 }
 0x9a7   : > { %v2972_v46 = vadd.f32 %v2940_v34, %v6040_v32 }
 0x9a8   : > { %v2944_v7 = vadd.f32 %v5421_v39, %v2908_v0  ;;  %v2859_v27 = vpop.f32.mrf.mxu1 }
 0x9a9   : > { %3031 = vst.msk [vmem:[%s4558_s26 + $0x1a8] sm:$0xff] %vm1220_vm2, %v2972_v46  ;;  %v2860_v40 = vadd.f32 %v5410_v41, %v2859_v27 }
 0x9aa   : > { %v2976_v6 = vadd.f32 %v2944_v7, %v6042_v26 }
 0x9ab   : > { %v2905_v33 = vmul.f32 %v5415_v23, %v2860_v40 }
 0x9ac   : > { %3039 = vst.msk [vmem:[%s4558_s26 + $0x1e8] sm:$0xff] %vm1220_vm2, %v2976_v6  ;;  %v2871_v52 = vpop.f32.mrf.mxu3 }
 0x9ad   : > { %v2941_v58 = vadd.f32 %v5421_v39, %v2905_v33  ;;  %v2872_v62 = vadd.f32 %v5410_v41, %v2871_v52 }
 0x9af   : > { %v2973_v1 = vadd.f32 %v2941_v58, %v6044_v53  ;;  %v2909_v37 = vmul.f32 %v5415_v23, %v2872_v62 }
 0x9b0   : > { %v2862_v8 = vpop.f32.mrf.mxu1 }
 0x9b1   : > { %3033 = vst.msk [vmem:[%s4558_s26 + $0x1b8] sm:$0xff] %vm1220_vm2, %v2973_v1  ;;  %v2945_v60 = vadd.f32 %v5421_v39, %v2909_v37  ;;  %v2863_v59 = vadd.f32 %v5410_v41, %v2862_v8 }
 0x9b3   : > { %v2977_v51 = vadd.f32 %v2945_v60, %v6046_v55  ;;  %v2906_v24 = vmul.f32 %v5415_v23, %v2863_v59 }
 0x9b5   : > { %3041 = vst.msk [vmem:[%s4558_s26 + $0x1f8] sm:$0xff] %vm1220_vm2, %v2977_v51  ;;  %v2942_v54 = vadd.f32 %v5421_v39, %v2906_v24 }
 0x9b7   : > { %v2974_v10 = vadd.f32 %v2942_v54, %v6048_v30 }
 0x9b9   : > { %3035 = vst.msk [vmem:[%s4558_s26 + $0x1c8] sm:$0xff] %vm1220_vm2, %v2974_v10 }
 0x9ba   : > { %3656 = shalt.err (!%p3653_p3)
}
 0x9bb   : > { %s3694_s26 = smov 256   ;;  %s3695_s16 = smov 16  }
 0x9bc   : > { %3353 = dma.vmem_to_hbm [thread:$0]  (%p3814_p5), %s3056_s22, 8192, %s3058_s30, %s3043_s17, %s3694_s26, %s3694_s26, %s3695_s16  }
 0x9bd PF: > { %p3359_p4 = scmp.ge.s32.totalorder %s3691_s21, 2  ;;  %s3072_s20 = sand.u32 1, %s3679_s18  }
 0x9be   : > { %s3073_s25 = scalar_lea.sflag [#allocation3], %s3072_s20 }
 0x9bf   : > { %p3356_p7 = pnand %p3359_p4, %p3818_p6 }
 0x9c1   : > { %p3357_p8 = pneg %p3356_p7 }
 0x9c3   : > { %3674 = dma.done.wait (%p3357_p8), %s3073_s25, 8192  }
 0x9c4   : > { %3676 = vsyncadd (%p3357_p8), %s3073_s25, 4294959104  ;;  %s6050_s21 = sld [smem:[#allocation6_spill]]  ;;  %s6053_s18 = smov %s3683_s19 }
 0x9c5   : > { %s6051_s1 = sld [smem:[#allocation5_spill]] }
 0x9c6   : > { %s6052_s20 = sld [smem:[#allocation7_spill]] }
 0x9ca   : > { %p25_p9 = scmp.ge.s32.totalorder %s6050_s21, 4  }
 0x9cb   : > { %s6054_s19 = smov %s6051_s1 }
 0x9cc   :  { %27 = sbr.rel (!%p25_p9) target bundleno = 6 (0x6), region = 115 }
 0x9d1   :  { %3079 = vsyncpa [#allocation3], 1 }
 0x9d2   :  { %3081 = vsyncpa [#allocation3 + $0x1], 1 }

</bundles_post_ra>
